<compile_context>
chip_gen: v5e
topology: v5e:2x2
jax: 0.10.0
libtpu: 0.0.40
codegen_flags: <defaults>
</compile_context>

<pallas_src>
import jax
import jax.numpy as jnp
from jax import lax
from jax.experimental import pallas as pl
from jax.experimental.pallas import tpu as pltpu


# ---------------------------------------------------------------------------
# Fused Pallas kernel (embedding + all LSTM layers + FC head in one call)
# ---------------------------------------------------------------------------
def make_sentiment_kernel(n_layers, seq_len, batch_pad, hidden, vocab):
    T, B, H, V = seq_len, batch_pad, hidden, vocab

    def kernel(*refs):
        # --- unpack refs: inputs..., output, scratch ---
        len_ref = refs[0]                        # (B, 1)      i32  lengths (0 for pad rows)
        tok_ref = refs[1]                        # (T*B, 1)    i32  token ids (time-major, flat)
        emb_ref = refs[2]                        # (V, E)      f32  embedding table (pad row zero)
        layer_refs = [refs[3 + 3 * l: 3 + 3 * (l + 1)] for l in range(n_layers)]
        fcw_ref = refs[3 + 3 * n_layers]         # (2H, O)
        fcb_ref = refs[4 + 3 * n_layers]         # (1, O)
        logits_ref = refs[5 + 3 * n_layers]      # (B, O)      output
        act_sc = refs[6 + 3 * n_layers]          # (T*B, 2H)   inter-layer activations
        xproj_sc = refs[7 + 3 * n_layers]        # (T*B, 8H)   fused fwd+bwd input projection

        # --- Fused embedding lookup: one-hot matmul on the MXU.  Exact vs.
        # gather: exactly one row is selected, zeros contribute 0.0. ---
        vocab_iota = lax.broadcasted_iota(jnp.int32, (T * B, V), 1)
        onehot = (vocab_iota == tok_ref[...]).astype(jnp.float32)
        x0 = jnp.dot(onehot, emb_ref[...], preferred_element_type=jnp.float32)

        # Hoisted lane-broadcast length threshold: per-step validity becomes a
        # pure VPU compare (no per-step (B,1)->(B,H) cross-lane broadcasts).
        len_h = jnp.broadcast_to(len_ref[...], (B, H))          # (B, H) i32

        # Defensive: act_sc is scratch; zero it once so a read of any row the
        # previous layer skipped can never pick up stale VMEM.
        act_sc[...] = jnp.zeros_like(act_sc)

        def half_cell(gates, c_prev, valid):
            # Gate order (i, f, o, g): ONE sigmoid over the contiguous 3H
            # strip + ONE tanh over the H strip (no lane-mask select).
            sig = jax.nn.sigmoid(gates[:, 0:3 * H])
            g_g = jnp.tanh(gates[:, 3 * H:4 * H])
            i_g = sig[:, 0:H]
            f_g = sig[:, H:2 * H]
            o_g = sig[:, 2 * H:3 * H]
            c_new = f_g * c_prev + i_g * g_g
            h_new = o_g * jnp.tanh(c_new)
            c = jnp.where(valid, c_new, c_prev)     # packed-seq: no update past length
            return h_new, c

        h_cat = jnp.zeros((B, 2 * H), jnp.float32)
        for layer in range(n_layers):
            wih_ref, wblk_ref, b_ref = layer_refs[layer]
            last = layer == n_layers - 1

            # Hoisted input projection for BOTH directions, bias folded in:
            # one (T*B, E_in) @ (E_in, 8H) matmul, off the serial chain.
            src = x0 if layer == 0 else act_sc[...]
            xproj_sc[...] = (
                jnp.dot(src, wih_ref[...], preferred_element_type=jnp.float32)
                + b_ref[...])

            # Block-diagonal recurrent weight [[W_hh_f, 0], [0, W_hh_b]],
            # loaded once per layer (16 vregs; fine at these sizes).
            w_blk = wblk_ref[...]                                # (2H, 8H)

            h_f = jnp.zeros((B, H), jnp.float32)
            h_b = jnp.zeros((B, H), jnp.float32)
            c_f = jnp.zeros((B, H), jnp.float32)
            c_b = jnp.zeros((B, H), jnp.float32)
            h_cat = jnp.zeros((B, 2 * H), jnp.float32)

            # Fully-unrolled time loop (T small & static); static slice
            # indices let the LLO scheduler pipeline MXU/VPU/EUP across steps.
            for t in range(T):
                tf, tb = t, T - 1 - t
                rf, rb = tf * B, tb * B
                valid_f = tf < len_h                             # (B, H) bool
                valid_b = tb < len_h

                if t == 0:
                    # h == 0 => recurrent contribution is exactly zero.
                    gates_f = xproj_sc[rf:rf + B, 0:4 * H]
                    gates_b = xproj_sc[rb:rb + B, 4 * H:8 * H]
                else:
                    # ONE fused recurrent matmul for both directions.
                    hg = jnp.dot(h_cat, w_blk,
                                 preferred_element_type=jnp.float32)   # (B, 8H)
                    gates_f = hg[:, 0:4 * H] + xproj_sc[rf:rf + B, 0:4 * H]
                    gates_b = hg[:, 4 * H:8 * H] + xproj_sc[rb:rb + B, 4 * H:8 * H]

                hn_f, c_f = half_cell(gates_f, c_f, valid_f)
                hn_b, c_b = half_cell(gates_b, c_b, valid_b)
                h_f = jnp.where(valid_f, hn_f, h_f)
                h_b = jnp.where(valid_b, hn_b, h_b)
                h_cat = jnp.concatenate([h_f, h_b], axis=1)      # (B, 2H)

                if not last:
                    # Per-step outputs only feed the next layer; pad_packed
                    # semantics => zeros past each sequence's length.
                    act_sc[rf:rf + B, 0:H] = jnp.where(valid_f, hn_f, 0.0)
                    act_sc[rb:rb + B, H:2 * H] = jnp.where(valid_b, hn_b, 0.0)

        # Fused FC epilogue on the direction-concatenated final hidden state.
        # TODO(synk): nn.Dropout is identity in eval mode; training-mode
        # stochastic mask is not implemented.
        logits_ref[...] = (
            jnp.dot(h_cat, fcw_ref[...], preferred_element_type=jnp.float32)
            + fcb_ref[...])

    return kernel


# ---------------------------------------------------------------------------
# One-time parameter fusion (call once, cache the result)
# ---------------------------------------------------------------------------
def prepare_params(params):
    """Reorder gates to (i,f,o,g), fuse per-direction W_ih/bias, and build the
    block-diagonal recurrent weight.  Done once at parameter-load time so the
    per-call wrapper emits no concat launches."""
    H = params["lstm"][0][0][1].shape[0]          # W_hh is (H, 4H)

    def reorder(w):   # PyTorch gate order (i, f, g, o) -> (i, f, o, g)
        return jnp.concatenate([w[:, 0:2 * H], w[:, 3 * H:4 * H], w[:, 2 * H:3 * H]],
                               axis=1)

    layers = []
    for (wih_f, whh_f, b_f), (wih_b, whh_b, b_b) in params["lstm"]:
        wih_cat = jnp.concatenate([reorder(wih_f), reorder(wih_b)], axis=1)  # (E_in, 8H)
        b_cat = jnp.concatenate([reorder(b_f), reorder(b_b)], axis=1)        # (1, 8H)
        w_blk = jnp.zeros((2 * H, 8 * H), jnp.float32)
        w_blk = w_blk.at[0:H, 0:4 * H].set(reorder(whh_f))
        w_blk = w_blk.at[H:2 * H, 4 * H:8 * H].set(reorder(whh_b))            # (2H, 8H)
        layers.append((wih_cat, w_blk, b_cat))

    return {"embedding": params["embedding"], "layers": layers,
            "fc_w": params["fc_w"], "fc_b": params["fc_b"], "hidden": H}


# ---------------------------------------------------------------------------
# Wrapper
# ---------------------------------------------------------------------------
def sentiment_forward(text, lengths, prepared):
    """Forward pass equivalent to SentimentModel.forward (eval mode)."""
    T, B = text.shape
    V, E = prepared["embedding"].shape
    H = prepared["hidden"]
    O = prepared["fc_w"].shape[1]
    n_layers = len(prepared["layers"])

    # Pad batch to the f32 sublane tile; padded rows get length 0 (never
    # update state) and token 0 (zero embedding row).
    B_pad = max(8, ((B + 7) // 8) * 8)
    pad_cols = B_pad - B
    tok = jnp.pad(text.astype(jnp.int32), ((0, 0), (0, pad_cols)))
    tok = tok.reshape(T * B_pad, 1)
    len_p = jnp.pad(lengths.astype(jnp.int32), (0, pad_cols))[:, None]   # (B_pad, 1)

    weight_args = []
    for (wih, wblk, b) in prepared["layers"]:
        weight_args += [wih, wblk, b]
    weight_args += [prepared["fc_w"], prepared["fc_b"]]

    kernel = make_sentiment_kernel(n_layers, T, B_pad, H, V)
    vmem = pl.BlockSpec(memory_space=pltpu.MemorySpace.VMEM)
    n_in = 3 + len(weight_args)

    # NOTE: at production T/B/H, chunk the (T*B, 8H) projection scratch over
    # time blocks (grid axis / emit_pipeline) and set vmem_limit_bytes — at
    # these toy sizes total scratch is ~80 KB so a single resident slab wins.
    logits_pad = pl.pallas_call(
        kernel,
        out_shape=jax.ShapeDtypeStruct((B_pad, O), jnp.float32),
        in_specs=[vmem] * n_in,
        out_specs=vmem,
        scratch_shapes=[
            pltpu.VMEM((T * B_pad, 2 * H), jnp.float32),   # inter-layer activation slab
            pltpu.VMEM((T * B_pad, 8 * H), jnp.float32),   # fwd+bwd input projection
        ],
    )(len_p, tok, prepared["embedding"], *weight_args)
    return logits_pad[:B]


# ---------------------------------------------------------------------------
# Pure-JAX reference (same packed-LSTM semantics, raw PyTorch-ordered weights)
# ---------------------------------------------------------------------------
def ref_lstm_dir(x, lengths, w_ih, w_hh, b, reverse):
    T, B, _ = x.shape
    H = w_hh.shape[0]
    h = jnp.zeros((B, H), jnp.float32)
    c = jnp.zeros((B, H), jnp.float32)
    outs = jnp.zeros((T, B, H), jnp.float32)
    ts = range(T - 1, -1, -1) if reverse else range(T)
    for t in ts:
        gates = x[t] @ w_ih + h @ w_hh + b
        i = jax.nn.sigmoid(gates[:, :H])
        f = jax.nn.sigmoid(gates[:, H:2 * H])
        g = jnp.tanh(gates[:, 2 * H:3 * H])
        o = jax.nn.sigmoid(gates[:, 3 * H:])
        c_new = f * c + i * g
        h_new = o * jnp.tanh(c_new)
        valid = (t < lengths)[:, None]
        h = jnp.where(valid, h_new, h)
        c = jnp.where(valid, c_new, c)
        outs = outs.at[t].set(jnp.where(valid, h_new, 0.0))
    return outs, h


def ref_forward(text, lengths, params):
    x = params["embedding"][text]
    layer_in = x
    h_f = h_b = None
    for layer_params in params["lstm"]:
        (wih_f, whh_f, b_f), (wih_b, whh_b, b_b) = layer_params
        out_f, h_f = ref_lstm_dir(layer_in, lengths, wih_f, whh_f, b_f, False)
        out_b, h_b = ref_lstm_dir(layer_in, lengths, wih_b, whh_b, b_b, True)
        layer_in = jnp.concatenate([out_f, out_b], axis=-1)
    hidden = jnp.concatenate([h_f, h_b], axis=1)
    return hidden @ params["fc_w"] + params["fc_b"]


# ---------------------------------------------------------------------------
# Main
# ---------------------------------------------------------------------------
if __name__ == "__main__":
    # Module hyperparameters
    VOCAB, EMB, HID, OUT = 50, 16, 32, 2
    N_LAYERS, PAD_IDX = 2, 0
    T, B = 8, 2

    key = jax.random.PRNGKey(0)
    ks = iter(jax.random.split(key, 32))

    # Deterministic parameter init (synthetic, not a checkpoint load)
    emb_table = jax.random.normal(next(ks), (VOCAB, EMB), jnp.float32) * 0.1
    emb_table = emb_table.at[PAD_IDX].set(0.0)               # padding_idx row is zero

    lstm_params = []
    for layer in range(N_LAYERS):
        in_dim = EMB if layer == 0 else 2 * HID
        per_dir = []
        for _d in range(2):                                   # forward, backward
            w_ih = jax.random.normal(next(ks), (in_dim, 4 * HID), jnp.float32) * 0.1
            w_hh = jax.random.normal(next(ks), (HID, 4 * HID), jnp.float32) * 0.1
            bias = jax.random.normal(next(ks), (1, 4 * HID), jnp.float32) * 0.1  # b_ih + b_hh
            per_dir.append((w_ih, w_hh, bias))
        lstm_params.append(tuple(per_dir))

    fc_w = jax.random.normal(next(ks), (2 * HID, OUT), jnp.float32) * 0.1
    fc_b = jax.random.normal(next(ks), (1, OUT), jnp.float32) * 0.1

    params = {"embedding": emb_table, "lstm": lstm_params, "fc_w": fc_w, "fc_b": fc_b}
    prepared = prepare_params(params)                         # one-time weight fusion

    # Inputs: time-major tokens, lengths sorted descending (pack_padded_sequence default)
    lengths = jnp.array([8, 5], jnp.int32)                    # (B,)
    text = jax.random.randint(next(ks), (T, B), 1, VOCAB, jnp.int32)
    time_idx = jnp.arange(T)[:, None]                         # (T, 1)
    text = jnp.where(time_idx < lengths[None, :], text, PAD_IDX)   # pad tail with pad_idx

    logits = sentiment_forward(text, lengths, prepared)
    logits = jax.block_until_ready(logits)

    ref = ref_forward(text, lengths, params)
    assert logits.shape == (B, OUT)
    assert jnp.allclose(logits, ref, rtol=1e-3, atol=1e-3), (logits, ref)

    print("KERNEL_OK")
</pallas_src>

<mosaic_0001>
module attributes {stable_mosaic.version = 11 : i64} {
  func.func @kernel(%arg0: memref<8x1xi32, #tpu.memory_space<vmem>>, %arg1: memref<64x1xi32, #tpu.memory_space<vmem>>, %arg2: memref<50x16xf32, #tpu.memory_space<vmem>>, %arg3: memref<16x256xf32, #tpu.memory_space<vmem>>, %arg4: memref<64x256xf32, #tpu.memory_space<vmem>>, %arg5: memref<1x256xf32, #tpu.memory_space<vmem>>, %arg6: memref<64x256xf32, #tpu.memory_space<vmem>>, %arg7: memref<64x256xf32, #tpu.memory_space<vmem>>, %arg8: memref<1x256xf32, #tpu.memory_space<vmem>>, %arg9: memref<64x2xf32, #tpu.memory_space<vmem>>, %arg10: memref<1x2xf32, #tpu.memory_space<vmem>>, %arg11: memref<8x2xf32, #tpu.memory_space<vmem>>, %arg12: memref<64x64xf32, #tpu.memory_space<vmem>>, %arg13: memref<64x256xf32, #tpu.memory_space<vmem>>) attributes {dimension_semantics = [], scalar_prefetch = 0 : i64, scratch_operands = 2 : i64, tpu.core_type = #tpu.core_type<tc>} {
    %0 = tpu.iota {dimensions = array<i32: 1>} : vector<64x50xi32>
    %c0 = arith.constant 0 : index
    %c0_0 = arith.constant 0 : index
    %1 = vector.load %arg1[%c0, %c0_0] : memref<64x1xi32, #tpu.memory_space<vmem>>, vector<64x1xi32>
    %2 = vector.broadcast %1 : vector<64x1xi32> to vector<64x50xi32>
    %3 = arith.cmpi eq, %0, %2 : vector<64x50xi32>
    %4 = arith.extui %3 : vector<64x50xi1> to vector<64x50xi32>
    %5 = arith.sitofp %4 : vector<64x50xi32> to vector<64x50xf32>
    %c0_1 = arith.constant 0 : index
    %c0_2 = arith.constant 0 : index
    %6 = vector.load %arg2[%c0_1, %c0_2] : memref<50x16xf32, #tpu.memory_space<vmem>>, vector<50x16xf32>
    %cst = arith.constant dense<0.000000e+00> : vector<64x16xf32>
    %7 = tpu.matmul %5, %6, %cst {dimension_numbers = #tpu.dot_dimension_numbers<[1], [0], [0], [1], [0, 0, 1, 1], [], []>} : vector<64x50xf32>, vector<50x16xf32>, vector<64x16xf32> -> vector<64x16xf32>
    %c0_3 = arith.constant 0 : index
    %c0_4 = arith.constant 0 : index
    %8 = vector.load %arg0[%c0_3, %c0_4] : memref<8x1xi32, #tpu.memory_space<vmem>>, vector<8x1xi32>
    %9 = vector.shape_cast %8 : vector<8x1xi32> to vector<8x1xi32>
    %10 = vector.broadcast %9 : vector<8x1xi32> to vector<8x32xi32>
    %cst_5 = arith.constant 0.000000e+00 : f32
    %11 = vector.broadcast %cst_5 : f32 to vector<64x64xf32>
    %c0_6 = arith.constant 0 : index
    %c0_7 = arith.constant 0 : index
    %12 = vector.load %arg12[%c0_6, %c0_7] : memref<64x64xf32, #tpu.memory_space<vmem>>, vector<64x64xf32>
    tpu.vector_store %arg12[%c0_6, %c0_7], %11 {strides = array<i32>} : memref<64x64xf32, #tpu.memory_space<vmem>>, vector<64x64xf32>,
    %c0_8 = arith.constant 0 : index
    %c0_9 = arith.constant 0 : index
    %13 = vector.load %arg3[%c0_8, %c0_9] : memref<16x256xf32, #tpu.memory_space<vmem>>, vector<16x256xf32>
    %cst_10 = arith.constant dense<0.000000e+00> : vector<64x256xf32>
    %14 = tpu.matmul %7, %13, %cst_10 {dimension_numbers = #tpu.dot_dimension_numbers<[1], [0], [0], [1], [0, 0, 1, 1], [], []>} : vector<64x16xf32>, vector<16x256xf32>, vector<64x256xf32> -> vector<64x256xf32>
    %c0_11 = arith.constant 0 : index
    %c0_12 = arith.constant 0 : index
    %15 = vector.load %arg5[%c0_11, %c0_12] : memref<1x256xf32, #tpu.memory_space<vmem>>, vector<1x256xf32>
    %16 = vector.broadcast %15 : vector<1x256xf32> to vector<64x256xf32>
    %17 = arith.addf %14, %16 : vector<64x256xf32>
    %c0_13 = arith.constant 0 : index
    %c0_14 = arith.constant 0 : index
    %18 = vector.load %arg13[%c0_13, %c0_14] : memref<64x256xf32, #tpu.memory_space<vmem>>, vector<64x256xf32>
    tpu.vector_store %arg13[%c0_13, %c0_14], %17 {strides = array<i32>} : memref<64x256xf32, #tpu.memory_space<vmem>>, vector<64x256xf32>,
    %c0_15 = arith.constant 0 : index
    %c0_16 = arith.constant 0 : index
    %19 = vector.load %arg4[%c0_15, %c0_16] : memref<64x256xf32, #tpu.memory_space<vmem>>, vector<64x256xf32>
    %cst_17 = arith.constant 0.000000e+00 : f32
    %20 = vector.broadcast %cst_17 : f32 to vector<8x32xf32>
    %cst_18 = arith.constant 0.000000e+00 : f32
    %21 = vector.broadcast %cst_18 : f32 to vector<8x32xf32>
    %cst_19 = arith.constant 0.000000e+00 : f32
    %22 = vector.broadcast %cst_19 : f32 to vector<8x32xf32>
    %cst_20 = arith.constant 0.000000e+00 : f32
    %23 = vector.broadcast %cst_20 : f32 to vector<8x32xf32>
    %c0_i32 = arith.constant 0 : i32
    %24 = vector.broadcast %c0_i32 : i32 to vector<8x32xi32>
    %25 = arith.cmpi sgt, %10, %24 : vector<8x32xi32>
    %c7_i32 = arith.constant 7 : i32
    %26 = vector.broadcast %c7_i32 : i32 to vector<8x32xi32>
    %27 = arith.cmpi sgt, %10, %26 : vector<8x32xi32>
    %c0_21 = arith.constant 0 : index
    %c0_22 = arith.constant 0 : index
    %28 = vector.load %arg13[%c0_21, %c0_22] : memref<64x256xf32, #tpu.memory_space<vmem>>, vector<8x128xf32>
    %c56 = arith.constant 56 : index
    %c128 = arith.constant 128 : index
    %29 = vector.load %arg13[%c56, %c128] : memref<64x256xf32, #tpu.memory_space<vmem>>, vector<8x128xf32>
    %30 = vector.extract_strided_slice %28 {offsets = [0, 0], sizes = [8, 96], strides = [1, 1]} : vector<8x128xf32> to vector<8x96xf32>
    %31 = arith.negf %30 : vector<8x96xf32>
    %32 = math.exp %31 : vector<8x96xf32>
    %cst_23 = arith.constant 1.000000e+00 : f32
    %33 = vector.broadcast %cst_23 : f32 to vector<8x96xf32>
    %34 = arith.addf %33, %32 : vector<8x96xf32>
    %35 = arith.divf %33, %34 : vector<8x96xf32>
    %36 = vector.extract_strided_slice %28 {offsets = [0, 96], sizes = [8, 32], strides = [1, 1]} : vector<8x128xf32> to vector<8x32xf32>
    %37 = math.tanh %36 : vector<8x32xf32>
    %38 = vector.extract_strided_slice %35 {offsets = [0, 0], sizes = [8, 32], strides = [1, 1]} : vector<8x96xf32> to vector<8x32xf32>
    %39 = vector.extract_strided_slice %35 {offsets = [0, 32], sizes = [8, 32], strides = [1, 1]} : vector<8x96xf32> to vector<8x32xf32>
    %40 = vector.extract_strided_slice %35 {offsets = [0, 64], sizes = [8, 32], strides = [1, 1]} : vector<8x96xf32> to vector<8x32xf32>
    %41 = arith.mulf %39, %22 : vector<8x32xf32>
    %42 = arith.mulf %38, %37 : vector<8x32xf32>
    %43 = arith.addf %41, %42 : vector<8x32xf32>
    %44 = math.tanh %43 : vector<8x32xf32>
    %45 = arith.mulf %40, %44 : vector<8x32xf32>
    %46 = arith.select %25, %43, %22 : vector<8x32xi1>, vector<8x32xf32>
    %47 = vector.extract_strided_slice %29 {offsets = [0, 0], sizes = [8, 96], strides = [1, 1]} : vector<8x128xf32> to vector<8x96xf32>
    %48 = arith.negf %47 : vector<8x96xf32>
    %49 = math.exp %48 : vector<8x96xf32>
    %cst_24 = arith.constant 1.000000e+00 : f32
    %50 = vector.broadcast %cst_24 : f32 to vector<8x96xf32>
    %51 = arith.addf %50, %49 : vector<8x96xf32>
    %52 = arith.divf %50, %51 : vector<8x96xf32>
    %53 = vector.extract_strided_slice %29 {offsets = [0, 96], sizes = [8, 32], strides = [1, 1]} : vector<8x128xf32> to vector<8x32xf32>
    %54 = math.tanh %53 : vector<8x32xf32>
    %55 = vector.extract_strided_slice %52 {offsets = [0, 0], sizes = [8, 32], strides = [1, 1]} : vector<8x96xf32> to vector<8x32xf32>
    %56 = vector.extract_strided_slice %52 {offsets = [0, 32], sizes = [8, 32], strides = [1, 1]} : vector<8x96xf32> to vector<8x32xf32>
    %57 = vector.extract_strided_slice %52 {offsets = [0, 64], sizes = [8, 32], strides = [1, 1]} : vector<8x96xf32> to vector<8x32xf32>
    %58 = arith.mulf %56, %23 : vector<8x32xf32>
    %59 = arith.mulf %55, %54 : vector<8x32xf32>
    %60 = arith.addf %58, %59 : vector<8x32xf32>
    %61 = math.tanh %60 : vector<8x32xf32>
    %62 = arith.mulf %57, %61 : vector<8x32xf32>
    %63 = arith.select %27, %60, %23 : vector<8x32xi1>, vector<8x32xf32>
    %64 = arith.select %25, %45, %20 : vector<8x32xi1>, vector<8x32xf32>
    %65 = arith.select %27, %62, %21 : vector<8x32xi1>, vector<8x32xf32>
    %66 = tpu.concatenate %64, %65 in 1 : vector<8x32xf32>, vector<8x32xf32> -> vector<8x64xf32>
    %cst_25 = arith.constant 0.000000e+00 : f32
    %67 = vector.broadcast %cst_25 : f32 to vector<8x32xf32>
    %68 = arith.select %25, %45, %67 : vector<8x32xi1>, vector<8x32xf32>
    %c0_26 = arith.constant 0 : index
    %c0_27 = arith.constant 0 : index
    %69 = vector.load %arg12[%c0_26, %c0_27] : memref<64x64xf32, #tpu.memory_space<vmem>>, vector<8x32xf32>
    tpu.vector_store %arg12[%c0_26, %c0_27], %68 {strides = array<i32>} : memref<64x64xf32, #tpu.memory_space<vmem>>, vector<8x32xf32>,
    %cst_28 = arith.constant 0.000000e+00 : f32
    %70 = vector.broadcast %cst_28 : f32 to vector<8x32xf32>
    %71 = arith.select %27, %62, %70 : vector<8x32xi1>, vector<8x32xf32>
    %c56_29 = arith.constant 56 : index
    %c32 = arith.constant 32 : index
    %72 = vector.load %arg12[%c56_29, %c32] : memref<64x64xf32, #tpu.memory_space<vmem>>, vector<8x32xf32>
    tpu.vector_store %arg12[%c56_29, %c32], %71 {strides = array<i32>} : memref<64x64xf32, #tpu.memory_space<vmem>>, vector<8x32xf32>,
    %c1_i32 = arith.constant 1 : i32
    %73 = vector.broadcast %c1_i32 : i32 to vector<8x32xi32>
    %74 = arith.cmpi sgt, %10, %73 : vector<8x32xi32>
    %c6_i32 = arith.constant 6 : i32
    %75 = vector.broadcast %c6_i32 : i32 to vector<8x32xi32>
    %76 = arith.cmpi sgt, %10, %75 : vector<8x32xi32>
    %cst_30 = arith.constant dense<0.000000e+00> : vector<8x256xf32>
    %77 = tpu.matmul %66, %19, %cst_30 {dimension_numbers = #tpu.dot_dimension_numbers<[1], [0], [0], [1], [0, 0, 1, 1], [], []>} : vector<8x64xf32>, vector<64x256xf32>, vector<8x256xf32> -> vector<8x256xf32>
    %78 = vector.extract_strided_slice %77 {offsets = [0, 0], sizes = [8, 128], strides = [1, 1]} : vector<8x256xf32> to vector<8x128xf32>
    %c8 = arith.constant 8 : index
    %c0_31 = arith.constant 0 : index
    %79 = vector.load %arg13[%c8, %c0_31] : memref<64x256xf32, #tpu.memory_space<vmem>>, vector<8x128xf32>
    %80 = arith.addf %78, %79 : vector<8x128xf32>
    %81 = vector.extract_strided_slice %77 {offsets = [0, 128], sizes = [8, 128], strides = [1, 1]} : vector<8x256xf32> to vector<8x128xf32>
    %c48 = arith.constant 48 : index
    %c128_32 = arith.constant 128 : index
    %82 = vector.load %arg13[%c48, %c128_32] : memref<64x256xf32, #tpu.memory_space<vmem>>, vector<8x128xf32>
    %83 = arith.addf %81, %82 : vector<8x128xf32>
    %84 = vector.extract_strided_slice %80 {offsets = [0, 0], sizes = [8, 96], strides = [1, 1]} : vector<8x128xf32> to vector<8x96xf32>
    %85 = arith.negf %84 : vector<8x96xf32>
    %86 = math.exp %85 : vector<8x96xf32>
    %cst_33 = arith.constant 1.000000e+00 : f32
    %87 = vector.broadcast %cst_33 : f32 to vector<8x96xf32>
    %88 = arith.addf %87, %86 : vector<8x96xf32>
    %89 = arith.divf %87, %88 : vector<8x96xf32>
    %90 = vector.extract_strided_slice %80 {offsets = [0, 96], sizes = [8, 32], strides = [1, 1]} : vector<8x128xf32> to vector<8x32xf32>
    %91 = math.tanh %90 : vector<8x32xf32>
    %92 = vector.extract_strided_slice %89 {offsets = [0, 0], sizes = [8, 32], strides = [1, 1]} : vector<8x96xf32> to vector<8x32xf32>
    %93 = vector.extract_strided_slice %89 {offsets = [0, 32], sizes = [8, 32], strides = [1, 1]} : vector<8x96xf32> to vector<8x32xf32>
    %94 = vector.extract_strided_slice %89 {offsets = [0, 64], sizes = [8, 32], strides = [1, 1]} : vector<8x96xf32> to vector<8x32xf32>
    %95 = arith.mulf %93, %46 : vector<8x32xf32>
    %96 = arith.mulf %92, %91 : vector<8x32xf32>
    %97 = arith.addf %95, %96 : vector<8x32xf32>
    %98 = math.tanh %97 : vector<8x32xf32>
    %99 = arith.mulf %94, %98 : vector<8x32xf32>
    %100 = arith.select %74, %97, %46 : vector<8x32xi1>, vector<8x32xf32>
    %101 = vector.extract_strided_slice %83 {offsets = [0, 0], sizes = [8, 96], strides = [1, 1]} : vector<8x128xf32> to vector<8x96xf32>
    %102 = arith.negf %101 : vector<8x96xf32>
    %103 = math.exp %102 : vector<8x96xf32>
    %cst_34 = arith.constant 1.000000e+00 : f32
    %104 = vector.broadcast %cst_34 : f32 to vector<8x96xf32>
    %105 = arith.addf %104, %103 : vector<8x96xf32>
    %106 = arith.divf %104, %105 : vector<8x96xf32>
    %107 = vector.extract_strided_slice %83 {offsets = [0, 96], sizes = [8, 32], strides = [1, 1]} : vector<8x128xf32> to vector<8x32xf32>
    %108 = math.tanh %107 : vector<8x32xf32>
    %109 = vector.extract_strided_slice %106 {offsets = [0, 0], sizes = [8, 32], strides = [1, 1]} : vector<8x96xf32> to vector<8x32xf32>
    %110 = vector.extract_strided_slice %106 {offsets = [0, 32], sizes = [8, 32], strides = [1, 1]} : vector<8x96xf32> to vector<8x32xf32>
    %111 = vector.extract_strided_slice %106 {offsets = [0, 64], sizes = [8, 32], strides = [1, 1]} : vector<8x96xf32> to vector<8x32xf32>
    %112 = arith.mulf %110, %63 : vector<8x32xf32>
    %113 = arith.mulf %109, %108 : vector<8x32xf32>
    %114 = arith.addf %112, %113 : vector<8x32xf32>
    %115 = math.tanh %114 : vector<8x32xf32>
    %116 = arith.mulf %111, %115 : vector<8x32xf32>
    %117 = arith.select %76, %114, %63 : vector<8x32xi1>, vector<8x32xf32>
    %118 = arith.select %74, %99, %64 : vector<8x32xi1>, vector<8x32xf32>
    %119 = arith.select %76, %116, %65 : vector<8x32xi1>, vector<8x32xf32>
    %120 = tpu.concatenate %118, %119 in 1 : vector<8x32xf32>, vector<8x32xf32> -> vector<8x64xf32>
    %cst_35 = arith.constant 0.000000e+00 : f32
    %121 = vector.broadcast %cst_35 : f32 to vector<8x32xf32>
    %122 = arith.select %74, %99, %121 : vector<8x32xi1>, vector<8x32xf32>
    %c8_36 = arith.constant 8 : index
    %c0_37 = arith.constant 0 : index
    %123 = vector.load %arg12[%c8_36, %c0_37] : memref<64x64xf32, #tpu.memory_space<vmem>>, vector<8x32xf32>
    tpu.vector_store %arg12[%c8_36, %c0_37], %122 {strides = array<i32>} : memref<64x64xf32, #tpu.memory_space<vmem>>, vector<8x32xf32>,
    %cst_38 = arith.constant 0.000000e+00 : f32
    %124 = vector.broadcast %cst_38 : f32 to vector<8x32xf32>
    %125 = arith.select %76, %116, %124 : vector<8x32xi1>, vector<8x32xf32>
    %c48_39 = arith.constant 48 : index
    %c32_40 = arith.constant 32 : index
    %126 = vector.load %arg12[%c48_39, %c32_40] : memref<64x64xf32, #tpu.memory_space<vmem>>, vector<8x32xf32>
    tpu.vector_store %arg12[%c48_39, %c32_40], %125 {strides = array<i32>} : memref<64x64xf32, #tpu.memory_space<vmem>>, vector<8x32xf32>,
    %c2_i32 = arith.constant 2 : i32
    %127 = vector.broadcast %c2_i32 : i32 to vector<8x32xi32>
    %128 = arith.cmpi sgt, %10, %127 : vector<8x32xi32>
    %c5_i32 = arith.constant 5 : i32
    %129 = vector.broadcast %c5_i32 : i32 to vector<8x32xi32>
    %130 = arith.cmpi sgt, %10, %129 : vector<8x32xi32>
    %cst_41 = arith.constant dense<0.000000e+00> : vector<8x256xf32>
    %131 = tpu.matmul %120, %19, %cst_41 {dimension_numbers = #tpu.dot_dimension_numbers<[1], [0], [0], [1], [0, 0, 1, 1], [], []>} : vector<8x64xf32>, vector<64x256xf32>, vector<8x256xf32> -> vector<8x256xf32>
    %132 = vector.extract_strided_slice %131 {offsets = [0, 0], sizes = [8, 128], strides = [1, 1]} : vector<8x256xf32> to vector<8x128xf32>
    %c16 = arith.constant 16 : index
    %c0_42 = arith.constant 0 : index
    %133 = vector.load %arg13[%c16, %c0_42] : memref<64x256xf32, #tpu.memory_space<vmem>>, vector<8x128xf32>
    %134 = arith.addf %132, %133 : vector<8x128xf32>
    %135 = vector.extract_strided_slice %131 {offsets = [0, 128], sizes = [8, 128], strides = [1, 1]} : vector<8x256xf32> to vector<8x128xf32>
    %c40 = arith.constant 40 : index
    %c128_43 = arith.constant 128 : index
    %136 = vector.load %arg13[%c40, %c128_43] : memref<64x256xf32, #tpu.memory_space<vmem>>, vector<8x128xf32>
    %137 = arith.addf %135, %136 : vector<8x128xf32>
    %138 = vector.extract_strided_slice %134 {offsets = [0, 0], sizes = [8, 96], strides = [1, 1]} : vector<8x128xf32> to vector<8x96xf32>
    %139 = arith.negf %138 : vector<8x96xf32>
    %140 = math.exp %139 : vector<8x96xf32>
    %cst_44 = arith.constant 1.000000e+00 : f32
    %141 = vector.broadcast %cst_44 : f32 to vector<8x96xf32>
    %142 = arith.addf %141, %140 : vector<8x96xf32>
    %143 = arith.divf %141, %142 : vector<8x96xf32>
    %144 = vector.extract_strided_slice %134 {offsets = [0, 96], sizes = [8, 32], strides = [1, 1]} : vector<8x128xf32> to vector<8x32xf32>
    %145 = math.tanh %144 : vector<8x32xf32>
    %146 = vector.extract_strided_slice %143 {offsets = [0, 0], sizes = [8, 32], strides = [1, 1]} : vector<8x96xf32> to vector<8x32xf32>
    %147 = vector.extract_strided_slice %143 {offsets = [0, 32], sizes = [8, 32], strides = [1, 1]} : vector<8x96xf32> to vector<8x32xf32>
    %148 = vector.extract_strided_slice %143 {offsets = [0, 64], sizes = [8, 32], strides = [1, 1]} : vector<8x96xf32> to vector<8x32xf32>
    %149 = arith.mulf %147, %100 : vector<8x32xf32>
    %150 = arith.mulf %146, %145 : vector<8x32xf32>
    %151 = arith.addf %149, %150 : vector<8x32xf32>
    %152 = math.tanh %151 : vector<8x32xf32>
    %153 = arith.mulf %148, %152 : vector<8x32xf32>
    %154 = arith.select %128, %151, %100 : vector<8x32xi1>, vector<8x32xf32>
    %155 = vector.extract_strided_slice %137 {offsets = [0, 0], sizes = [8, 96], strides = [1, 1]} : vector<8x128xf32> to vector<8x96xf32>
    %156 = arith.negf %155 : vector<8x96xf32>
    %157 = math.exp %156 : vector<8x96xf32>
    %cst_45 = arith.constant 1.000000e+00 : f32
    %158 = vector.broadcast %cst_45 : f32 to vector<8x96xf32>
    %159 = arith.addf %158, %157 : vector<8x96xf32>
    %160 = arith.divf %158, %159 : vector<8x96xf32>
    %161 = vector.extract_strided_slice %137 {offsets = [0, 96], sizes = [8, 32], strides = [1, 1]} : vector<8x128xf32> to vector<8x32xf32>
    %162 = math.tanh %161 : vector<8x32xf32>
    %163 = vector.extract_strided_slice %160 {offsets = [0, 0], sizes = [8, 32], strides = [1, 1]} : vector<8x96xf32> to vector<8x32xf32>
    %164 = vector.extract_strided_slice %160 {offsets = [0, 32], sizes = [8, 32], strides = [1, 1]} : vector<8x96xf32> to vector<8x32xf32>
    %165 = vector.extract_strided_slice %160 {offsets = [0, 64], sizes = [8, 32], strides = [1, 1]} : vector<8x96xf32> to vector<8x32xf32>
    %166 = arith.mulf %164, %117 : vector<8x32xf32>
    %167 = arith.mulf %163, %162 : vector<8x32xf32>
    %168 = arith.addf %166, %167 : vector<8x32xf32>
    %169 = math.tanh %168 : vector<8x32xf32>
    %170 = arith.mulf %165, %169 : vector<8x32xf32>
    %171 = arith.select %130, %168, %117 : vector<8x32xi1>, vector<8x32xf32>
    %172 = arith.select %128, %153, %118 : vector<8x32xi1>, vector<8x32xf32>
    %173 = arith.select %130, %170, %119 : vector<8x32xi1>, vector<8x32xf32>
    %174 = tpu.concatenate %172, %173 in 1 : vector<8x32xf32>, vector<8x32xf32> -> vector<8x64xf32>
    %cst_46 = arith.constant 0.000000e+00 : f32
    %175 = vector.broadcast %cst_46 : f32 to vector<8x32xf32>
    %176 = arith.select %128, %153, %175 : vector<8x32xi1>, vector<8x32xf32>
    %c16_47 = arith.constant 16 : index
    %c0_48 = arith.constant 0 : index
    %177 = vector.load %arg12[%c16_47, %c0_48] : memref<64x64xf32, #tpu.memory_space<vmem>>, vector<8x32xf32>
    tpu.vector_store %arg12[%c16_47, %c0_48], %176 {strides = array<i32>} : memref<64x64xf32, #tpu.memory_space<vmem>>, vector<8x32xf32>,
    %cst_49 = arith.constant 0.000000e+00 : f32
    %178 = vector.broadcast %cst_49 : f32 to vector<8x32xf32>
    %179 = arith.select %130, %170, %178 : vector<8x32xi1>, vector<8x32xf32>
    %c40_50 = arith.constant 40 : index
    %c32_51 = arith.constant 32 : index
    %180 = vector.load %arg12[%c40_50, %c32_51] : memref<64x64xf32, #tpu.memory_space<vmem>>, vector<8x32xf32>
    tpu.vector_store %arg12[%c40_50, %c32_51], %179 {strides = array<i32>} : memref<64x64xf32, #tpu.memory_space<vmem>>, vector<8x32xf32>,
    %c3_i32 = arith.constant 3 : i32
    %181 = vector.broadcast %c3_i32 : i32 to vector<8x32xi32>
    %182 = arith.cmpi sgt, %10, %181 : vector<8x32xi32>
    %c4_i32 = arith.constant 4 : i32
    %183 = vector.broadcast %c4_i32 : i32 to vector<8x32xi32>
    %184 = arith.cmpi sgt, %10, %183 : vector<8x32xi32>
    %cst_52 = arith.constant dense<0.000000e+00> : vector<8x256xf32>
    %185 = tpu.matmul %174, %19, %cst_52 {dimension_numbers = #tpu.dot_dimension_numbers<[1], [0], [0], [1], [0, 0, 1, 1], [], []>} : vector<8x64xf32>, vector<64x256xf32>, vector<8x256xf32> -> vector<8x256xf32>
    %186 = vector.extract_strided_slice %185 {offsets = [0, 0], sizes = [8, 128], strides = [1, 1]} : vector<8x256xf32> to vector<8x128xf32>
    %c24 = arith.constant 24 : index
    %c0_53 = arith.constant 0 : index
    %187 = vector.load %arg13[%c24, %c0_53] : memref<64x256xf32, #tpu.memory_space<vmem>>, vector<8x128xf32>
    %188 = arith.addf %186, %187 : vector<8x128xf32>
    %189 = vector.extract_strided_slice %185 {offsets = [0, 128], sizes = [8, 128], strides = [1, 1]} : vector<8x256xf32> to vector<8x128xf32>
    %c32_54 = arith.constant 32 : index
    %c128_55 = arith.constant 128 : index
    %190 = vector.load %arg13[%c32_54, %c128_55] : memref<64x256xf32, #tpu.memory_space<vmem>>, vector<8x128xf32>
    %191 = arith.addf %189, %190 : vector<8x128xf32>
    %192 = vector.extract_strided_slice %188 {offsets = [0, 0], sizes = [8, 96], strides = [1, 1]} : vector<8x128xf32> to vector<8x96xf32>
    %193 = arith.negf %192 : vector<8x96xf32>
    %194 = math.exp %193 : vector<8x96xf32>
    %cst_56 = arith.constant 1.000000e+00 : f32
    %195 = vector.broadcast %cst_56 : f32 to vector<8x96xf32>
    %196 = arith.addf %195, %194 : vector<8x96xf32>
    %197 = arith.divf %195, %196 : vector<8x96xf32>
    %198 = vector.extract_strided_slice %188 {offsets = [0, 96], sizes = [8, 32], strides = [1, 1]} : vector<8x128xf32> to vector<8x32xf32>
    %199 = math.tanh %198 : vector<8x32xf32>
    %200 = vector.extract_strided_slice %197 {offsets = [0, 0], sizes = [8, 32], strides = [1, 1]} : vector<8x96xf32> to vector<8x32xf32>
    %201 = vector.extract_strided_slice %197 {offsets = [0, 32], sizes = [8, 32], strides = [1, 1]} : vector<8x96xf32> to vector<8x32xf32>
    %202 = vector.extract_strided_slice %197 {offsets = [0, 64], sizes = [8, 32], strides = [1, 1]} : vector<8x96xf32> to vector<8x32xf32>
    %203 = arith.mulf %201, %154 : vector<8x32xf32>
    %204 = arith.mulf %200, %199 : vector<8x32xf32>
    %205 = arith.addf %203, %204 : vector<8x32xf32>
    %206 = math.tanh %205 : vector<8x32xf32>
    %207 = arith.mulf %202, %206 : vector<8x32xf32>
    %208 = arith.select %182, %205, %154 : vector<8x32xi1>, vector<8x32xf32>
    %209 = vector.extract_strided_slice %191 {offsets = [0, 0], sizes = [8, 96], strides = [1, 1]} : vector<8x128xf32> to vector<8x96xf32>
    %210 = arith.negf %209 : vector<8x96xf32>
    %211 = math.exp %210 : vector<8x96xf32>
    %cst_57 = arith.constant 1.000000e+00 : f32
    %212 = vector.broadcast %cst_57 : f32 to vector<8x96xf32>
    %213 = arith.addf %212, %211 : vector<8x96xf32>
    %214 = arith.divf %212, %213 : vector<8x96xf32>
    %215 = vector.extract_strided_slice %191 {offsets = [0, 96], sizes = [8, 32], strides = [1, 1]} : vector<8x128xf32> to vector<8x32xf32>
    %216 = math.tanh %215 : vector<8x32xf32>
    %217 = vector.extract_strided_slice %214 {offsets = [0, 0], sizes = [8, 32], strides = [1, 1]} : vector<8x96xf32> to vector<8x32xf32>
    %218 = vector.extract_strided_slice %214 {offsets = [0, 32], sizes = [8, 32], strides = [1, 1]} : vector<8x96xf32> to vector<8x32xf32>
    %219 = vector.extract_strided_slice %214 {offsets = [0, 64], sizes = [8, 32], strides = [1, 1]} : vector<8x96xf32> to vector<8x32xf32>
    %220 = arith.mulf %218, %171 : vector<8x32xf32>
    %221 = arith.mulf %217, %216 : vector<8x32xf32>
    %222 = arith.addf %220, %221 : vector<8x32xf32>
    %223 = math.tanh %222 : vector<8x32xf32>
    %224 = arith.mulf %219, %223 : vector<8x32xf32>
    %225 = arith.select %184, %222, %171 : vector<8x32xi1>, vector<8x32xf32>
    %226 = arith.select %182, %207, %172 : vector<8x32xi1>, vector<8x32xf32>
    %227 = arith.select %184, %224, %173 : vector<8x32xi1>, vector<8x32xf32>
    %228 = tpu.concatenate %226, %227 in 1 : vector<8x32xf32>, vector<8x32xf32> -> vector<8x64xf32>
    %cst_58 = arith.constant 0.000000e+00 : f32
    %229 = vector.broadcast %cst_58 : f32 to vector<8x32xf32>
    %230 = arith.select %182, %207, %229 : vector<8x32xi1>, vector<8x32xf32>
    %c24_59 = arith.constant 24 : index
    %c0_60 = arith.constant 0 : index
    %231 = vector.load %arg12[%c24_59, %c0_60] : memref<64x64xf32, #tpu.memory_space<vmem>>, vector<8x32xf32>
    tpu.vector_store %arg12[%c24_59, %c0_60], %230 {strides = array<i32>} : memref<64x64xf32, #tpu.memory_space<vmem>>, vector<8x32xf32>,
    %cst_61 = arith.constant 0.000000e+00 : f32
    %232 = vector.broadcast %cst_61 : f32 to vector<8x32xf32>
    %233 = arith.select %184, %224, %232 : vector<8x32xi1>, vector<8x32xf32>
    %c32_62 = arith.constant 32 : index
    %c32_63 = arith.constant 32 : index
    %234 = vector.load %arg12[%c32_62, %c32_63] : memref<64x64xf32, #tpu.memory_space<vmem>>, vector<8x32xf32>
    tpu.vector_store %arg12[%c32_62, %c32_63], %233 {strides = array<i32>} : memref<64x64xf32, #tpu.memory_space<vmem>>, vector<8x32xf32>,
    %c4_i32_64 = arith.constant 4 : i32
    %235 = vector.broadcast %c4_i32_64 : i32 to vector<8x32xi32>
    %236 = arith.cmpi sgt, %10, %235 : vector<8x32xi32>
    %c3_i32_65 = arith.constant 3 : i32
    %237 = vector.broadcast %c3_i32_65 : i32 to vector<8x32xi32>
    %238 = arith.cmpi sgt, %10, %237 : vector<8x32xi32>
    %cst_66 = arith.constant dense<0.000000e+00> : vector<8x256xf32>
    %239 = tpu.matmul %228, %19, %cst_66 {dimension_numbers = #tpu.dot_dimension_numbers<[1], [0], [0], [1], [0, 0, 1, 1], [], []>} : vector<8x64xf32>, vector<64x256xf32>, vector<8x256xf32> -> vector<8x256xf32>
    %240 = vector.extract_strided_slice %239 {offsets = [0, 0], sizes = [8, 128], strides = [1, 1]} : vector<8x256xf32> to vector<8x128xf32>
    %c32_67 = arith.constant 32 : index
    %c0_68 = arith.constant 0 : index
    %241 = vector.load %arg13[%c32_67, %c0_68] : memref<64x256xf32, #tpu.memory_space<vmem>>, vector<8x128xf32>
    %242 = arith.addf %240, %241 : vector<8x128xf32>
    %243 = vector.extract_strided_slice %239 {offsets = [0, 128], sizes = [8, 128], strides = [1, 1]} : vector<8x256xf32> to vector<8x128xf32>
    %c24_69 = arith.constant 24 : index
    %c128_70 = arith.constant 128 : index
    %244 = vector.load %arg13[%c24_69, %c128_70] : memref<64x256xf32, #tpu.memory_space<vmem>>, vector<8x128xf32>
    %245 = arith.addf %243, %244 : vector<8x128xf32>
    %246 = vector.extract_strided_slice %242 {offsets = [0, 0], sizes = [8, 96], strides = [1, 1]} : vector<8x128xf32> to vector<8x96xf32>
    %247 = arith.negf %246 : vector<8x96xf32>
    %248 = math.exp %247 : vector<8x96xf32>
    %cst_71 = arith.constant 1.000000e+00 : f32
    %249 = vector.broadcast %cst_71 : f32 to vector<8x96xf32>
    %250 = arith.addf %249, %248 : vector<8x96xf32>
    %251 = arith.divf %249, %250 : vector<8x96xf32>
    %252 = vector.extract_strided_slice %242 {offsets = [0, 96], sizes = [8, 32], strides = [1, 1]} : vector<8x128xf32> to vector<8x32xf32>
    %253 = math.tanh %252 : vector<8x32xf32>
    %254 = vector.extract_strided_slice %251 {offsets = [0, 0], sizes = [8, 32], strides = [1, 1]} : vector<8x96xf32> to vector<8x32xf32>
    %255 = vector.extract_strided_slice %251 {offsets = [0, 32], sizes = [8, 32], strides = [1, 1]} : vector<8x96xf32> to vector<8x32xf32>
    %256 = vector.extract_strided_slice %251 {offsets = [0, 64], sizes = [8, 32], strides = [1, 1]} : vector<8x96xf32> to vector<8x32xf32>
    %257 = arith.mulf %255, %208 : vector<8x32xf32>
    %258 = arith.mulf %254, %253 : vector<8x32xf32>
    %259 = arith.addf %257, %258 : vector<8x32xf32>
    %260 = math.tanh %259 : vector<8x32xf32>
    %261 = arith.mulf %256, %260 : vector<8x32xf32>
    %262 = arith.select %236, %259, %208 : vector<8x32xi1>, vector<8x32xf32>
    %263 = vector.extract_strided_slice %245 {offsets = [0, 0], sizes = [8, 96], strides = [1, 1]} : vector<8x128xf32> to vector<8x96xf32>
    %264 = arith.negf %263 : vector<8x96xf32>
    %265 = math.exp %264 : vector<8x96xf32>
    %cst_72 = arith.constant 1.000000e+00 : f32
    %266 = vector.broadcast %cst_72 : f32 to vector<8x96xf32>
    %267 = arith.addf %266, %265 : vector<8x96xf32>
    %268 = arith.divf %266, %267 : vector<8x96xf32>
    %269 = vector.extract_strided_slice %245 {offsets = [0, 96], sizes = [8, 32], strides = [1, 1]} : vector<8x128xf32> to vector<8x32xf32>
    %270 = math.tanh %269 : vector<8x32xf32>
    %271 = vector.extract_strided_slice %268 {offsets = [0, 0], sizes = [8, 32], strides = [1, 1]} : vector<8x96xf32> to vector<8x32xf32>
    %272 = vector.extract_strided_slice %268 {offsets = [0, 32], sizes = [8, 32], strides = [1, 1]} : vector<8x96xf32> to vector<8x32xf32>
    %273 = vector.extract_strided_slice %268 {offsets = [0, 64], sizes = [8, 32], strides = [1, 1]} : vector<8x96xf32> to vector<8x32xf32>
    %274 = arith.mulf %272, %225 : vector<8x32xf32>
    %275 = arith.mulf %271, %270 : vector<8x32xf32>
    %276 = arith.addf %274, %275 : vector<8x32xf32>
    %277 = math.tanh %276 : vector<8x32xf32>
    %278 = arith.mulf %273, %277 : vector<8x32xf32>
    %279 = arith.select %238, %276, %225 : vector<8x32xi1>, vector<8x32xf32>
    %280 = arith.select %236, %261, %226 : vector<8x32xi1>, vector<8x32xf32>
    %281 = arith.select %238, %278, %227 : vector<8x32xi1>, vector<8x32xf32>
    %282 = tpu.concatenate %280, %281 in 1 : vector<8x32xf32>, vector<8x32xf32> -> vector<8x64xf32>
    %cst_73 = arith.constant 0.000000e+00 : f32
    %283 = vector.broadcast %cst_73 : f32 to vector<8x32xf32>
    %284 = arith.select %236, %261, %283 : vector<8x32xi1>, vector<8x32xf32>
    %c32_74 = arith.constant 32 : index
    %c0_75 = arith.constant 0 : index
    %285 = vector.load %arg12[%c32_74, %c0_75] : memref<64x64xf32, #tpu.memory_space<vmem>>, vector<8x32xf32>
    tpu.vector_store %arg12[%c32_74, %c0_75], %284 {strides = array<i32>} : memref<64x64xf32, #tpu.memory_space<vmem>>, vector<8x32xf32>,
    %cst_76 = arith.constant 0.000000e+00 : f32
    %286 = vector.broadcast %cst_76 : f32 to vector<8x32xf32>
    %287 = arith.select %238, %278, %286 : vector<8x32xi1>, vector<8x32xf32>
    %c24_77 = arith.constant 24 : index
    %c32_78 = arith.constant 32 : index
    %288 = vector.load %arg12[%c24_77, %c32_78] : memref<64x64xf32, #tpu.memory_space<vmem>>, vector<8x32xf32>
    tpu.vector_store %arg12[%c24_77, %c32_78], %287 {strides = array<i32>} : memref<64x64xf32, #tpu.memory_space<vmem>>, vector<8x32xf32>,
    %c5_i32_79 = arith.constant 5 : i32
    %289 = vector.broadcast %c5_i32_79 : i32 to vector<8x32xi32>
    %290 = arith.cmpi sgt, %10, %289 : vector<8x32xi32>
    %c2_i32_80 = arith.constant 2 : i32
    %291 = vector.broadcast %c2_i32_80 : i32 to vector<8x32xi32>
    %292 = arith.cmpi sgt, %10, %291 : vector<8x32xi32>
    %cst_81 = arith.constant dense<0.000000e+00> : vector<8x256xf32>
    %293 = tpu.matmul %282, %19, %cst_81 {dimension_numbers = #tpu.dot_dimension_numbers<[1], [0], [0], [1], [0, 0, 1, 1], [], []>} : vector<8x64xf32>, vector<64x256xf32>, vector<8x256xf32> -> vector<8x256xf32>
    %294 = vector.extract_strided_slice %293 {offsets = [0, 0], sizes = [8, 128], strides = [1, 1]} : vector<8x256xf32> to vector<8x128xf32>
    %c40_82 = arith.constant 40 : index
    %c0_83 = arith.constant 0 : index
    %295 = vector.load %arg13[%c40_82, %c0_83] : memref<64x256xf32, #tpu.memory_space<vmem>>, vector<8x128xf32>
    %296 = arith.addf %294, %295 : vector<8x128xf32>
    %297 = vector.extract_strided_slice %293 {offsets = [0, 128], sizes = [8, 128], strides = [1, 1]} : vector<8x256xf32> to vector<8x128xf32>
    %c16_84 = arith.constant 16 : index
    %c128_85 = arith.constant 128 : index
    %298 = vector.load %arg13[%c16_84, %c128_85] : memref<64x256xf32, #tpu.memory_space<vmem>>, vector<8x128xf32>
    %299 = arith.addf %297, %298 : vector<8x128xf32>
    %300 = vector.extract_strided_slice %296 {offsets = [0, 0], sizes = [8, 96], strides = [1, 1]} : vector<8x128xf32> to vector<8x96xf32>
    %301 = arith.negf %300 : vector<8x96xf32>
    %302 = math.exp %301 : vector<8x96xf32>
    %cst_86 = arith.constant 1.000000e+00 : f32
    %303 = vector.broadcast %cst_86 : f32 to vector<8x96xf32>
    %304 = arith.addf %303, %302 : vector<8x96xf32>
    %305 = arith.divf %303, %304 : vector<8x96xf32>
    %306 = vector.extract_strided_slice %296 {offsets = [0, 96], sizes = [8, 32], strides = [1, 1]} : vector<8x128xf32> to vector<8x32xf32>
    %307 = math.tanh %306 : vector<8x32xf32>
    %308 = vector.extract_strided_slice %305 {offsets = [0, 0], sizes = [8, 32], strides = [1, 1]} : vector<8x96xf32> to vector<8x32xf32>
    %309 = vector.extract_strided_slice %305 {offsets = [0, 32], sizes = [8, 32], strides = [1, 1]} : vector<8x96xf32> to vector<8x32xf32>
    %310 = vector.extract_strided_slice %305 {offsets = [0, 64], sizes = [8, 32], strides = [1, 1]} : vector<8x96xf32> to vector<8x32xf32>
    %311 = arith.mulf %309, %262 : vector<8x32xf32>
    %312 = arith.mulf %308, %307 : vector<8x32xf32>
    %313 = arith.addf %311, %312 : vector<8x32xf32>
    %314 = math.tanh %313 : vector<8x32xf32>
    %315 = arith.mulf %310, %314 : vector<8x32xf32>
    %316 = arith.select %290, %313, %262 : vector<8x32xi1>, vector<8x32xf32>
    %317 = vector.extract_strided_slice %299 {offsets = [0, 0], sizes = [8, 96], strides = [1, 1]} : vector<8x128xf32> to vector<8x96xf32>
    %318 = arith.negf %317 : vector<8x96xf32>
    %319 = math.exp %318 : vector<8x96xf32>
    %cst_87 = arith.constant 1.000000e+00 : f32
    %320 = vector.broadcast %cst_87 : f32 to vector<8x96xf32>
    %321 = arith.addf %320, %319 : vector<8x96xf32>
    %322 = arith.divf %320, %321 : vector<8x96xf32>
    %323 = vector.extract_strided_slice %299 {offsets = [0, 96], sizes = [8, 32], strides = [1, 1]} : vector<8x128xf32> to vector<8x32xf32>
    %324 = math.tanh %323 : vector<8x32xf32>
    %325 = vector.extract_strided_slice %322 {offsets = [0, 0], sizes = [8, 32], strides = [1, 1]} : vector<8x96xf32> to vector<8x32xf32>
    %326 = vector.extract_strided_slice %322 {offsets = [0, 32], sizes = [8, 32], strides = [1, 1]} : vector<8x96xf32> to vector<8x32xf32>
    %327 = vector.extract_strided_slice %322 {offsets = [0, 64], sizes = [8, 32], strides = [1, 1]} : vector<8x96xf32> to vector<8x32xf32>
    %328 = arith.mulf %326, %279 : vector<8x32xf32>
    %329 = arith.mulf %325, %324 : vector<8x32xf32>
    %330 = arith.addf %328, %329 : vector<8x32xf32>
    %331 = math.tanh %330 : vector<8x32xf32>
    %332 = arith.mulf %327, %331 : vector<8x32xf32>
    %333 = arith.select %292, %330, %279 : vector<8x32xi1>, vector<8x32xf32>
    %334 = arith.select %290, %315, %280 : vector<8x32xi1>, vector<8x32xf32>
    %335 = arith.select %292, %332, %281 : vector<8x32xi1>, vector<8x32xf32>
    %336 = tpu.concatenate %334, %335 in 1 : vector<8x32xf32>, vector<8x32xf32> -> vector<8x64xf32>
    %cst_88 = arith.constant 0.000000e+00 : f32
    %337 = vector.broadcast %cst_88 : f32 to vector<8x32xf32>
    %338 = arith.select %290, %315, %337 : vector<8x32xi1>, vector<8x32xf32>
    %c40_89 = arith.constant 40 : index
    %c0_90 = arith.constant 0 : index
    %339 = vector.load %arg12[%c40_89, %c0_90] : memref<64x64xf32, #tpu.memory_space<vmem>>, vector<8x32xf32>
    tpu.vector_store %arg12[%c40_89, %c0_90], %338 {strides = array<i32>} : memref<64x64xf32, #tpu.memory_space<vmem>>, vector<8x32xf32>,
    %cst_91 = arith.constant 0.000000e+00 : f32
    %340 = vector.broadcast %cst_91 : f32 to vector<8x32xf32>
    %341 = arith.select %292, %332, %340 : vector<8x32xi1>, vector<8x32xf32>
    %c16_92 = arith.constant 16 : index
    %c32_93 = arith.constant 32 : index
    %342 = vector.load %arg12[%c16_92, %c32_93] : memref<64x64xf32, #tpu.memory_space<vmem>>, vector<8x32xf32>
    tpu.vector_store %arg12[%c16_92, %c32_93], %341 {strides = array<i32>} : memref<64x64xf32, #tpu.memory_space<vmem>>, vector<8x32xf32>,
    %c6_i32_94 = arith.constant 6 : i32
    %343 = vector.broadcast %c6_i32_94 : i32 to vector<8x32xi32>
    %344 = arith.cmpi sgt, %10, %343 : vector<8x32xi32>
    %c1_i32_95 = arith.constant 1 : i32
    %345 = vector.broadcast %c1_i32_95 : i32 to vector<8x32xi32>
    %346 = arith.cmpi sgt, %10, %345 : vector<8x32xi32>
    %cst_96 = arith.constant dense<0.000000e+00> : vector<8x256xf32>
    %347 = tpu.matmul %336, %19, %cst_96 {dimension_numbers = #tpu.dot_dimension_numbers<[1], [0], [0], [1], [0, 0, 1, 1], [], []>} : vector<8x64xf32>, vector<64x256xf32>, vector<8x256xf32> -> vector<8x256xf32>
    %348 = vector.extract_strided_slice %347 {offsets = [0, 0], sizes = [8, 128], strides = [1, 1]} : vector<8x256xf32> to vector<8x128xf32>
    %c48_97 = arith.constant 48 : index
    %c0_98 = arith.constant 0 : index
    %349 = vector.load %arg13[%c48_97, %c0_98] : memref<64x256xf32, #tpu.memory_space<vmem>>, vector<8x128xf32>
    %350 = arith.addf %348, %349 : vector<8x128xf32>
    %351 = vector.extract_strided_slice %347 {offsets = [0, 128], sizes = [8, 128], strides = [1, 1]} : vector<8x256xf32> to vector<8x128xf32>
    %c8_99 = arith.constant 8 : index
    %c128_100 = arith.constant 128 : index
    %352 = vector.load %arg13[%c8_99, %c128_100] : memref<64x256xf32, #tpu.memory_space<vmem>>, vector<8x128xf32>
    %353 = arith.addf %351, %352 : vector<8x128xf32>
    %354 = vector.extract_strided_slice %350 {offsets = [0, 0], sizes = [8, 96], strides = [1, 1]} : vector<8x128xf32> to vector<8x96xf32>
    %355 = arith.negf %354 : vector<8x96xf32>
    %356 = math.exp %355 : vector<8x96xf32>
    %cst_101 = arith.constant 1.000000e+00 : f32
    %357 = vector.broadcast %cst_101 : f32 to vector<8x96xf32>
    %358 = arith.addf %357, %356 : vector<8x96xf32>
    %359 = arith.divf %357, %358 : vector<8x96xf32>
    %360 = vector.extract_strided_slice %350 {offsets = [0, 96], sizes = [8, 32], strides = [1, 1]} : vector<8x128xf32> to vector<8x32xf32>
    %361 = math.tanh %360 : vector<8x32xf32>
    %362 = vector.extract_strided_slice %359 {offsets = [0, 0], sizes = [8, 32], strides = [1, 1]} : vector<8x96xf32> to vector<8x32xf32>
    %363 = vector.extract_strided_slice %359 {offsets = [0, 32], sizes = [8, 32], strides = [1, 1]} : vector<8x96xf32> to vector<8x32xf32>
    %364 = vector.extract_strided_slice %359 {offsets = [0, 64], sizes = [8, 32], strides = [1, 1]} : vector<8x96xf32> to vector<8x32xf32>
    %365 = arith.mulf %363, %316 : vector<8x32xf32>
    %366 = arith.mulf %362, %361 : vector<8x32xf32>
    %367 = arith.addf %365, %366 : vector<8x32xf32>
    %368 = math.tanh %367 : vector<8x32xf32>
    %369 = arith.mulf %364, %368 : vector<8x32xf32>
    %370 = arith.select %344, %367, %316 : vector<8x32xi1>, vector<8x32xf32>
    %371 = vector.extract_strided_slice %353 {offsets = [0, 0], sizes = [8, 96], strides = [1, 1]} : vector<8x128xf32> to vector<8x96xf32>
    %372 = arith.negf %371 : vector<8x96xf32>
    %373 = math.exp %372 : vector<8x96xf32>
    %cst_102 = arith.constant 1.000000e+00 : f32
    %374 = vector.broadcast %cst_102 : f32 to vector<8x96xf32>
    %375 = arith.addf %374, %373 : vector<8x96xf32>
    %376 = arith.divf %374, %375 : vector<8x96xf32>
    %377 = vector.extract_strided_slice %353 {offsets = [0, 96], sizes = [8, 32], strides = [1, 1]} : vector<8x128xf32> to vector<8x32xf32>
    %378 = math.tanh %377 : vector<8x32xf32>
    %379 = vector.extract_strided_slice %376 {offsets = [0, 0], sizes = [8, 32], strides = [1, 1]} : vector<8x96xf32> to vector<8x32xf32>
    %380 = vector.extract_strided_slice %376 {offsets = [0, 32], sizes = [8, 32], strides = [1, 1]} : vector<8x96xf32> to vector<8x32xf32>
    %381 = vector.extract_strided_slice %376 {offsets = [0, 64], sizes = [8, 32], strides = [1, 1]} : vector<8x96xf32> to vector<8x32xf32>
    %382 = arith.mulf %380, %333 : vector<8x32xf32>
    %383 = arith.mulf %379, %378 : vector<8x32xf32>
    %384 = arith.addf %382, %383 : vector<8x32xf32>
    %385 = math.tanh %384 : vector<8x32xf32>
    %386 = arith.mulf %381, %385 : vector<8x32xf32>
    %387 = arith.select %346, %384, %333 : vector<8x32xi1>, vector<8x32xf32>
    %388 = arith.select %344, %369, %334 : vector<8x32xi1>, vector<8x32xf32>
    %389 = arith.select %346, %386, %335 : vector<8x32xi1>, vector<8x32xf32>
    %390 = tpu.concatenate %388, %389 in 1 : vector<8x32xf32>, vector<8x32xf32> -> vector<8x64xf32>
    %cst_103 = arith.constant 0.000000e+00 : f32
    %391 = vector.broadcast %cst_103 : f32 to vector<8x32xf32>
    %392 = arith.select %344, %369, %391 : vector<8x32xi1>, vector<8x32xf32>
    %c48_104 = arith.constant 48 : index
    %c0_105 = arith.constant 0 : index
    %393 = vector.load %arg12[%c48_104, %c0_105] : memref<64x64xf32, #tpu.memory_space<vmem>>, vector<8x32xf32>
    tpu.vector_store %arg12[%c48_104, %c0_105], %392 {strides = array<i32>} : memref<64x64xf32, #tpu.memory_space<vmem>>, vector<8x32xf32>,
    %cst_106 = arith.constant 0.000000e+00 : f32
    %394 = vector.broadcast %cst_106 : f32 to vector<8x32xf32>
    %395 = arith.select %346, %386, %394 : vector<8x32xi1>, vector<8x32xf32>
    %c8_107 = arith.constant 8 : index
    %c32_108 = arith.constant 32 : index
    %396 = vector.load %arg12[%c8_107, %c32_108] : memref<64x64xf32, #tpu.memory_space<vmem>>, vector<8x32xf32>
    tpu.vector_store %arg12[%c8_107, %c32_108], %395 {strides = array<i32>} : memref<64x64xf32, #tpu.memory_space<vmem>>, vector<8x32xf32>,
    %c7_i32_109 = arith.constant 7 : i32
    %397 = vector.broadcast %c7_i32_109 : i32 to vector<8x32xi32>
    %398 = arith.cmpi sgt, %10, %397 : vector<8x32xi32>
    %c0_i32_110 = arith.constant 0 : i32
    %399 = vector.broadcast %c0_i32_110 : i32 to vector<8x32xi32>
    %400 = arith.cmpi sgt, %10, %399 : vector<8x32xi32>
    %cst_111 = arith.constant dense<0.000000e+00> : vector<8x256xf32>
    %401 = tpu.matmul %390, %19, %cst_111 {dimension_numbers = #tpu.dot_dimension_numbers<[1], [0], [0], [1], [0, 0, 1, 1], [], []>} : vector<8x64xf32>, vector<64x256xf32>, vector<8x256xf32> -> vector<8x256xf32>
    %402 = vector.extract_strided_slice %401 {offsets = [0, 0], sizes = [8, 128], strides = [1, 1]} : vector<8x256xf32> to vector<8x128xf32>
    %c56_112 = arith.constant 56 : index
    %c0_113 = arith.constant 0 : index
    %403 = vector.load %arg13[%c56_112, %c0_113] : memref<64x256xf32, #tpu.memory_space<vmem>>, vector<8x128xf32>
    %404 = arith.addf %402, %403 : vector<8x128xf32>
    %405 = vector.extract_strided_slice %401 {offsets = [0, 128], sizes = [8, 128], strides = [1, 1]} : vector<8x256xf32> to vector<8x128xf32>
    %c0_114 = arith.constant 0 : index
    %c128_115 = arith.constant 128 : index
    %406 = vector.load %arg13[%c0_114, %c128_115] : memref<64x256xf32, #tpu.memory_space<vmem>>, vector<8x128xf32>
    %407 = arith.addf %405, %406 : vector<8x128xf32>
    %408 = vector.extract_strided_slice %404 {offsets = [0, 0], sizes = [8, 96], strides = [1, 1]} : vector<8x128xf32> to vector<8x96xf32>
    %409 = arith.negf %408 : vector<8x96xf32>
    %410 = math.exp %409 : vector<8x96xf32>
    %cst_116 = arith.constant 1.000000e+00 : f32
    %411 = vector.broadcast %cst_116 : f32 to vector<8x96xf32>
    %412 = arith.addf %411, %410 : vector<8x96xf32>
    %413 = arith.divf %411, %412 : vector<8x96xf32>
    %414 = vector.extract_strided_slice %404 {offsets = [0, 96], sizes = [8, 32], strides = [1, 1]} : vector<8x128xf32> to vector<8x32xf32>
    %415 = math.tanh %414 : vector<8x32xf32>
    %416 = vector.extract_strided_slice %413 {offsets = [0, 0], sizes = [8, 32], strides = [1, 1]} : vector<8x96xf32> to vector<8x32xf32>
    %417 = vector.extract_strided_slice %413 {offsets = [0, 32], sizes = [8, 32], strides = [1, 1]} : vector<8x96xf32> to vector<8x32xf32>
    %418 = vector.extract_strided_slice %413 {offsets = [0, 64], sizes = [8, 32], strides = [1, 1]} : vector<8x96xf32> to vector<8x32xf32>
    %419 = arith.mulf %417, %370 : vector<8x32xf32>
    %420 = arith.mulf %416, %415 : vector<8x32xf32>
    %421 = arith.addf %419, %420 : vector<8x32xf32>
    %422 = math.tanh %421 : vector<8x32xf32>
    %423 = arith.mulf %418, %422 : vector<8x32xf32>
    %424 = vector.extract_strided_slice %407 {offsets = [0, 0], sizes = [8, 96], strides = [1, 1]} : vector<8x128xf32> to vector<8x96xf32>
    %425 = arith.negf %424 : vector<8x96xf32>
    %426 = math.exp %425 : vector<8x96xf32>
    %cst_117 = arith.constant 1.000000e+00 : f32
    %427 = vector.broadcast %cst_117 : f32 to vector<8x96xf32>
    %428 = arith.addf %427, %426 : vector<8x96xf32>
    %429 = arith.divf %427, %428 : vector<8x96xf32>
    %430 = vector.extract_strided_slice %407 {offsets = [0, 96], sizes = [8, 32], strides = [1, 1]} : vector<8x128xf32> to vector<8x32xf32>
    %431 = math.tanh %430 : vector<8x32xf32>
    %432 = vector.extract_strided_slice %429 {offsets = [0, 0], sizes = [8, 32], strides = [1, 1]} : vector<8x96xf32> to vector<8x32xf32>
    %433 = vector.extract_strided_slice %429 {offsets = [0, 32], sizes = [8, 32], strides = [1, 1]} : vector<8x96xf32> to vector<8x32xf32>
    %434 = vector.extract_strided_slice %429 {offsets = [0, 64], sizes = [8, 32], strides = [1, 1]} : vector<8x96xf32> to vector<8x32xf32>
    %435 = arith.mulf %433, %387 : vector<8x32xf32>
    %436 = arith.mulf %432, %431 : vector<8x32xf32>
    %437 = arith.addf %435, %436 : vector<8x32xf32>
    %438 = math.tanh %437 : vector<8x32xf32>
    %439 = arith.mulf %434, %438 : vector<8x32xf32>
    %cst_118 = arith.constant 0.000000e+00 : f32
    %440 = vector.broadcast %cst_118 : f32 to vector<8x32xf32>
    %441 = arith.select %398, %423, %440 : vector<8x32xi1>, vector<8x32xf32>
    %c56_119 = arith.constant 56 : index
    %c0_120 = arith.constant 0 : index
    %442 = vector.load %arg12[%c56_119, %c0_120] : memref<64x64xf32, #tpu.memory_space<vmem>>, vector<8x32xf32>
    tpu.vector_store %arg12[%c56_119, %c0_120], %441 {strides = array<i32>} : memref<64x64xf32, #tpu.memory_space<vmem>>, vector<8x32xf32>,
    %cst_121 = arith.constant 0.000000e+00 : f32
    %443 = vector.broadcast %cst_121 : f32 to vector<8x32xf32>
    %444 = arith.select %400, %439, %443 : vector<8x32xi1>, vector<8x32xf32>
    %c0_122 = arith.constant 0 : index
    %c32_123 = arith.constant 32 : index
    %445 = vector.load %arg12[%c0_122, %c32_123] : memref<64x64xf32, #tpu.memory_space<vmem>>, vector<8x32xf32>
    tpu.vector_store %arg12[%c0_122, %c32_123], %444 {strides = array<i32>} : memref<64x64xf32, #tpu.memory_space<vmem>>, vector<8x32xf32>,
    %c0_124 = arith.constant 0 : index
    %c0_125 = arith.constant 0 : index
    %446 = vector.load %arg12[%c0_124, %c0_125] : memref<64x64xf32, #tpu.memory_space<vmem>>, vector<64x64xf32>
    %c0_126 = arith.constant 0 : index
    %c0_127 = arith.constant 0 : index
    %447 = vector.load %arg6[%c0_126, %c0_127] : memref<64x256xf32, #tpu.memory_space<vmem>>, vector<64x256xf32>
    %cst_128 = arith.constant dense<0.000000e+00> : vector<64x256xf32>
    %448 = tpu.matmul %446, %447, %cst_128 {dimension_numbers = #tpu.dot_dimension_numbers<[1], [0], [0], [1], [0, 0, 1, 1], [], []>} : vector<64x64xf32>, vector<64x256xf32>, vector<64x256xf32> -> vector<64x256xf32>
    %c0_129 = arith.constant 0 : index
    %c0_130 = arith.constant 0 : index
    %449 = vector.load %arg8[%c0_129, %c0_130] : memref<1x256xf32, #tpu.memory_space<vmem>>, vector<1x256xf32>
    %450 = vector.broadcast %449 : vector<1x256xf32> to vector<64x256xf32>
    %451 = arith.addf %448, %450 : vector<64x256xf32>
    %c0_131 = arith.constant 0 : index
    %c0_132 = arith.constant 0 : index
    %452 = vector.load %arg13[%c0_131, %c0_132] : memref<64x256xf32, #tpu.memory_space<vmem>>, vector<64x256xf32>
    tpu.vector_store %arg13[%c0_131, %c0_132], %451 {strides = array<i32>} : memref<64x256xf32, #tpu.memory_space<vmem>>, vector<64x256xf32>,
    %c0_133 = arith.constant 0 : index
    %c0_134 = arith.constant 0 : index
    %453 = vector.load %arg7[%c0_133, %c0_134] : memref<64x256xf32, #tpu.memory_space<vmem>>, vector<64x256xf32>
    %cst_135 = arith.constant 0.000000e+00 : f32
    %454 = vector.broadcast %cst_135 : f32 to vector<8x32xf32>
    %cst_136 = arith.constant 0.000000e+00 : f32
    %455 = vector.broadcast %cst_136 : f32 to vector<8x32xf32>
    %cst_137 = arith.constant 0.000000e+00 : f32
    %456 = vector.broadcast %cst_137 : f32 to vector<8x32xf32>
    %cst_138 = arith.constant 0.000000e+00 : f32
    %457 = vector.broadcast %cst_138 : f32 to vector<8x32xf32>
    %c0_i32_139 = arith.constant 0 : i32
    %458 = vector.broadcast %c0_i32_139 : i32 to vector<8x32xi32>
    %459 = arith.cmpi sgt, %10, %458 : vector<8x32xi32>
    %c7_i32_140 = arith.constant 7 : i32
    %460 = vector.broadcast %c7_i32_140 : i32 to vector<8x32xi32>
    %461 = arith.cmpi sgt, %10, %460 : vector<8x32xi32>
    %c0_141 = arith.constant 0 : index
    %c0_142 = arith.constant 0 : index
    %462 = vector.load %arg13[%c0_141, %c0_142] : memref<64x256xf32, #tpu.memory_space<vmem>>, vector<8x128xf32>
    %c56_143 = arith.constant 56 : index
    %c128_144 = arith.constant 128 : index
    %463 = vector.load %arg13[%c56_143, %c128_144] : memref<64x256xf32, #tpu.memory_space<vmem>>, vector<8x128xf32>
    %464 = vector.extract_strided_slice %462 {offsets = [0, 0], sizes = [8, 96], strides = [1, 1]} : vector<8x128xf32> to vector<8x96xf32>
    %465 = arith.negf %464 : vector<8x96xf32>
    %466 = math.exp %465 : vector<8x96xf32>
    %cst_145 = arith.constant 1.000000e+00 : f32
    %467 = vector.broadcast %cst_145 : f32 to vector<8x96xf32>
    %468 = arith.addf %467, %466 : vector<8x96xf32>
    %469 = arith.divf %467, %468 : vector<8x96xf32>
    %470 = vector.extract_strided_slice %462 {offsets = [0, 96], sizes = [8, 32], strides = [1, 1]} : vector<8x128xf32> to vector<8x32xf32>
    %471 = math.tanh %470 : vector<8x32xf32>
    %472 = vector.extract_strided_slice %469 {offsets = [0, 0], sizes = [8, 32], strides = [1, 1]} : vector<8x96xf32> to vector<8x32xf32>
    %473 = vector.extract_strided_slice %469 {offsets = [0, 32], sizes = [8, 32], strides = [1, 1]} : vector<8x96xf32> to vector<8x32xf32>
    %474 = vector.extract_strided_slice %469 {offsets = [0, 64], sizes = [8, 32], strides = [1, 1]} : vector<8x96xf32> to vector<8x32xf32>
    %475 = arith.mulf %473, %456 : vector<8x32xf32>
    %476 = arith.mulf %472, %471 : vector<8x32xf32>
    %477 = arith.addf %475, %476 : vector<8x32xf32>
    %478 = math.tanh %477 : vector<8x32xf32>
    %479 = arith.mulf %474, %478 : vector<8x32xf32>
    %480 = arith.select %459, %477, %456 : vector<8x32xi1>, vector<8x32xf32>
    %481 = vector.extract_strided_slice %463 {offsets = [0, 0], sizes = [8, 96], strides = [1, 1]} : vector<8x128xf32> to vector<8x96xf32>
    %482 = arith.negf %481 : vector<8x96xf32>
    %483 = math.exp %482 : vector<8x96xf32>
    %cst_146 = arith.constant 1.000000e+00 : f32
    %484 = vector.broadcast %cst_146 : f32 to vector<8x96xf32>
    %485 = arith.addf %484, %483 : vector<8x96xf32>
    %486 = arith.divf %484, %485 : vector<8x96xf32>
    %487 = vector.extract_strided_slice %463 {offsets = [0, 96], sizes = [8, 32], strides = [1, 1]} : vector<8x128xf32> to vector<8x32xf32>
    %488 = math.tanh %487 : vector<8x32xf32>
    %489 = vector.extract_strided_slice %486 {offsets = [0, 0], sizes = [8, 32], strides = [1, 1]} : vector<8x96xf32> to vector<8x32xf32>
    %490 = vector.extract_strided_slice %486 {offsets = [0, 32], sizes = [8, 32], strides = [1, 1]} : vector<8x96xf32> to vector<8x32xf32>
    %491 = vector.extract_strided_slice %486 {offsets = [0, 64], sizes = [8, 32], strides = [1, 1]} : vector<8x96xf32> to vector<8x32xf32>
    %492 = arith.mulf %490, %457 : vector<8x32xf32>
    %493 = arith.mulf %489, %488 : vector<8x32xf32>
    %494 = arith.addf %492, %493 : vector<8x32xf32>
    %495 = math.tanh %494 : vector<8x32xf32>
    %496 = arith.mulf %491, %495 : vector<8x32xf32>
    %497 = arith.select %461, %494, %457 : vector<8x32xi1>, vector<8x32xf32>
    %498 = arith.select %459, %479, %454 : vector<8x32xi1>, vector<8x32xf32>
    %499 = arith.select %461, %496, %455 : vector<8x32xi1>, vector<8x32xf32>
    %500 = tpu.concatenate %498, %499 in 1 : vector<8x32xf32>, vector<8x32xf32> -> vector<8x64xf32>
    %c1_i32_147 = arith.constant 1 : i32
    %501 = vector.broadcast %c1_i32_147 : i32 to vector<8x32xi32>
    %502 = arith.cmpi sgt, %10, %501 : vector<8x32xi32>
    %c6_i32_148 = arith.constant 6 : i32
    %503 = vector.broadcast %c6_i32_148 : i32 to vector<8x32xi32>
    %504 = arith.cmpi sgt, %10, %503 : vector<8x32xi32>
    %cst_149 = arith.constant dense<0.000000e+00> : vector<8x256xf32>
    %505 = tpu.matmul %500, %453, %cst_149 {dimension_numbers = #tpu.dot_dimension_numbers<[1], [0], [0], [1], [0, 0, 1, 1], [], []>} : vector<8x64xf32>, vector<64x256xf32>, vector<8x256xf32> -> vector<8x256xf32>
    %506 = vector.extract_strided_slice %505 {offsets = [0, 0], sizes = [8, 128], strides = [1, 1]} : vector<8x256xf32> to vector<8x128xf32>
    %c8_150 = arith.constant 8 : index
    %c0_151 = arith.constant 0 : index
    %507 = vector.load %arg13[%c8_150, %c0_151] : memref<64x256xf32, #tpu.memory_space<vmem>>, vector<8x128xf32>
    %508 = arith.addf %506, %507 : vector<8x128xf32>
    %509 = vector.extract_strided_slice %505 {offsets = [0, 128], sizes = [8, 128], strides = [1, 1]} : vector<8x256xf32> to vector<8x128xf32>
    %c48_152 = arith.constant 48 : index
    %c128_153 = arith.constant 128 : index
    %510 = vector.load %arg13[%c48_152, %c128_153] : memref<64x256xf32, #tpu.memory_space<vmem>>, vector<8x128xf32>
    %511 = arith.addf %509, %510 : vector<8x128xf32>
    %512 = vector.extract_strided_slice %508 {offsets = [0, 0], sizes = [8, 96], strides = [1, 1]} : vector<8x128xf32> to vector<8x96xf32>
    %513 = arith.negf %512 : vector<8x96xf32>
    %514 = math.exp %513 : vector<8x96xf32>
    %cst_154 = arith.constant 1.000000e+00 : f32
    %515 = vector.broadcast %cst_154 : f32 to vector<8x96xf32>
    %516 = arith.addf %515, %514 : vector<8x96xf32>
    %517 = arith.divf %515, %516 : vector<8x96xf32>
    %518 = vector.extract_strided_slice %508 {offsets = [0, 96], sizes = [8, 32], strides = [1, 1]} : vector<8x128xf32> to vector<8x32xf32>
    %519 = math.tanh %518 : vector<8x32xf32>
    %520 = vector.extract_strided_slice %517 {offsets = [0, 0], sizes = [8, 32], strides = [1, 1]} : vector<8x96xf32> to vector<8x32xf32>
    %521 = vector.extract_strided_slice %517 {offsets = [0, 32], sizes = [8, 32], strides = [1, 1]} : vector<8x96xf32> to vector<8x32xf32>
    %522 = vector.extract_strided_slice %517 {offsets = [0, 64], sizes = [8, 32], strides = [1, 1]} : vector<8x96xf32> to vector<8x32xf32>
    %523 = arith.mulf %521, %480 : vector<8x32xf32>
    %524 = arith.mulf %520, %519 : vector<8x32xf32>
    %525 = arith.addf %523, %524 : vector<8x32xf32>
    %526 = math.tanh %525 : vector<8x32xf32>
    %527 = arith.mulf %522, %526 : vector<8x32xf32>
    %528 = arith.select %502, %525, %480 : vector<8x32xi1>, vector<8x32xf32>
    %529 = vector.extract_strided_slice %511 {offsets = [0, 0], sizes = [8, 96], strides = [1, 1]} : vector<8x128xf32> to vector<8x96xf32>
    %530 = arith.negf %529 : vector<8x96xf32>
    %531 = math.exp %530 : vector<8x96xf32>
    %cst_155 = arith.constant 1.000000e+00 : f32
    %532 = vector.broadcast %cst_155 : f32 to vector<8x96xf32>
    %533 = arith.addf %532, %531 : vector<8x96xf32>
    %534 = arith.divf %532, %533 : vector<8x96xf32>
    %535 = vector.extract_strided_slice %511 {offsets = [0, 96], sizes = [8, 32], strides = [1, 1]} : vector<8x128xf32> to vector<8x32xf32>
    %536 = math.tanh %535 : vector<8x32xf32>
    %537 = vector.extract_strided_slice %534 {offsets = [0, 0], sizes = [8, 32], strides = [1, 1]} : vector<8x96xf32> to vector<8x32xf32>
    %538 = vector.extract_strided_slice %534 {offsets = [0, 32], sizes = [8, 32], strides = [1, 1]} : vector<8x96xf32> to vector<8x32xf32>
    %539 = vector.extract_strided_slice %534 {offsets = [0, 64], sizes = [8, 32], strides = [1, 1]} : vector<8x96xf32> to vector<8x32xf32>
    %540 = arith.mulf %538, %497 : vector<8x32xf32>
    %541 = arith.mulf %537, %536 : vector<8x32xf32>
    %542 = arith.addf %540, %541 : vector<8x32xf32>
    %543 = math.tanh %542 : vector<8x32xf32>
    %544 = arith.mulf %539, %543 : vector<8x32xf32>
    %545 = arith.select %504, %542, %497 : vector<8x32xi1>, vector<8x32xf32>
    %546 = arith.select %502, %527, %498 : vector<8x32xi1>, vector<8x32xf32>
    %547 = arith.select %504, %544, %499 : vector<8x32xi1>, vector<8x32xf32>
    %548 = tpu.concatenate %546, %547 in 1 : vector<8x32xf32>, vector<8x32xf32> -> vector<8x64xf32>
    %c2_i32_156 = arith.constant 2 : i32
    %549 = vector.broadcast %c2_i32_156 : i32 to vector<8x32xi32>
    %550 = arith.cmpi sgt, %10, %549 : vector<8x32xi32>
    %c5_i32_157 = arith.constant 5 : i32
    %551 = vector.broadcast %c5_i32_157 : i32 to vector<8x32xi32>
    %552 = arith.cmpi sgt, %10, %551 : vector<8x32xi32>
    %cst_158 = arith.constant dense<0.000000e+00> : vector<8x256xf32>
    %553 = tpu.matmul %548, %453, %cst_158 {dimension_numbers = #tpu.dot_dimension_numbers<[1], [0], [0], [1], [0, 0, 1, 1], [], []>} : vector<8x64xf32>, vector<64x256xf32>, vector<8x256xf32> -> vector<8x256xf32>
    %554 = vector.extract_strided_slice %553 {offsets = [0, 0], sizes = [8, 128], strides = [1, 1]} : vector<8x256xf32> to vector<8x128xf32>
    %c16_159 = arith.constant 16 : index
    %c0_160 = arith.constant 0 : index
    %555 = vector.load %arg13[%c16_159, %c0_160] : memref<64x256xf32, #tpu.memory_space<vmem>>, vector<8x128xf32>
    %556 = arith.addf %554, %555 : vector<8x128xf32>
    %557 = vector.extract_strided_slice %553 {offsets = [0, 128], sizes = [8, 128], strides = [1, 1]} : vector<8x256xf32> to vector<8x128xf32>
    %c40_161 = arith.constant 40 : index
    %c128_162 = arith.constant 128 : index
    %558 = vector.load %arg13[%c40_161, %c128_162] : memref<64x256xf32, #tpu.memory_space<vmem>>, vector<8x128xf32>
    %559 = arith.addf %557, %558 : vector<8x128xf32>
    %560 = vector.extract_strided_slice %556 {offsets = [0, 0], sizes = [8, 96], strides = [1, 1]} : vector<8x128xf32> to vector<8x96xf32>
    %561 = arith.negf %560 : vector<8x96xf32>
    %562 = math.exp %561 : vector<8x96xf32>
    %cst_163 = arith.constant 1.000000e+00 : f32
    %563 = vector.broadcast %cst_163 : f32 to vector<8x96xf32>
    %564 = arith.addf %563, %562 : vector<8x96xf32>
    %565 = arith.divf %563, %564 : vector<8x96xf32>
    %566 = vector.extract_strided_slice %556 {offsets = [0, 96], sizes = [8, 32], strides = [1, 1]} : vector<8x128xf32> to vector<8x32xf32>
    %567 = math.tanh %566 : vector<8x32xf32>
    %568 = vector.extract_strided_slice %565 {offsets = [0, 0], sizes = [8, 32], strides = [1, 1]} : vector<8x96xf32> to vector<8x32xf32>
    %569 = vector.extract_strided_slice %565 {offsets = [0, 32], sizes = [8, 32], strides = [1, 1]} : vector<8x96xf32> to vector<8x32xf32>
    %570 = vector.extract_strided_slice %565 {offsets = [0, 64], sizes = [8, 32], strides = [1, 1]} : vector<8x96xf32> to vector<8x32xf32>
    %571 = arith.mulf %569, %528 : vector<8x32xf32>
    %572 = arith.mulf %568, %567 : vector<8x32xf32>
    %573 = arith.addf %571, %572 : vector<8x32xf32>
    %574 = math.tanh %573 : vector<8x32xf32>
    %575 = arith.mulf %570, %574 : vector<8x32xf32>
    %576 = arith.select %550, %573, %528 : vector<8x32xi1>, vector<8x32xf32>
    %577 = vector.extract_strided_slice %559 {offsets = [0, 0], sizes = [8, 96], strides = [1, 1]} : vector<8x128xf32> to vector<8x96xf32>
    %578 = arith.negf %577 : vector<8x96xf32>
    %579 = math.exp %578 : vector<8x96xf32>
    %cst_164 = arith.constant 1.000000e+00 : f32
    %580 = vector.broadcast %cst_164 : f32 to vector<8x96xf32>
    %581 = arith.addf %580, %579 : vector<8x96xf32>
    %582 = arith.divf %580, %581 : vector<8x96xf32>
    %583 = vector.extract_strided_slice %559 {offsets = [0, 96], sizes = [8, 32], strides = [1, 1]} : vector<8x128xf32> to vector<8x32xf32>
    %584 = math.tanh %583 : vector<8x32xf32>
    %585 = vector.extract_strided_slice %582 {offsets = [0, 0], sizes = [8, 32], strides = [1, 1]} : vector<8x96xf32> to vector<8x32xf32>
    %586 = vector.extract_strided_slice %582 {offsets = [0, 32], sizes = [8, 32], strides = [1, 1]} : vector<8x96xf32> to vector<8x32xf32>
    %587 = vector.extract_strided_slice %582 {offsets = [0, 64], sizes = [8, 32], strides = [1, 1]} : vector<8x96xf32> to vector<8x32xf32>
    %588 = arith.mulf %586, %545 : vector<8x32xf32>
    %589 = arith.mulf %585, %584 : vector<8x32xf32>
    %590 = arith.addf %588, %589 : vector<8x32xf32>
    %591 = math.tanh %590 : vector<8x32xf32>
    %592 = arith.mulf %587, %591 : vector<8x32xf32>
    %593 = arith.select %552, %590, %545 : vector<8x32xi1>, vector<8x32xf32>
    %594 = arith.select %550, %575, %546 : vector<8x32xi1>, vector<8x32xf32>
    %595 = arith.select %552, %592, %547 : vector<8x32xi1>, vector<8x32xf32>
    %596 = tpu.concatenate %594, %595 in 1 : vector<8x32xf32>, vector<8x32xf32> -> vector<8x64xf32>
    %c3_i32_165 = arith.constant 3 : i32
    %597 = vector.broadcast %c3_i32_165 : i32 to vector<8x32xi32>
    %598 = arith.cmpi sgt, %10, %597 : vector<8x32xi32>
    %c4_i32_166 = arith.constant 4 : i32
    %599 = vector.broadcast %c4_i32_166 : i32 to vector<8x32xi32>
    %600 = arith.cmpi sgt, %10, %599 : vector<8x32xi32>
    %cst_167 = arith.constant dense<0.000000e+00> : vector<8x256xf32>
    %601 = tpu.matmul %596, %453, %cst_167 {dimension_numbers = #tpu.dot_dimension_numbers<[1], [0], [0], [1], [0, 0, 1, 1], [], []>} : vector<8x64xf32>, vector<64x256xf32>, vector<8x256xf32> -> vector<8x256xf32>
    %602 = vector.extract_strided_slice %601 {offsets = [0, 0], sizes = [8, 128], strides = [1, 1]} : vector<8x256xf32> to vector<8x128xf32>
    %c24_168 = arith.constant 24 : index
    %c0_169 = arith.constant 0 : index
    %603 = vector.load %arg13[%c24_168, %c0_169] : memref<64x256xf32, #tpu.memory_space<vmem>>, vector<8x128xf32>
    %604 = arith.addf %602, %603 : vector<8x128xf32>
    %605 = vector.extract_strided_slice %601 {offsets = [0, 128], sizes = [8, 128], strides = [1, 1]} : vector<8x256xf32> to vector<8x128xf32>
    %c32_170 = arith.constant 32 : index
    %c128_171 = arith.constant 128 : index
    %606 = vector.load %arg13[%c32_170, %c128_171] : memref<64x256xf32, #tpu.memory_space<vmem>>, vector<8x128xf32>
    %607 = arith.addf %605, %606 : vector<8x128xf32>
    %608 = vector.extract_strided_slice %604 {offsets = [0, 0], sizes = [8, 96], strides = [1, 1]} : vector<8x128xf32> to vector<8x96xf32>
    %609 = arith.negf %608 : vector<8x96xf32>
    %610 = math.exp %609 : vector<8x96xf32>
    %cst_172 = arith.constant 1.000000e+00 : f32
    %611 = vector.broadcast %cst_172 : f32 to vector<8x96xf32>
    %612 = arith.addf %611, %610 : vector<8x96xf32>
    %613 = arith.divf %611, %612 : vector<8x96xf32>
    %614 = vector.extract_strided_slice %604 {offsets = [0, 96], sizes = [8, 32], strides = [1, 1]} : vector<8x128xf32> to vector<8x32xf32>
    %615 = math.tanh %614 : vector<8x32xf32>
    %616 = vector.extract_strided_slice %613 {offsets = [0, 0], sizes = [8, 32], strides = [1, 1]} : vector<8x96xf32> to vector<8x32xf32>
    %617 = vector.extract_strided_slice %613 {offsets = [0, 32], sizes = [8, 32], strides = [1, 1]} : vector<8x96xf32> to vector<8x32xf32>
    %618 = vector.extract_strided_slice %613 {offsets = [0, 64], sizes = [8, 32], strides = [1, 1]} : vector<8x96xf32> to vector<8x32xf32>
    %619 = arith.mulf %617, %576 : vector<8x32xf32>
    %620 = arith.mulf %616, %615 : vector<8x32xf32>
    %621 = arith.addf %619, %620 : vector<8x32xf32>
    %622 = math.tanh %621 : vector<8x32xf32>
    %623 = arith.mulf %618, %622 : vector<8x32xf32>
    %624 = arith.select %598, %621, %576 : vector<8x32xi1>, vector<8x32xf32>
    %625 = vector.extract_strided_slice %607 {offsets = [0, 0], sizes = [8, 96], strides = [1, 1]} : vector<8x128xf32> to vector<8x96xf32>
    %626 = arith.negf %625 : vector<8x96xf32>
    %627 = math.exp %626 : vector<8x96xf32>
    %cst_173 = arith.constant 1.000000e+00 : f32
    %628 = vector.broadcast %cst_173 : f32 to vector<8x96xf32>
    %629 = arith.addf %628, %627 : vector<8x96xf32>
    %630 = arith.divf %628, %629 : vector<8x96xf32>
    %631 = vector.extract_strided_slice %607 {offsets = [0, 96], sizes = [8, 32], strides = [1, 1]} : vector<8x128xf32> to vector<8x32xf32>
    %632 = math.tanh %631 : vector<8x32xf32>
    %633 = vector.extract_strided_slice %630 {offsets = [0, 0], sizes = [8, 32], strides = [1, 1]} : vector<8x96xf32> to vector<8x32xf32>
    %634 = vector.extract_strided_slice %630 {offsets = [0, 32], sizes = [8, 32], strides = [1, 1]} : vector<8x96xf32> to vector<8x32xf32>
    %635 = vector.extract_strided_slice %630 {offsets = [0, 64], sizes = [8, 32], strides = [1, 1]} : vector<8x96xf32> to vector<8x32xf32>
    %636 = arith.mulf %634, %593 : vector<8x32xf32>
    %637 = arith.mulf %633, %632 : vector<8x32xf32>
    %638 = arith.addf %636, %637 : vector<8x32xf32>
    %639 = math.tanh %638 : vector<8x32xf32>
    %640 = arith.mulf %635, %639 : vector<8x32xf32>
    %641 = arith.select %600, %638, %593 : vector<8x32xi1>, vector<8x32xf32>
    %642 = arith.select %598, %623, %594 : vector<8x32xi1>, vector<8x32xf32>
    %643 = arith.select %600, %640, %595 : vector<8x32xi1>, vector<8x32xf32>
    %644 = tpu.concatenate %642, %643 in 1 : vector<8x32xf32>, vector<8x32xf32> -> vector<8x64xf32>
    %c4_i32_174 = arith.constant 4 : i32
    %645 = vector.broadcast %c4_i32_174 : i32 to vector<8x32xi32>
    %646 = arith.cmpi sgt, %10, %645 : vector<8x32xi32>
    %c3_i32_175 = arith.constant 3 : i32
    %647 = vector.broadcast %c3_i32_175 : i32 to vector<8x32xi32>
    %648 = arith.cmpi sgt, %10, %647 : vector<8x32xi32>
    %cst_176 = arith.constant dense<0.000000e+00> : vector<8x256xf32>
    %649 = tpu.matmul %644, %453, %cst_176 {dimension_numbers = #tpu.dot_dimension_numbers<[1], [0], [0], [1], [0, 0, 1, 1], [], []>} : vector<8x64xf32>, vector<64x256xf32>, vector<8x256xf32> -> vector<8x256xf32>
    %650 = vector.extract_strided_slice %649 {offsets = [0, 0], sizes = [8, 128], strides = [1, 1]} : vector<8x256xf32> to vector<8x128xf32>
    %c32_177 = arith.constant 32 : index
    %c0_178 = arith.constant 0 : index
    %651 = vector.load %arg13[%c32_177, %c0_178] : memref<64x256xf32, #tpu.memory_space<vmem>>, vector<8x128xf32>
    %652 = arith.addf %650, %651 : vector<8x128xf32>
    %653 = vector.extract_strided_slice %649 {offsets = [0, 128], sizes = [8, 128], strides = [1, 1]} : vector<8x256xf32> to vector<8x128xf32>
    %c24_179 = arith.constant 24 : index
    %c128_180 = arith.constant 128 : index
    %654 = vector.load %arg13[%c24_179, %c128_180] : memref<64x256xf32, #tpu.memory_space<vmem>>, vector<8x128xf32>
    %655 = arith.addf %653, %654 : vector<8x128xf32>
    %656 = vector.extract_strided_slice %652 {offsets = [0, 0], sizes = [8, 96], strides = [1, 1]} : vector<8x128xf32> to vector<8x96xf32>
    %657 = arith.negf %656 : vector<8x96xf32>
    %658 = math.exp %657 : vector<8x96xf32>
    %cst_181 = arith.constant 1.000000e+00 : f32
    %659 = vector.broadcast %cst_181 : f32 to vector<8x96xf32>
    %660 = arith.addf %659, %658 : vector<8x96xf32>
    %661 = arith.divf %659, %660 : vector<8x96xf32>
    %662 = vector.extract_strided_slice %652 {offsets = [0, 96], sizes = [8, 32], strides = [1, 1]} : vector<8x128xf32> to vector<8x32xf32>
    %663 = math.tanh %662 : vector<8x32xf32>
    %664 = vector.extract_strided_slice %661 {offsets = [0, 0], sizes = [8, 32], strides = [1, 1]} : vector<8x96xf32> to vector<8x32xf32>
    %665 = vector.extract_strided_slice %661 {offsets = [0, 32], sizes = [8, 32], strides = [1, 1]} : vector<8x96xf32> to vector<8x32xf32>
    %666 = vector.extract_strided_slice %661 {offsets = [0, 64], sizes = [8, 32], strides = [1, 1]} : vector<8x96xf32> to vector<8x32xf32>
    %667 = arith.mulf %665, %624 : vector<8x32xf32>
    %668 = arith.mulf %664, %663 : vector<8x32xf32>
    %669 = arith.addf %667, %668 : vector<8x32xf32>
    %670 = math.tanh %669 : vector<8x32xf32>
    %671 = arith.mulf %666, %670 : vector<8x32xf32>
    %672 = arith.select %646, %669, %624 : vector<8x32xi1>, vector<8x32xf32>
    %673 = vector.extract_strided_slice %655 {offsets = [0, 0], sizes = [8, 96], strides = [1, 1]} : vector<8x128xf32> to vector<8x96xf32>
    %674 = arith.negf %673 : vector<8x96xf32>
    %675 = math.exp %674 : vector<8x96xf32>
    %cst_182 = arith.constant 1.000000e+00 : f32
    %676 = vector.broadcast %cst_182 : f32 to vector<8x96xf32>
    %677 = arith.addf %676, %675 : vector<8x96xf32>
    %678 = arith.divf %676, %677 : vector<8x96xf32>
    %679 = vector.extract_strided_slice %655 {offsets = [0, 96], sizes = [8, 32], strides = [1, 1]} : vector<8x128xf32> to vector<8x32xf32>
    %680 = math.tanh %679 : vector<8x32xf32>
    %681 = vector.extract_strided_slice %678 {offsets = [0, 0], sizes = [8, 32], strides = [1, 1]} : vector<8x96xf32> to vector<8x32xf32>
    %682 = vector.extract_strided_slice %678 {offsets = [0, 32], sizes = [8, 32], strides = [1, 1]} : vector<8x96xf32> to vector<8x32xf32>
    %683 = vector.extract_strided_slice %678 {offsets = [0, 64], sizes = [8, 32], strides = [1, 1]} : vector<8x96xf32> to vector<8x32xf32>
    %684 = arith.mulf %682, %641 : vector<8x32xf32>
    %685 = arith.mulf %681, %680 : vector<8x32xf32>
    %686 = arith.addf %684, %685 : vector<8x32xf32>
    %687 = math.tanh %686 : vector<8x32xf32>
    %688 = arith.mulf %683, %687 : vector<8x32xf32>
    %689 = arith.select %648, %686, %641 : vector<8x32xi1>, vector<8x32xf32>
    %690 = arith.select %646, %671, %642 : vector<8x32xi1>, vector<8x32xf32>
    %691 = arith.select %648, %688, %643 : vector<8x32xi1>, vector<8x32xf32>
    %692 = tpu.concatenate %690, %691 in 1 : vector<8x32xf32>, vector<8x32xf32> -> vector<8x64xf32>
    %c5_i32_183 = arith.constant 5 : i32
    %693 = vector.broadcast %c5_i32_183 : i32 to vector<8x32xi32>
    %694 = arith.cmpi sgt, %10, %693 : vector<8x32xi32>
    %c2_i32_184 = arith.constant 2 : i32
    %695 = vector.broadcast %c2_i32_184 : i32 to vector<8x32xi32>
    %696 = arith.cmpi sgt, %10, %695 : vector<8x32xi32>
    %cst_185 = arith.constant dense<0.000000e+00> : vector<8x256xf32>
    %697 = tpu.matmul %692, %453, %cst_185 {dimension_numbers = #tpu.dot_dimension_numbers<[1], [0], [0], [1], [0, 0, 1, 1], [], []>} : vector<8x64xf32>, vector<64x256xf32>, vector<8x256xf32> -> vector<8x256xf32>
    %698 = vector.extract_strided_slice %697 {offsets = [0, 0], sizes = [8, 128], strides = [1, 1]} : vector<8x256xf32> to vector<8x128xf32>
    %c40_186 = arith.constant 40 : index
    %c0_187 = arith.constant 0 : index
    %699 = vector.load %arg13[%c40_186, %c0_187] : memref<64x256xf32, #tpu.memory_space<vmem>>, vector<8x128xf32>
    %700 = arith.addf %698, %699 : vector<8x128xf32>
    %701 = vector.extract_strided_slice %697 {offsets = [0, 128], sizes = [8, 128], strides = [1, 1]} : vector<8x256xf32> to vector<8x128xf32>
    %c16_188 = arith.constant 16 : index
    %c128_189 = arith.constant 128 : index
    %702 = vector.load %arg13[%c16_188, %c128_189] : memref<64x256xf32, #tpu.memory_space<vmem>>, vector<8x128xf32>
    %703 = arith.addf %701, %702 : vector<8x128xf32>
    %704 = vector.extract_strided_slice %700 {offsets = [0, 0], sizes = [8, 96], strides = [1, 1]} : vector<8x128xf32> to vector<8x96xf32>
    %705 = arith.negf %704 : vector<8x96xf32>
    %706 = math.exp %705 : vector<8x96xf32>
    %cst_190 = arith.constant 1.000000e+00 : f32
    %707 = vector.broadcast %cst_190 : f32 to vector<8x96xf32>
    %708 = arith.addf %707, %706 : vector<8x96xf32>
    %709 = arith.divf %707, %708 : vector<8x96xf32>
    %710 = vector.extract_strided_slice %700 {offsets = [0, 96], sizes = [8, 32], strides = [1, 1]} : vector<8x128xf32> to vector<8x32xf32>
    %711 = math.tanh %710 : vector<8x32xf32>
    %712 = vector.extract_strided_slice %709 {offsets = [0, 0], sizes = [8, 32], strides = [1, 1]} : vector<8x96xf32> to vector<8x32xf32>
    %713 = vector.extract_strided_slice %709 {offsets = [0, 32], sizes = [8, 32], strides = [1, 1]} : vector<8x96xf32> to vector<8x32xf32>
    %714 = vector.extract_strided_slice %709 {offsets = [0, 64], sizes = [8, 32], strides = [1, 1]} : vector<8x96xf32> to vector<8x32xf32>
    %715 = arith.mulf %713, %672 : vector<8x32xf32>
    %716 = arith.mulf %712, %711 : vector<8x32xf32>
    %717 = arith.addf %715, %716 : vector<8x32xf32>
    %718 = math.tanh %717 : vector<8x32xf32>
    %719 = arith.mulf %714, %718 : vector<8x32xf32>
    %720 = arith.select %694, %717, %672 : vector<8x32xi1>, vector<8x32xf32>
    %721 = vector.extract_strided_slice %703 {offsets = [0, 0], sizes = [8, 96], strides = [1, 1]} : vector<8x128xf32> to vector<8x96xf32>
    %722 = arith.negf %721 : vector<8x96xf32>
    %723 = math.exp %722 : vector<8x96xf32>
    %cst_191 = arith.constant 1.000000e+00 : f32
    %724 = vector.broadcast %cst_191 : f32 to vector<8x96xf32>
    %725 = arith.addf %724, %723 : vector<8x96xf32>
    %726 = arith.divf %724, %725 : vector<8x96xf32>
    %727 = vector.extract_strided_slice %703 {offsets = [0, 96], sizes = [8, 32], strides = [1, 1]} : vector<8x128xf32> to vector<8x32xf32>
    %728 = math.tanh %727 : vector<8x32xf32>
    %729 = vector.extract_strided_slice %726 {offsets = [0, 0], sizes = [8, 32], strides = [1, 1]} : vector<8x96xf32> to vector<8x32xf32>
    %730 = vector.extract_strided_slice %726 {offsets = [0, 32], sizes = [8, 32], strides = [1, 1]} : vector<8x96xf32> to vector<8x32xf32>
    %731 = vector.extract_strided_slice %726 {offsets = [0, 64], sizes = [8, 32], strides = [1, 1]} : vector<8x96xf32> to vector<8x32xf32>
    %732 = arith.mulf %730, %689 : vector<8x32xf32>
    %733 = arith.mulf %729, %728 : vector<8x32xf32>
    %734 = arith.addf %732, %733 : vector<8x32xf32>
    %735 = math.tanh %734 : vector<8x32xf32>
    %736 = arith.mulf %731, %735 : vector<8x32xf32>
    %737 = arith.select %696, %734, %689 : vector<8x32xi1>, vector<8x32xf32>
    %738 = arith.select %694, %719, %690 : vector<8x32xi1>, vector<8x32xf32>
    %739 = arith.select %696, %736, %691 : vector<8x32xi1>, vector<8x32xf32>
    %740 = tpu.concatenate %738, %739 in 1 : vector<8x32xf32>, vector<8x32xf32> -> vector<8x64xf32>
    %c6_i32_192 = arith.constant 6 : i32
    %741 = vector.broadcast %c6_i32_192 : i32 to vector<8x32xi32>
    %742 = arith.cmpi sgt, %10, %741 : vector<8x32xi32>
    %c1_i32_193 = arith.constant 1 : i32
    %743 = vector.broadcast %c1_i32_193 : i32 to vector<8x32xi32>
    %744 = arith.cmpi sgt, %10, %743 : vector<8x32xi32>
    %cst_194 = arith.constant dense<0.000000e+00> : vector<8x256xf32>
    %745 = tpu.matmul %740, %453, %cst_194 {dimension_numbers = #tpu.dot_dimension_numbers<[1], [0], [0], [1], [0, 0, 1, 1], [], []>} : vector<8x64xf32>, vector<64x256xf32>, vector<8x256xf32> -> vector<8x256xf32>
    %746 = vector.extract_strided_slice %745 {offsets = [0, 0], sizes = [8, 128], strides = [1, 1]} : vector<8x256xf32> to vector<8x128xf32>
    %c48_195 = arith.constant 48 : index
    %c0_196 = arith.constant 0 : index
    %747 = vector.load %arg13[%c48_195, %c0_196] : memref<64x256xf32, #tpu.memory_space<vmem>>, vector<8x128xf32>
    %748 = arith.addf %746, %747 : vector<8x128xf32>
    %749 = vector.extract_strided_slice %745 {offsets = [0, 128], sizes = [8, 128], strides = [1, 1]} : vector<8x256xf32> to vector<8x128xf32>
    %c8_197 = arith.constant 8 : index
    %c128_198 = arith.constant 128 : index
    %750 = vector.load %arg13[%c8_197, %c128_198] : memref<64x256xf32, #tpu.memory_space<vmem>>, vector<8x128xf32>
    %751 = arith.addf %749, %750 : vector<8x128xf32>
    %752 = vector.extract_strided_slice %748 {offsets = [0, 0], sizes = [8, 96], strides = [1, 1]} : vector<8x128xf32> to vector<8x96xf32>
    %753 = arith.negf %752 : vector<8x96xf32>
    %754 = math.exp %753 : vector<8x96xf32>
    %cst_199 = arith.constant 1.000000e+00 : f32
    %755 = vector.broadcast %cst_199 : f32 to vector<8x96xf32>
    %756 = arith.addf %755, %754 : vector<8x96xf32>
    %757 = arith.divf %755, %756 : vector<8x96xf32>
    %758 = vector.extract_strided_slice %748 {offsets = [0, 96], sizes = [8, 32], strides = [1, 1]} : vector<8x128xf32> to vector<8x32xf32>
    %759 = math.tanh %758 : vector<8x32xf32>
    %760 = vector.extract_strided_slice %757 {offsets = [0, 0], sizes = [8, 32], strides = [1, 1]} : vector<8x96xf32> to vector<8x32xf32>
    %761 = vector.extract_strided_slice %757 {offsets = [0, 32], sizes = [8, 32], strides = [1, 1]} : vector<8x96xf32> to vector<8x32xf32>
    %762 = vector.extract_strided_slice %757 {offsets = [0, 64], sizes = [8, 32], strides = [1, 1]} : vector<8x96xf32> to vector<8x32xf32>
    %763 = arith.mulf %761, %720 : vector<8x32xf32>
    %764 = arith.mulf %760, %759 : vector<8x32xf32>
    %765 = arith.addf %763, %764 : vector<8x32xf32>
    %766 = math.tanh %765 : vector<8x32xf32>
    %767 = arith.mulf %762, %766 : vector<8x32xf32>
    %768 = arith.select %742, %765, %720 : vector<8x32xi1>, vector<8x32xf32>
    %769 = vector.extract_strided_slice %751 {offsets = [0, 0], sizes = [8, 96], strides = [1, 1]} : vector<8x128xf32> to vector<8x96xf32>
    %770 = arith.negf %769 : vector<8x96xf32>
    %771 = math.exp %770 : vector<8x96xf32>
    %cst_200 = arith.constant 1.000000e+00 : f32
    %772 = vector.broadcast %cst_200 : f32 to vector<8x96xf32>
    %773 = arith.addf %772, %771 : vector<8x96xf32>
    %774 = arith.divf %772, %773 : vector<8x96xf32>
    %775 = vector.extract_strided_slice %751 {offsets = [0, 96], sizes = [8, 32], strides = [1, 1]} : vector<8x128xf32> to vector<8x32xf32>
    %776 = math.tanh %775 : vector<8x32xf32>
    %777 = vector.extract_strided_slice %774 {offsets = [0, 0], sizes = [8, 32], strides = [1, 1]} : vector<8x96xf32> to vector<8x32xf32>
    %778 = vector.extract_strided_slice %774 {offsets = [0, 32], sizes = [8, 32], strides = [1, 1]} : vector<8x96xf32> to vector<8x32xf32>
    %779 = vector.extract_strided_slice %774 {offsets = [0, 64], sizes = [8, 32], strides = [1, 1]} : vector<8x96xf32> to vector<8x32xf32>
    %780 = arith.mulf %778, %737 : vector<8x32xf32>
    %781 = arith.mulf %777, %776 : vector<8x32xf32>
    %782 = arith.addf %780, %781 : vector<8x32xf32>
    %783 = math.tanh %782 : vector<8x32xf32>
    %784 = arith.mulf %779, %783 : vector<8x32xf32>
    %785 = arith.select %744, %782, %737 : vector<8x32xi1>, vector<8x32xf32>
    %786 = arith.select %742, %767, %738 : vector<8x32xi1>, vector<8x32xf32>
    %787 = arith.select %744, %784, %739 : vector<8x32xi1>, vector<8x32xf32>
    %788 = tpu.concatenate %786, %787 in 1 : vector<8x32xf32>, vector<8x32xf32> -> vector<8x64xf32>
    %c7_i32_201 = arith.constant 7 : i32
    %789 = vector.broadcast %c7_i32_201 : i32 to vector<8x32xi32>
    %790 = arith.cmpi sgt, %10, %789 : vector<8x32xi32>
    %c0_i32_202 = arith.constant 0 : i32
    %791 = vector.broadcast %c0_i32_202 : i32 to vector<8x32xi32>
    %792 = arith.cmpi sgt, %10, %791 : vector<8x32xi32>
    %cst_203 = arith.constant dense<0.000000e+00> : vector<8x256xf32>
    %793 = tpu.matmul %788, %453, %cst_203 {dimension_numbers = #tpu.dot_dimension_numbers<[1], [0], [0], [1], [0, 0, 1, 1], [], []>} : vector<8x64xf32>, vector<64x256xf32>, vector<8x256xf32> -> vector<8x256xf32>
    %794 = vector.extract_strided_slice %793 {offsets = [0, 0], sizes = [8, 128], strides = [1, 1]} : vector<8x256xf32> to vector<8x128xf32>
    %c56_204 = arith.constant 56 : index
    %c0_205 = arith.constant 0 : index
    %795 = vector.load %arg13[%c56_204, %c0_205] : memref<64x256xf32, #tpu.memory_space<vmem>>, vector<8x128xf32>
    %796 = arith.addf %794, %795 : vector<8x128xf32>
    %797 = vector.extract_strided_slice %793 {offsets = [0, 128], sizes = [8, 128], strides = [1, 1]} : vector<8x256xf32> to vector<8x128xf32>
    %c0_206 = arith.constant 0 : index
    %c128_207 = arith.constant 128 : index
    %798 = vector.load %arg13[%c0_206, %c128_207] : memref<64x256xf32, #tpu.memory_space<vmem>>, vector<8x128xf32>
    %799 = arith.addf %797, %798 : vector<8x128xf32>
    %800 = vector.extract_strided_slice %796 {offsets = [0, 0], sizes = [8, 96], strides = [1, 1]} : vector<8x128xf32> to vector<8x96xf32>
    %801 = arith.negf %800 : vector<8x96xf32>
    %802 = math.exp %801 : vector<8x96xf32>
    %cst_208 = arith.constant 1.000000e+00 : f32
    %803 = vector.broadcast %cst_208 : f32 to vector<8x96xf32>
    %804 = arith.addf %803, %802 : vector<8x96xf32>
    %805 = arith.divf %803, %804 : vector<8x96xf32>
    %806 = vector.extract_strided_slice %796 {offsets = [0, 96], sizes = [8, 32], strides = [1, 1]} : vector<8x128xf32> to vector<8x32xf32>
    %807 = math.tanh %806 : vector<8x32xf32>
    %808 = vector.extract_strided_slice %805 {offsets = [0, 0], sizes = [8, 32], strides = [1, 1]} : vector<8x96xf32> to vector<8x32xf32>
    %809 = vector.extract_strided_slice %805 {offsets = [0, 32], sizes = [8, 32], strides = [1, 1]} : vector<8x96xf32> to vector<8x32xf32>
    %810 = vector.extract_strided_slice %805 {offsets = [0, 64], sizes = [8, 32], strides = [1, 1]} : vector<8x96xf32> to vector<8x32xf32>
    %811 = arith.mulf %809, %768 : vector<8x32xf32>
    %812 = arith.mulf %808, %807 : vector<8x32xf32>
    %813 = arith.addf %811, %812 : vector<8x32xf32>
    %814 = math.tanh %813 : vector<8x32xf32>
    %815 = arith.mulf %810, %814 : vector<8x32xf32>
    %816 = vector.extract_strided_slice %799 {offsets = [0, 0], sizes = [8, 96], strides = [1, 1]} : vector<8x128xf32> to vector<8x96xf32>
    %817 = arith.negf %816 : vector<8x96xf32>
    %818 = math.exp %817 : vector<8x96xf32>
    %cst_209 = arith.constant 1.000000e+00 : f32
    %819 = vector.broadcast %cst_209 : f32 to vector<8x96xf32>
    %820 = arith.addf %819, %818 : vector<8x96xf32>
    %821 = arith.divf %819, %820 : vector<8x96xf32>
    %822 = vector.extract_strided_slice %799 {offsets = [0, 96], sizes = [8, 32], strides = [1, 1]} : vector<8x128xf32> to vector<8x32xf32>
    %823 = math.tanh %822 : vector<8x32xf32>
    %824 = vector.extract_strided_slice %821 {offsets = [0, 0], sizes = [8, 32], strides = [1, 1]} : vector<8x96xf32> to vector<8x32xf32>
    %825 = vector.extract_strided_slice %821 {offsets = [0, 32], sizes = [8, 32], strides = [1, 1]} : vector<8x96xf32> to vector<8x32xf32>
    %826 = vector.extract_strided_slice %821 {offsets = [0, 64], sizes = [8, 32], strides = [1, 1]} : vector<8x96xf32> to vector<8x32xf32>
    %827 = arith.mulf %825, %785 : vector<8x32xf32>
    %828 = arith.mulf %824, %823 : vector<8x32xf32>
    %829 = arith.addf %827, %828 : vector<8x32xf32>
    %830 = math.tanh %829 : vector<8x32xf32>
    %831 = arith.mulf %826, %830 : vector<8x32xf32>
    %832 = arith.select %790, %815, %786 : vector<8x32xi1>, vector<8x32xf32>
    %833 = arith.select %792, %831, %787 : vector<8x32xi1>, vector<8x32xf32>
    %834 = tpu.concatenate %832, %833 in 1 : vector<8x32xf32>, vector<8x32xf32> -> vector<8x64xf32>
    %c0_210 = arith.constant 0 : index
    %c0_211 = arith.constant 0 : index
    %835 = vector.load %arg9[%c0_210, %c0_211] : memref<64x2xf32, #tpu.memory_space<vmem>>, vector<64x2xf32>
    %cst_212 = arith.constant dense<0.000000e+00> : vector<8x2xf32>
    %836 = tpu.matmul %834, %835, %cst_212 {dimension_numbers = #tpu.dot_dimension_numbers<[1], [0], [0], [1], [0, 0, 1, 1], [], []>} : vector<8x64xf32>, vector<64x2xf32>, vector<8x2xf32> -> vector<8x2xf32>
    %c0_213 = arith.constant 0 : index
    %c0_214 = arith.constant 0 : index
    %837 = vector.load %arg10[%c0_213, %c0_214] : memref<1x2xf32, #tpu.memory_space<vmem>>, vector<1x2xf32>
    %838 = vector.broadcast %837 : vector<1x2xf32> to vector<8x2xf32>
    %839 = arith.addf %836, %838 : vector<8x2xf32>
    %c0_215 = arith.constant 0 : index
    %c0_216 = arith.constant 0 : index
    %840 = vector.load %arg11[%c0_215, %c0_216] : memref<8x2xf32, #tpu.memory_space<vmem>>, vector<8x2xf32>
    tpu.vector_store %arg11[%c0_215, %c0_216], %839 {strides = array<i32>} : memref<8x2xf32, #tpu.memory_space<vmem>>, vector<8x2xf32>,
    return
  }
}

</mosaic_0001>

<bundles_post_ra>
// kernel: tpu_custom_call.1
= control target key start
LH: loop header
LB: loop body
LE: loop exit
PB: predicated region body
PF: predicated region fallthrough
CT: control target
= control target key end

     0   :  { %16 = vsyncpa [#allocation5], 0  ;;  %s4533_s0 = inlined_call_operand.vmem [shape: s32[8,1], index: 0, kind: input, shape index: {}]   ;;  %s4534_s1 = inlined_call_operand.vmem [shape: s32[64,1], index: 1, kind: input, shape index: {}]   ;;  %s4535_s2 = inlined_call_operand.vmem [shape: f32[50,16], index: 2, kind: input, shape index: {}]   ;;  %s4536_s3 = inlined_call_operand.vmem [shape: f32[16,256], index: 3, kind: input, shape index: {}]   ;;  %s4537_s4 = inlined_call_operand.vmem [shape: f32[64,256], index: 4, kind: input, shape index: {}]   ;;  %s4538_s5 = inlined_call_operand.vmem [shape: f32[1,256], index: 5, kind: input, shape index: {}]   ;;  %s4539_s6 = inlined_call_operand.hbm [shape: f32[64,256], index: 6, kind: input, shape index: {}]   ;;  %s4540_s7 = inlined_call_operand.hbm [shape: f32[64,256], index: 7, kind: input, shape index: {}]   ;;  %s4541_s8 = inlined_call_operand.vmem [shape: f32[1,256], index: 8, kind: input, shape index: {}]   ;;  %s4542_s9 = inlined_call_operand.vmem [shape: f32[64,2], index: 9, kind: input, shape index: {}]   ;;  %s4543_s10 = inlined_call_operand.vmem [shape: f32[1,2], index: 10, kind: input, shape index: {}]   ;;  %s4544_s11 = inlined_call_operand.vmem [shape: f32[8,2], index: 11, kind: output, shape index: {}]  }
   0x1   :  { %s34_s19 = sshll.u32 %s4539_s6, 4  ;;  %s35_s19 = int_to_ptr.hbm [resolvable:$true] %s34_s19 }
   0x2   :  { %17 = vsyncpa [#allocation7], 0  ;;  %s3144_s20 = smov [#allocation4]   ;;  %s47_s24 = sshll.u32 %s4540_s7, 4  ;;  %s48_s24 = int_to_ptr.hbm [resolvable:$true] %s47_s24 }
   0x3   :  { %s36_s21 = sshll.u32 %s3144_s20, 4  ;;  %s3145_s25 = smov 256   ;;  %s37_s21 = int_to_ptr.vmem [resolvable:$true] %s36_s21 }
   0x4   :  { %s3146_s26 = smov 16   ;;  %s3147_s27 = smov [#allocation6]  }
   0x5   :  { %42 = dma.hbm_to_vmem [thread:$0]  %s35_s19, 2048, %s37_s21, [#allocation5], %s3145_s25, %s3145_s25, %s3146_s26  }
   0x6   :  { %s49_s28 = sshll.u32 %s3147_s27, 4  ;;  %s50_s28 = int_to_ptr.vmem [resolvable:$true] %s49_s28 }
   0x7   :  { %55 = dma.hbm_to_vmem [thread:$0]  %s48_s24, 2048, %s50_s28, [#allocation7], %s3145_s25, %s3145_s25, %s3146_s26  }
   0x8   :  { %3140 = dma.done.wait [#allocation5], 2048  }
   0x9   :  { %3141 = vsyncadd [#allocation5], 4294965248 }
   0xa   :  { %3142 = dma.done.wait [#allocation7], 2048  }
   0xb   :  { %3143 = vsyncadd [#allocation7], 4294965248  ;;  %v3148_v0 = vmov 0   ;;  %v74_v1 = vld [vmem:[%s4534_s1 + $0x10] sm:$0xff]  ;;  %v72_v2 = vld [vmem:[%s4534_s1] sm:$0xff]  ;;  %vm160_vm0 = vcmask 1041408   ;;  %v70_v16 = vlaneseq }
   0xc   :  { %2833 = vset.pattern.permute.xlu1 %v3148_v0  ;;  %2832 = vset.pattern.permute.xlu0 %v3148_v0  ;;  %v76_v3 = vld [vmem:[%s4534_s1 + $0x20] sm:$0xff]  ;;  %v134_v4 = vld [vmem:[%s4535_s2 + $0x30] sm:$0x3]  ;;  %v133_v5 = vld [vmem:[%s4535_s2 + $0x28] sm:$0xff]  ;;  %vm135_vm1 = vcmask 408576   ;;  %v3149_v19 = vmov 0.0  }
   0xd   :  { %2834 = vset.pattern.permute.xlu2 %v3148_v0  ;;  %87 = vperm.xlu1 %2833, %v74_v1   ;;  %v132_v6 = vld [vmem:[%s4535_s2 + $0x20] sm:$0xff]  ;;  %v75_v7 = vld [vmem:[%s4534_s1 + $0x18] sm:$0xff]  ;;  %v73_v8 = vld [vmem:[%s4534_s1 + $0x8] sm:$0xff]  ;;  %v71_v17 = vand.u32 127, %v70_v16  ;;  %vm228_vm10 = vcmask 130048   ;;  %s3150_s24 = smov 32  }
   0xe   :  { %81 = vperm.xlu0 %2832, %v72_v2   ;;  %93 = vperm.xlu2 %2834, %v76_v3   ;;  %v131_v9 = vld [vmem:[%s4535_s2 + $0x18] sm:$0xff]  ;;  %v77_v10 = vld [vmem:[%s4534_s1 + $0x28] sm:$0xff]  ;;  %v130_v11 = vld [vmem:[%s4535_s2 + $0x10] sm:$0xff]  ;;  %s3152_s26 = smov 96  }
   0xf   :  { %2721 = vmatpush.msk.msra.mxu0 %vm160_vm0, %v134_v4  ;;  %v129_v12 = vld [vmem:[%s4535_s2 + $0x8] sm:$0xff]  ;;  %v79_v13 = vld [vmem:[%s4534_s1 + $0x38] sm:$0xff]  ;;  %v78_v14 = vld [vmem:[%s4534_s1 + $0x30] sm:$0xff] }
  0x10   :  { %v128_v15 = vld [vmem:[%s4535_s2] sm:$0xff]  ;;  %v220_v28 = vld [vmem:[%s4536_s3 + $0x10] sm:$0xff]  ;;  %v221_v29 = vld [vmem:[%s4536_s3 + $0x18] sm:$0xff] }
  0x11   :  { %174 = vmatpush.msra.mxu0 %v133_v5  ;;  %267 = vmatpush.msra.mxu1 %v220_v28  ;;  %v218_v37 = vld [vmem:[%s4536_s3] sm:$0xff]  ;;  %v219_v38 = vld [vmem:[%s4536_s3 + $0x8] sm:$0xff] }
  0x12   :  { %308 = vmatpush.msra.mxu2 %v221_v29  ;;  %v222_v47 = vld [vmem:[%s4538_s5] sm:$0x3] }
  0x13   :  { %175 = vmatpush.msra.mxu0 %v132_v6  ;;  %268 = vmatpush.msra.mxu1 %v218_v37  ;;  %v3311_v48 = vperm.slane %v222_v47, 0  ;;  %v225_v51 = vperm.slane %v222_v47, 1 }
  0x14   :  { %309 = vmatpush.msra.mxu2 %v219_v38 }
  0x15   :  { %90 = vperm.xlu1 %2833, %v75_v7   ;;  %176 = vmatpush.msra.mxu0 %v131_v9 }
  0x16   :  { %84 = vperm.xlu0 %2832, %v73_v8   ;;  %96 = vperm.xlu2 %2834, %v77_v10  }
  0x17   :  { %177 = vmatpush.msra.mxu0 %v130_v11 }
  0x19   :  { %178 = vmatpush.msra.mxu0 %v129_v12 }
  0x1b   :  { %179 = vmatpush.msra.mxu0 %v128_v15 }
  0x1d   :  { %102 = vperm.xlu1 %2833, %v79_v13  }
  0x1e   :  { %99 = vperm.xlu0 %2832, %v78_v14  }
  0x68   :  { %v94_v27 = vpop.permute.xlu2 %93 }
  0x69   :  { %vm108_vm6 = vcmp.eq.s32.totalorder %v71_v17, %v94_v27 }
  0x6a   :  { %v2717_v30 = vsel %vm108_vm6, 1.0, %v3149_v19  ;;  %vm457_vm6 = vcmask 261120  }
  0x70   :  { %v97_v31 = vpop.permute.xlu2 %96 }
  0x71   :  { %vm109_vm7 = vcmp.eq.s32.totalorder %v71_v17, %v97_v31 }
  0x72   :  { %v2718_v32 = vsel %vm109_vm7, 1.0, %v3149_v19  ;;  %vm4547_vm7 = vcmask 523520  }
  0x7f   :  { %v88_v23 = vpop.permute.xlu1 %87 }
  0x80   :  { %v82_v18 = vpop.permute.xlu0 %81  ;;  %vm106_vm4 = vcmp.eq.s32.totalorder %v71_v17, %v88_v23 }
  0x81   :  { %vm104_vm2 = vcmp.eq.s32.totalorder %v71_v17, %v82_v18  ;;  %v2715_v24 = vsel %vm106_vm4, 1.0, %v3149_v19  ;;  %vm209_vm4 = vcmask 523264  }
  0x82   :  { %v2713_v20 = vsel %vm104_vm2, 1.0, %v3149_v19  ;;  %210 = vst.msk [vmem:[#allocation2] sm:$0xff] %vm209_vm4, %v3149_v19 }
  0x83   :  { %2722 = vmatmul.msk.f32.vlgmr.msra.gmra.mxu0 %vm135_vm1, %v2713_v20  ;;  %211 = vst.msk [vmem:[#allocation2 + $0x8] sm:$0xff] %vm209_vm4, %v3149_v19 }
  0x84   :  { %212 = vst.msk [vmem:[#allocation2 + $0x10] sm:$0xff] %vm209_vm4, %v3149_v19 }
  0x85   :  { %213 = vst.msk [vmem:[#allocation2 + $0x18] sm:$0xff] %vm209_vm4, %v3149_v19 }
  0x86   :  { %214 = vst.msk [vmem:[#allocation2 + $0x20] sm:$0xff] %vm209_vm4, %v3149_v19 }
  0x87   :  { %v91_v25 = vpop.permute.xlu1 %90  ;;  %215 = vst.msk [vmem:[#allocation2 + $0x28] sm:$0xff] %vm209_vm4, %v3149_v19 }
  0x88   :  { %v85_v21 = vpop.permute.xlu0 %84  ;;  %vm107_vm5 = vcmp.eq.s32.totalorder %v71_v17, %v91_v25  ;;  %216 = vst.msk [vmem:[#allocation2 + $0x30] sm:$0xff] %vm209_vm4, %v3149_v19 }
  0x89   :  { %vm105_vm3 = vcmp.eq.s32.totalorder %v71_v17, %v85_v21  ;;  %v2716_v26 = vsel %vm107_vm5, 1.0, %v3149_v19  ;;  %217 = vst.msk [vmem:[#allocation2 + $0x38] sm:$0xff] %vm209_vm4, %v3149_v19 }
  0x8a   :  { %v2714_v22 = vsel %vm105_vm3, 1.0, %v3149_v19 }
  0x8b   :  { %2723 = vmatmul.msk.f32.gmra.mxu0 %vm135_vm1, %v2714_v22 }
  0x8f   :  { %v103_v35 = vpop.permute.xlu1 %102 }
  0x90   :  { %v100_v33 = vpop.permute.xlu0 %99  ;;  %vm111_vm9 = vcmp.eq.s32.totalorder %v71_v17, %v103_v35 }
  0x91   :  { %vm110_vm8 = vcmp.eq.s32.totalorder %v71_v17, %v100_v33  ;;  %v2720_v36 = vsel %vm111_vm9, 1.0, %v3149_v19 }
  0x92   :  { %v2719_v34 = vsel %vm110_vm8, 1.0, %v3149_v19  ;;  %v3398_v19 = vld [vmem:[%s4537_s4 + $0x60] sm:$0xff] }
  0x93   :  { %2724 = vmatmul.msk.f32.gmra.mxu0 %vm135_vm1, %v2715_v24 }
  0x9b   :  { %2725 = vmatmul.msk.f32.gmra.mxu0 %vm135_vm1, %v2716_v26 }
  0xa3   :  { %2726 = vmatmul.msk.f32.gmra.mxu0 %vm135_vm1, %v2717_v30 }
  0xab   :  { %2727 = vmatmul.msk.f32.gmra.mxu0 %vm135_vm1, %v2718_v32 }
  0xb3   :  { %2728 = vmatmul.msk.f32.gmra.mxu0 %vm135_vm1, %v2719_v34 }
  0xbb   :  { %2729 = vmatmul.msk.f32.gmra.mxu0 %vm135_vm1, %v2720_v36 }
 0x100   :  { %v181_v39 = vpop.f32.mrf.mxu0 }
 0x101   :  { %2730 = vmatmul.msk.f32.vlgmr.msra.gmra.mxu1 %vm228_vm10, %v181_v39  ;;  %2738 = vmatmul.msk.f32.vlgmr.msra.gmra.mxu2 %vm228_vm10, %v181_v39 }
 0x108   :  { %v184_v40 = vpop.f32.mrf.mxu0 }
 0x109   :  { %2731 = vmatmul.msk.f32.gmra.mxu1 %vm228_vm10, %v184_v40  ;;  %2739 = vmatmul.msk.f32.gmra.mxu2 %vm228_vm10, %v184_v40 }
 0x110   :  { %v187_v41 = vpop.f32.mrf.mxu0 }
 0x111   :  { %2732 = vmatmul.msk.f32.gmra.mxu1 %vm228_vm10, %v187_v41  ;;  %2740 = vmatmul.msk.f32.gmra.mxu2 %vm228_vm10, %v187_v41 }
 0x118   :  { %v190_v42 = vpop.f32.mrf.mxu0 }
 0x119   :  { %2733 = vmatmul.msk.f32.gmra.mxu1 %vm228_vm10, %v190_v42  ;;  %2741 = vmatmul.msk.f32.gmra.mxu2 %vm228_vm10, %v190_v42 }
 0x120   :  { %v193_v43 = vpop.f32.mrf.mxu0 }
 0x121   :  { %2734 = vmatmul.msk.f32.gmra.mxu1 %vm228_vm10, %v193_v43  ;;  %2742 = vmatmul.msk.f32.gmra.mxu2 %vm228_vm10, %v193_v43 }
 0x128   :  { %v196_v44 = vpop.f32.mrf.mxu0 }
 0x129   :  { %2735 = vmatmul.msk.f32.gmra.mxu1 %vm228_vm10, %v196_v44  ;;  %2743 = vmatmul.msk.f32.gmra.mxu2 %vm228_vm10, %v196_v44 }
 0x130   :  { %v199_v45 = vpop.f32.mrf.mxu0 }
 0x131   :  { %2736 = vmatmul.msk.f32.gmra.mxu1 %vm228_vm10, %v199_v45  ;;  %2744 = vmatmul.msk.f32.gmra.mxu2 %vm228_vm10, %v199_v45 }
 0x138   :  { %v202_v46 = vpop.f32.mrf.mxu0 }
 0x139   :  { %2737 = vmatmul.msk.f32.gmra.mxu1 %vm228_vm10, %v202_v46  ;;  %2745 = vmatmul.msk.f32.gmra.mxu2 %vm228_vm10, %v202_v46  ;;  %v205_v46 = vld [vmem:[%s4533_s0] sm:$0xff]  ;;  %s3151_s0 = smov 64  }
 0x17e   :  { %v270_v49 = vpop.f32.mrf.mxu1 }
 0x17f   :  { %v271_v50 = vadd.f32 %v270_v49, %v3311_v48 }
 0x181   :  { %2836 = vtanh.f32 %v271_v50  ;;  %v2746_v11 = vmul.f32 -1.442695, %v271_v50 }
 0x183   :  { %2838 = vpow2.f32 %v2746_v11  ;;  %v3393_v11 = vld [vmem:[%s4537_s4 + $0x70] sm:$0xff] }
 0x184   :  { %v311_v52 = vpop.f32.mrf.mxu2  ;;  %475 = vmatpush.msra.mxu3 %v3393_v11  ;;  %771 = vmatpush.msrb.mxu1 %v3393_v11 }
 0x185   :  { %v3314_v53 = vadd.f32 %v311_v52, %v225_v51  ;;  %917 = vmatpush.msrb.mxu0 %v3393_v11 }
 0x186   :  { %v3316_v54 = vpop.f32.mrf.mxu1  ;;  %476 = vmatpush.msra.mxu3 %v3398_v19  ;;  %772 = vmatpush.msrb.mxu1 %v3398_v19 }
 0x187   :  { %v2837_v55 = vpop.eup %2836  ;;  %918 = vmatpush.msrb.mxu0 %v3398_v19 }
 0x188   :  { %393 = vrot.lane.b32.xlu2 %v2837_v55, %s3150_s24 }
 0x189   :  { %v2839_v15 = vpop.eup %2838 }
 0x18a   :  { %v374_v16 = vadd.f32 1.0, %v2839_v15  ;;  %v3418_v15 = vld [vmem:[%s4537_s4 + $0x40] sm:$0xff] }
 0x18c   :  { %v314_v56 = vpop.f32.mrf.mxu2  ;;  %v386_v24 = vand.u32 2147483648, %v374_v16  ;;  %vm380_vm12 = vweird.f32 %v374_v16  ;;  %v384_v25 = vand.u32 2147483647, %v374_v16 }
 0x18d   :  { %v3319_v57 = vadd.f32 %v314_v56, %v225_v51 }
 0x18e   :  { %v3321_v58 = vpop.f32.mrf.mxu1  ;;  %v387_v27 = vor.u32 1.1754944e-38, %v386_v24  ;;  %vm385_vm14 = vcmp.eq.f32.partialorder %v384_v25, 8.507059e+37  ;;  %v3495_v24 = vld [vmem:[%s4537_s4 + $0x48] sm:$0xff]  ;;  %v3501_v25 = vld [vmem:[%s4537_s4 + $0x38] sm:$0xff] }
 0x194   :  { %v317_v59 = vpop.f32.mrf.mxu2 }
 0x195   :  { %v3323_v60 = vadd.f32 %v317_v59, %v225_v51 }
 0x196   :  { %v3325_v61 = vpop.f32.mrf.mxu1 }
 0x19c   :  { %v320_v62 = vpop.f32.mrf.mxu2 }
 0x19d   :  { %v3327_v63 = vadd.f32 %v320_v62, %v225_v51 }
 0x19e   :  { %v282_v0 = vpop.f32.mrf.mxu1 }
 0x19f   :  { %v3330_v1 = vadd.f32 %v282_v0, %v3311_v48 }
 0x1a4   :  { %v323_v2 = vpop.f32.mrf.mxu2 }
 0x1a5   :  { %v3332_v3 = vadd.f32 %v323_v2, %v225_v51 }
 0x1a6   :  { %v285_v4 = vpop.f32.mrf.mxu1 }
 0x1a7   :  { %v3335_v5 = vadd.f32 %v285_v4, %v3311_v48 }
 0x1ac   :  { %v326_v6 = vpop.f32.mrf.mxu2 }
 0x1ad   :  { %v3337_v7 = vadd.f32 %v326_v6, %v225_v51 }
 0x1ae   :  { %v288_v8 = vpop.f32.mrf.mxu1 }
 0x1af   :  { %v3340_v9 = vadd.f32 %v288_v8, %v3311_v48 }
 0x1b4   :  { %v329_v10 = vpop.f32.mrf.mxu2 }
 0x1b5   :  { %v3342_v12 = vadd.f32 %v329_v10, %v225_v51 }
 0x1bc   :  { %v332_v13 = vpop.f32.mrf.mxu2 }
 0x1bd   :  { %v333_v14 = vadd.f32 %v332_v13, %v225_v51  ;;  %v3405_v13 = vld [vmem:[%s4537_s4 + $0x50] sm:$0xff] }
 0x1be   :  { %477 = vmatpush.msra.mxu3 %v3405_v13  ;;  %773 = vmatpush.msrb.mxu1 %v3405_v13 }
 0x1bf   :  { %2840 = vtanh.f32 %v333_v14  ;;  %v2747_v31 = vmul.f32 -1.442695, %v333_v14  ;;  %v3410_v14 = vld [vmem:[%s4537_s4 + $0x78] sm:$0xff]  ;;  %919 = vmatpush.msrb.mxu0 %v3405_v13 }
 0x1c0   :  { %2842 = vrcp.f32 %v374_v16  ;;  %791 = vmatpush.msrb.mxu2 %v3410_v14  ;;  %478 = vmatpush.msra.mxu3 %v3418_v15 }
 0x1c1   :  { %2844 = vpow2.f32 %v2747_v31  ;;  %774 = vmatpush.msrb.mxu1 %v3418_v15  ;;  %920 = vmatpush.msrb.mxu0 %v3418_v15  ;;  %v274_v31 = vadd.f32 %v3316_v54, %v3311_v48 }
 0x1c5   :  { %v2841_v17 = vpop.eup %2840 }
 0x1c6   :  { %431 = vrot.lane.b32.xlu0 %v2841_v17, %s3150_s24  ;;  %v2843_v18 = vpop.eup %2842  ;;  %v3432_v17 = vld [vmem:[%s4537_s4 + $0x30] sm:$0xff] }
 0x1c7   :  { %v376_v20 = vmul.f32 %v2843_v18, %v374_v16  ;;  %vm381_vm11 = vweird.f32 %v2843_v18  ;;  %v2845_v32 = vpop.eup %2844  ;;  %v3423_v16 = vld [vmem:[%s4537_s4 + $0x68] sm:$0xff]  ;;  %479 = vmatpush.msra.mxu3 %v3432_v17  ;;  %775 = vmatpush.msrb.mxu1 %v3432_v17 }
 0x1c8   :  { %vm382_vm13 = vmor %vm380_vm12, %vm381_vm11  ;;  %v412_v33 = vadd.f32 1.0, %v2845_v32  ;;  %792 = vmatpush.msrb.mxu2 %v3423_v16  ;;  %921 = vmatpush.msrb.mxu0 %v3432_v17 }
 0x1c9   :  { %v377_v21 = vsub.f32 1.0, %v376_v20  ;;  %v3446_v20 = vld [vmem:[%s4537_s4 + $0x20] sm:$0xff] }
 0x1ca   :  { %2846 = vrcp.f32 %v412_v33  ;;  %v424_v39 = vand.u32 2147483648, %v412_v33  ;;  %vm418_vm0 = vweird.f32 %v412_v33  ;;  %v422_v40 = vand.u32 2147483647, %v412_v33  ;;  %480 = vmatpush.msra.mxu3 %v3446_v20  ;;  %776 = vmatpush.msrb.mxu1 %v3446_v20 }
 0x1cb   :  { %v378_v22 = vmul.f32 %v2843_v18, %v377_v21  ;;  %v3454_v21 = vld [vmem:[%s4537_s4 + $0x10] sm:$0xff]  ;;  %922 = vmatpush.msrb.mxu0 %v3446_v20 }
 0x1cc   :  { %v425_v42 = vor.u32 1.1754944e-38, %v424_v39  ;;  %vm423_vm2 = vcmp.eq.f32.partialorder %v422_v40, 8.507059e+37  ;;  %481 = vmatpush.msra.mxu3 %v3454_v21  ;;  %777 = vmatpush.msrb.mxu1 %v3454_v21 }
 0x1cd   :  { %v379_v23 = vadd.f32 %v2843_v18, %v378_v22  ;;  %v3462_v22 = vld [vmem:[%s4537_s4] sm:$0xff]  ;;  %923 = vmatpush.msrb.mxu0 %v3454_v21 }
 0x1ce   :  { %482 = vmatpush.msra.mxu3 %v3462_v22  ;;  %778 = vmatpush.msrb.mxu1 %v3462_v22 }
 0x1cf   :  { %v383_v26 = vsel %vm382_vm13, %v2843_v18, %v379_v23  ;;  %v3437_v18 = vld [vmem:[%s4537_s4 + $0x58] sm:$0xff]  ;;  %924 = vmatpush.msrb.mxu0 %v3462_v22 }
 0x1d0   :  { %v388_v29 = vsel %vm385_vm14, %v387_v27, %v383_v26  ;;  %v2847_v34 = vpop.eup %2846  ;;  %793 = vmatpush.msrb.mxu2 %v3437_v18  ;;  %495 = vmatpush.msrb.mxu3 %v3410_v14  ;;  %v3507_v26 = vld [vmem:[%s4537_s4 + $0x28] sm:$0xff]  ;;  %v3514_v27 = vld [vmem:[%s4537_s4 + $0x18] sm:$0xff] }
 0x1d1   :  { %v414_v35 = vmul.f32 %v2847_v34, %v412_v33  ;;  %vm419_vm15 = vweird.f32 %v2847_v34  ;;  %v391_v47 = vmul.f32 0.0, %v388_v29  ;;  %1063 = vmatpush.msra.mxu1 %v3393_v11  ;;  %1209 = vmatpush.msra.mxu0 %v3393_v11 }
 0x1d2   :  { %vm420_vm1 = vmor %vm418_vm0, %vm419_vm15  ;;  %496 = vmatpush.msrb.mxu3 %v3423_v16  ;;  %794 = vmatpush.msrb.mxu2 %v3495_v24 }
 0x1d3   :  { %v415_v36 = vsub.f32 1.0, %v414_v35  ;;  %1064 = vmatpush.msra.mxu1 %v3398_v19  ;;  %1210 = vmatpush.msra.mxu0 %v3398_v19 }
 0x1d4   :  { %497 = vmatpush.msrb.mxu3 %v3437_v18  ;;  %795 = vmatpush.msrb.mxu2 %v3501_v25 }
 0x1d5   :  { %v416_v37 = vmul.f32 %v2847_v34, %v415_v36  ;;  %1065 = vmatpush.msra.mxu1 %v3405_v13  ;;  %1211 = vmatpush.msra.mxu0 %v3405_v13 }
 0x1d6   :  { %498 = vmatpush.msrb.mxu3 %v3495_v24  ;;  %796 = vmatpush.msrb.mxu2 %v3507_v26 }
 0x1d7   :  { %v417_v38 = vadd.f32 %v2847_v34, %v416_v37  ;;  %1066 = vmatpush.msra.mxu1 %v3418_v15  ;;  %1212 = vmatpush.msra.mxu0 %v3418_v15 }
 0x1d8   :  { %499 = vmatpush.msrb.mxu3 %v3501_v25  ;;  %797 = vmatpush.msrb.mxu2 %v3514_v27 }
 0x1d9   :  { %v421_v41 = vsel %vm420_vm1, %v2847_v34, %v417_v38  ;;  %1067 = vmatpush.msra.mxu1 %v3432_v17  ;;  %1213 = vmatpush.msra.mxu0 %v3432_v17 }
 0x1da   :  { %v426_v44 = vsel %vm423_vm2, %v425_v42, %v421_v41  ;;  %500 = vmatpush.msrb.mxu3 %v3507_v26 }
 0x1db   :  { %v429_v52 = vmul.f32 0.0, %v426_v44  ;;  %1068 = vmatpush.msra.mxu1 %v3446_v20  ;;  %1214 = vmatpush.msra.mxu0 %v3446_v20 }
 0x1dc   :  { %501 = vmatpush.msrb.mxu3 %v3514_v27 }
 0x1dd   :  { %1069 = vmatpush.msra.mxu1 %v3454_v21  ;;  %1215 = vmatpush.msra.mxu0 %v3454_v21 }
 0x1df   :  { %1070 = vmatpush.msra.mxu1 %v3462_v22  ;;  %1216 = vmatpush.msra.mxu0 %v3462_v22 }
 0x1e2   :  { %v394_v28 = vpop.permute.xlu2 %393 }
 0x1e3   :  { %v396_v30 = vmul.f32 %v394_v28, %v388_v29  ;;  %v3521_v28 = vld [vmem:[%s4537_s4 + $0x8] sm:$0xff] }
 0x1e4   :  { %502 = vmatpush.msrb.mxu3 %v3521_v28  ;;  %798 = vmatpush.msrb.mxu2 %v3521_v28 }
 0x1e5   :  { %398 = vrot.lane.b32.xlu1 %v396_v30, %s3150_s24 }
 0x1e6   :  { %1083 = vmatpush.msra.mxu2 %v3410_v14 }
 0x1e8   :  { %1084 = vmatpush.msra.mxu2 %v3423_v16 }
 0x1ea   :  { %1085 = vmatpush.msra.mxu2 %v3437_v18 }
 0x1ec   :  { %1086 = vmatpush.msra.mxu2 %v3495_v24 }
 0x1ee   :  { %1087 = vmatpush.msra.mxu2 %v3501_v25 }
 0x1f0   :  { %1088 = vmatpush.msra.mxu2 %v3507_v26 }
 0x1f2   :  { %1089 = vmatpush.msra.mxu2 %v3514_v27 }
 0x1f4   :  { %1090 = vmatpush.msra.mxu2 %v3521_v28 }
 0x238   :  { %v432_v43 = vpop.permute.xlu0 %431 }
 0x239   :  { %v434_v45 = vmul.f32 %v432_v43, %v426_v44 }
 0x23b   :  { %436 = vrot.lane.b32.xlu2 %v434_v45, %s3150_s24 }
 0x243   :  { %207 = vperm.xlu2 %2834, %v205_v46  }
 0x257   :  { %v399_v49 = vpop.permute.xlu1 %398 }
 0x258   :  { %v3350_v50 = vadd.f32 %v399_v49, %v391_v47 }
 0x25a   :  { %2848 = vtanh.f32 %v3350_v50 }
 0x260   :  { %v2849_v51 = vpop.eup %2848 }
 0x261   :  { %404 = vrot.lane.b32.xlu0 %v2849_v51, %s3150_s24 }
 0x295   :  { %v437_v55 = vpop.permute.xlu2 %436 }
 0x296   :  { %v3354_v56 = vadd.f32 %v437_v55, %v429_v52 }
 0x298   :  { %2850 = vtanh.f32 %v3354_v56 }
 0x29d   :  { %v3358_v62 = vpop.permute.xlu2 %207 }
 0x29e   :  { %v2851_v59 = vpop.eup %2850  ;;  %vm4546_vm3 = vcmp.gt.s32.totalorder %v3358_v62, 0  ;;  %vm4545_vm5 = vcmp.gt.s32.totalorder %v3358_v62, 7  ;;  %vm462_vm0 = vcmp.gt.s32.totalorder %v3358_v62, 1  ;;  %vm463_vm1 = vcmp.gt.s32.totalorder %v3358_v62, 6 }
 0x29f   :  { %442 = vrot.lane.b32.xlu1 %v2851_v59, %s3150_s24 }
 0x2d3   :  { %v405_v0 = vpop.permute.xlu0 %404 }
 0x2d4   :  { %v407_v2 = vmul.f32 %v405_v0, %v388_v29 }
 0x2d6   :  { %v3363_v4 = vsel %vm4546_vm3, %v407_v2, 0.0 }
 0x2d7   :  { %450 = vrot.lane.b32.xlu0 %v3363_v4, %s3151_s0 }
 0x311   :  { %v443_v6 = vpop.permute.xlu1 %442 }
 0x312   :  { %v445_v8 = vmul.f32 %v443_v6, %v426_v44 }
 0x314   :  { %v3386_v10 = vsel %vm4545_vm5, %v445_v8, 0.0 }
 0x315   :  { %454 = vrot.lane.b32.xlu1 %v3386_v10, %s3152_s26 }
 0x349   :  { %v451_v23 = vpop.permute.xlu0 %450 }
 0x34a   :  { %459 = vst.msk [vmem:[#allocation2] sm:$0xff] %vm457_vm6, %v451_v23 }
 0x387   :  { %v455_v29 = vpop.permute.xlu1 %454 }
 0x388   :  { %461 = vst.msk [vmem:[#allocation2 + $0x38] sm:$0xff] %vm4547_vm7, %v455_v29  ;;  %v458_v30 = vsel %vm457_vm6, %v451_v23, %v455_v29 }
 0x389   :  { %2748 = vmatmul.msk.f32.vlgmr.msra.gmra.mxu3 %vm209_vm4, %v458_v30 }
 0x38a   :  { %623 = vmatpush.msra.mxu3 %v3393_v11 }
 0x38c   :  { %624 = vmatpush.msra.mxu3 %v3398_v19 }
 0x38e   :  { %625 = vmatpush.msra.mxu3 %v3405_v13 }
 0x390   :  { %626 = vmatpush.msra.mxu3 %v3418_v15 }
 0x391   :  { %2749 = vmatmul.msk.f32.vlgmr.msrb.gmra.mxu3 %vm209_vm4, %v458_v30 }
 0x392   :  { %627 = vmatpush.msra.mxu3 %v3432_v17 }
 0x394   :  { %628 = vmatpush.msra.mxu3 %v3446_v20 }
 0x396   :  { %629 = vmatpush.msra.mxu3 %v3454_v21 }
 0x398   :  { %630 = vmatpush.msra.mxu3 %v3462_v22 }
 0x39a   :  { %643 = vmatpush.msrb.mxu3 %v3410_v14 }
 0x39c   :  { %644 = vmatpush.msrb.mxu3 %v3423_v16 }
 0x39e   :  { %645 = vmatpush.msrb.mxu3 %v3437_v18 }
 0x3a0   :  { %646 = vmatpush.msrb.mxu3 %v3495_v24 }
 0x3a2   :  { %647 = vmatpush.msrb.mxu3 %v3501_v25 }
 0x3a4   :  { %648 = vmatpush.msrb.mxu3 %v3507_v26 }
 0x3a6   :  { %649 = vmatpush.msrb.mxu3 %v3514_v27 }
 0x3a8   :  { %650 = vmatpush.msrb.mxu3 %v3521_v28 }
 0x40c   :  { %v484_v32 = vpop.f32.mrf.mxu3 }
 0x40d   :  { %v508_v33 = vadd.f32 %v484_v32, %v274_v31 }
 0x40f   :  { %2852 = vtanh.f32 %v508_v33  ;;  %v2750_v38 = vmul.f32 -1.442695, %v508_v33 }
 0x414   :  { %v504_v34 = vpop.f32.mrf.mxu3 }
 0x415   :  { %v2853_v35 = vpop.eup %2852  ;;  %v510_v36 = vadd.f32 %v504_v34, %v3342_v12 }
 0x416   :  { %533 = vrot.lane.b32.xlu2 %v2853_v35, %s3150_s24 }
 0x417   :  { %2854 = vtanh.f32 %v510_v36  ;;  %v2751_v43 = vmul.f32 -1.442695, %v510_v36 }
 0x418   :  { %2856 = vpow2.f32 %v2750_v38 }
 0x41d   :  { %v2855_v37 = vpop.eup %2854 }
 0x41e   :  { %571 = vrot.lane.b32.xlu0 %v2855_v37, %s3150_s24  ;;  %v2857_v39 = vpop.eup %2856  ;;  %v3565_v37 = vsel %vm4546_vm3, %v3350_v50, 0.0 }
 0x41f   :  { %v514_v40 = vadd.f32 1.0, %v2857_v39 }
 0x421   :  { %2858 = vrcp.f32 %v514_v40  ;;  %v526_v12 = vand.u32 2147483648, %v514_v40  ;;  %vm520_vm9 = vweird.f32 %v514_v40  ;;  %v524_v46 = vand.u32 2147483647, %v514_v40 }
 0x422   :  { %2860 = vpow2.f32 %v2751_v43 }
 0x423   :  { %v527_v51 = vor.u32 1.1754944e-38, %v526_v12  ;;  %vm525_vm11 = vcmp.eq.f32.partialorder %v524_v46, 8.507059e+37 }
 0x427   :  { %v2859_v41 = vpop.eup %2858 }
 0x428   :  { %v516_v54 = vmul.f32 %v2859_v41, %v514_v40  ;;  %vm521_vm8 = vweird.f32 %v2859_v41  ;;  %v2861_v47 = vpop.eup %2860 }
 0x429   :  { %vm522_vm10 = vmor %vm520_vm9, %vm521_vm8  ;;  %v552_v52 = vadd.f32 1.0, %v2861_v47 }
 0x42a   :  { %v517_v42 = vsub.f32 1.0, %v516_v54 }
 0x42b   :  { %2862 = vrcp.f32 %v552_v52  ;;  %v564_v30 = vand.u32 2147483648, %v552_v52  ;;  %vm558_vm13 = vweird.f32 %v552_v52  ;;  %v562_v31 = vand.u32 2147483647, %v552_v52 }
 0x42c   :  { %v518_v44 = vmul.f32 %v2859_v41, %v517_v42 }
 0x42d   :  { %v565_v33 = vor.u32 1.1754944e-38, %v564_v30  ;;  %vm563_vm15 = vcmp.eq.f32.partialorder %v562_v31, 8.507059e+37 }
 0x42e   :  { %v519_v45 = vadd.f32 %v2859_v41, %v518_v44 }
 0x430   :  { %v523_v49 = vsel %vm522_vm10, %v2859_v41, %v519_v45  ;;  %v3574_v41 = vsel %vm4545_vm5, %v3354_v56, 0.0 }
 0x431   :  { %v528_v59 = vsel %vm525_vm11, %v527_v51, %v523_v49  ;;  %v2863_v2 = vpop.eup %2862 }
 0x432   :  { %v554_v6 = vmul.f32 %v2863_v2, %v552_v52  ;;  %vm559_vm12 = vweird.f32 %v2863_v2  ;;  %v531_v38 = vmul.f32 %v528_v59, %v3565_v37 }
 0x433   :  { %vm560_vm14 = vmor %vm558_vm13, %vm559_vm12 }
 0x434   :  { %v555_v8 = vsub.f32 1.0, %v554_v6 }
 0x436   :  { %v556_v23 = vmul.f32 %v2863_v2, %v555_v8 }
 0x438   :  { %v557_v29 = vadd.f32 %v2863_v2, %v556_v23 }
 0x43a   :  { %v561_v32 = vsel %vm560_vm14, %v2863_v2, %v557_v29 }
 0x43b   :  { %v566_v35 = vsel %vm563_vm15, %v565_v33, %v561_v32  ;;  %vm610_vm15 = vcmp.gt.s32.totalorder %v3358_v62, 2 }
 0x43c   :  { %v569_v54 = vmul.f32 %v566_v35, %v3574_v41 }
 0x470   :  { %v534_v55 = vpop.permute.xlu2 %533 }
 0x471   :  { %v536_v0 = vmul.f32 %v534_v55, %v528_v59 }
 0x473   :  { %538 = vrot.lane.b32.xlu1 %v536_v0, %s3150_s24 }
 0x490   :  { %v572_v34 = vpop.permute.xlu0 %571 }
 0x491   :  { %v574_v36 = vmul.f32 %v572_v34, %v566_v35 }
 0x493   :  { %576 = vrot.lane.b32.xlu2 %v574_v36, %s3150_s24 }
 0x4e5   :  { %v539_v39 = vpop.permute.xlu1 %538 }
 0x4e6   :  { %v3568_v40 = vadd.f32 %v539_v39, %v531_v38 }
 0x4e8   :  { %2864 = vtanh.f32 %v3568_v40 }
 0x4ed   :  { %v577_v42 = vpop.permute.xlu2 %576 }
 0x4ee   :  { %v2865_v43 = vpop.eup %2864  ;;  %v3577_v44 = vadd.f32 %v577_v42, %v569_v54 }
 0x4ef   :  { %544 = vrot.lane.b32.xlu0 %v2865_v43, %s3150_s24 }
 0x4f0   :  { %2866 = vtanh.f32 %v3577_v44 }
 0x4f6   :  { %v2867_v50 = vpop.eup %2866 }
 0x4f7   :  { %582 = vrot.lane.b32.xlu1 %v2867_v50, %s3150_s24 }
 0x561   :  { %v545_v45 = vpop.permute.xlu0 %544 }
 0x562   :  { %v3582_v12 = vmul.f32 %v545_v45, %v528_v59 }
 0x564   :  { %v3589_v56 = vsel %vm462_vm0, %v3582_v12, %v3363_v4 }
 0x565   :  { %590 = vrot.lane.b32.xlu2 %v3589_v56, %s3151_s0 }
 0x569   :  { %v583_v46 = vpop.permute.xlu1 %582 }
 0x56a   :  { %v3593_v47 = vmul.f32 %v583_v46, %v566_v35 }
 0x56c   :  { %v3600_v49 = vsel %vm463_vm1, %v3593_v47, %v3386_v10  ;;  %v277_v10 = vadd.f32 %v3321_v58, %v3311_v48 }
 0x56d   :  { %594 = vrot.lane.b32.xlu0 %v3600_v49, %s3152_s26 }
 0x5bf   :  { %v591_v51 = vpop.permute.xlu2 %590 }
 0x5df   :  { %v595_v4 = vpop.permute.xlu0 %594 }
 0x5e0   :  { %v597_v52 = vsel %vm457_vm6, %v591_v51, %v595_v4 }
 0x5e1   :  { %2752 = vmatmul.msk.f32.vlgmr.msra.gmra.mxu3 %vm209_vm4, %v597_v52 }
 0x5e2   :  { %937 = vmatpush.msra.mxu3 %v3410_v14 }
 0x5e4   :  { %938 = vmatpush.msra.mxu3 %v3423_v16 }
 0x5e6   :  { %939 = vmatpush.msra.mxu3 %v3437_v18 }
 0x5e8   :  { %940 = vmatpush.msra.mxu3 %v3495_v24 }
 0x5e9   :  { %2753 = vmatmul.msk.f32.vlgmr.msrb.gmra.mxu3 %vm209_vm4, %v597_v52 }
 0x5ea   :  { %941 = vmatpush.msra.mxu3 %v3501_v25 }
 0x5ec   :  { %942 = vmatpush.msra.mxu3 %v3507_v26 }
 0x5ee   :  { %943 = vmatpush.msra.mxu3 %v3514_v27 }
 0x5f0   :  { %944 = vmatpush.msra.mxu3 %v3521_v28 }
 0x5f2   :  { %1229 = vmatpush.msrb.mxu3 %v3410_v14 }
 0x5f4   :  { %1230 = vmatpush.msrb.mxu3 %v3423_v16 }
 0x5f6   :  { %1231 = vmatpush.msrb.mxu3 %v3437_v18 }
 0x5f8   :  { %1232 = vmatpush.msrb.mxu3 %v3495_v24 }
 0x5fa   :  { %1233 = vmatpush.msrb.mxu3 %v3501_v25 }
 0x5fc   :  { %1234 = vmatpush.msrb.mxu3 %v3507_v26 }
 0x5fe   :  { %1235 = vmatpush.msrb.mxu3 %v3514_v27 }
 0x600   :  { %1236 = vmatpush.msrb.mxu3 %v3521_v28 }
 0x664   :  { %v632_v55 = vpop.f32.mrf.mxu3 }
 0x665   :  { %v656_v59 = vadd.f32 %v632_v55, %v277_v10 }
 0x667   :  { %2868 = vtanh.f32 %v656_v59  ;;  %v2754_v31 = vmul.f32 -1.442695, %v656_v59 }
 0x66c   :  { %v652_v0 = vpop.f32.mrf.mxu3 }
 0x66d   :  { %v2869_v2 = vpop.eup %2868  ;;  %v658_v6 = vadd.f32 %v652_v0, %v3337_v7 }
 0x66e   :  { %681 = vrot.lane.b32.xlu1 %v2869_v2, %s3150_s24 }
 0x66f   :  { %2870 = vtanh.f32 %v658_v6  ;;  %v2755_v23 = vmul.f32 -1.442695, %v658_v6 }
 0x671   :  { %2872 = vpow2.f32 %v2755_v23 }
 0x675   :  { %v2871_v8 = vpop.eup %2870 }
 0x676   :  { %719 = vrot.lane.b32.xlu2 %v2871_v8, %s3150_s24 }
 0x677   :  { %v2873_v29 = vpop.eup %2872 }
 0x678   :  { %v700_v30 = vadd.f32 1.0, %v2873_v29  ;;  %v3634_v29 = vsel %vm463_vm1, %v3577_v44, %v3574_v41 }
 0x67a   :  { %2874 = vrcp.f32 %v700_v30  ;;  %v712_v39 = vand.u32 2147483648, %v700_v30  ;;  %vm706_vm8 = vweird.f32 %v700_v30  ;;  %v710_v54 = vand.u32 2147483647, %v700_v30 }
 0x67b   :  { %2876 = vpow2.f32 %v2754_v31 }
 0x67c   :  { %v713_v50 = vor.u32 1.1754944e-38, %v712_v39  ;;  %vm711_vm10 = vcmp.eq.f32.partialorder %v710_v54, 8.507059e+37 }
 0x680   :  { %v2875_v58 = vpop.eup %2874 }
 0x681   :  { %v2877_v32 = vpop.eup %2876  ;;  %v702_v33 = vmul.f32 %v2875_v58, %v700_v30  ;;  %vm707_vm2 = vweird.f32 %v2875_v58 }
 0x682   :  { %v662_v34 = vadd.f32 1.0, %v2877_v32  ;;  %vm708_vm9 = vmor %vm706_vm8, %vm707_vm2  ;;  %vm611_vm2 = vcmp.gt.s32.totalorder %v3358_v62, 5 }
 0x683   :  { %v703_v35 = vsub.f32 1.0, %v702_v33  ;;  %v3645_v33 = vsel %vm462_vm0, %v3568_v40, %v3565_v37 }
 0x684   :  { %2878 = vrcp.f32 %v662_v34  ;;  %v674_v55 = vand.u32 2147483648, %v662_v34  ;;  %vm668_vm12 = vweird.f32 %v662_v34  ;;  %v672_v59 = vand.u32 2147483647, %v662_v34 }
 0x685   :  { %v704_v7 = vmul.f32 %v2875_v58, %v703_v35 }
 0x686   :  { %v675_v2 = vor.u32 1.1754944e-38, %v674_v55  ;;  %vm673_vm14 = vcmp.eq.f32.partialorder %v672_v59, 8.507059e+37 }
 0x687   :  { %v705_v36 = vadd.f32 %v2875_v58, %v704_v7 }
 0x689   :  { %v709_v42 = vsel %vm708_vm9, %v2875_v58, %v705_v36 }
 0x68a   :  { %v2879_v38 = vpop.eup %2878  ;;  %v714_v46 = vsel %vm711_vm10, %v713_v50, %v709_v42 }
 0x68b   :  { %v664_v43 = vmul.f32 %v2879_v38, %v662_v34  ;;  %vm669_vm11 = vweird.f32 %v2879_v38  ;;  %v717_v30 = vmul.f32 %v714_v46, %v3634_v29 }
 0x68c   :  { %vm670_vm13 = vmor %vm668_vm12, %vm669_vm11 }
 0x68d   :  { %v665_v4 = vsub.f32 1.0, %v664_v43 }
 0x68f   :  { %v666_v52 = vmul.f32 %v2879_v38, %v665_v4 }
 0x691   :  { %v667_v10 = vadd.f32 %v2879_v38, %v666_v52 }
 0x693   :  { %v671_v0 = vsel %vm670_vm13, %v2879_v38, %v667_v10 }
 0x694   :  { %v676_v8 = vsel %vm673_vm14, %v675_v2, %v671_v0 }
 0x695   :  { %v679_v34 = vmul.f32 %v676_v8, %v3645_v33 }
 0x6d0   :  { %v720_v45 = vpop.permute.xlu2 %719 }
 0x6d1   :  { %v722_v51 = vmul.f32 %v720_v45, %v714_v46 }
 0x6d3   :  { %724 = vrot.lane.b32.xlu1 %v722_v51, %s3150_s24 }
 0x6e0   :  { %v682_v6 = vpop.permute.xlu1 %681 }
 0x6e1   :  { %v684_v23 = vmul.f32 %v682_v6, %v676_v8 }
 0x6e3   :  { %686 = vrot.lane.b32.xlu0 %v684_v23, %s3150_s24 }
 0x745   :  { %v725_v31 = vpop.permute.xlu1 %724 }
 0x746   :  { %v3637_v58 = vadd.f32 %v725_v31, %v717_v30 }
 0x748   :  { %2880 = vtanh.f32 %v3637_v58 }
 0x74e   :  { %v2881_v32 = vpop.eup %2880 }
 0x74f   :  { %730 = vrot.lane.b32.xlu0 %v2881_v32, %s3150_s24 }
 0x755   :  { %v687_v41 = vpop.permute.xlu0 %686 }
 0x756   :  { %v3648_v44 = vadd.f32 %v687_v41, %v679_v34 }
 0x758   :  { %2882 = vtanh.f32 %v3648_v44  ;;  %v3706_v41 = vsel %vm610_vm15, %v3648_v44, %v3645_v33 }
 0x75e   :  { %v2883_v35 = vpop.eup %2882 }
 0x75f   :  { %692 = vrot.lane.b32.xlu2 %v2883_v35, %s3150_s24 }
 0x7b9   :  { %v693_v7 = vpop.permute.xlu2 %692 }
 0x7ba   :  { %v3652_v36 = vmul.f32 %v693_v7, %v676_v8 }
 0x7bc   :  { %v3659_v37 = vsel %vm610_vm15, %v3652_v36, %v3589_v56 }
 0x7bd   :  { %738 = vrot.lane.b32.xlu1 %v3659_v37, %s3151_s0 }
 0x7c1   :  { %v731_v40 = vpop.permute.xlu0 %730 }
 0x7c2   :  { %v3663_v38 = vmul.f32 %v731_v40, %v714_v46 }
 0x7c4   :  { %v3670_v39 = vsel %vm611_vm2, %v3663_v38, %v3600_v49 }
 0x7c5   :  { %742 = vrot.lane.b32.xlu2 %v3670_v39, %s3152_s26 }
 0x81f   :  { %v743_v54 = vpop.permute.xlu2 %742 }
 0x82f   :  { %v739_v56 = vpop.permute.xlu1 %738 }
 0x830   :  { %v745_v42 = vsel %vm457_vm6, %v739_v56, %v743_v54  ;;  %v3717_v56 = vsel %vm611_vm2, %v3637_v58, %v3634_v29 }
 0x831   :  { %2756 = vmatmul.msk.f32.vlgmr.msrb.gmra.mxu1 %vm209_vm4, %v745_v42  ;;  %2757 = vmatmul.msk.f32.vlgmr.msrb.gmra.mxu2 %vm209_vm4, %v745_v42 }
 0x832   :  { %1355 = vmatpush.msrb.mxu1 %v3393_v11  ;;  %1375 = vmatpush.msrb.mxu2 %v3410_v14  ;;  %v3693_v11 = vpop.f32.mrf.mxu1 }
 0x834   :  { %1356 = vmatpush.msrb.mxu1 %v3398_v19  ;;  %1376 = vmatpush.msrb.mxu2 %v3423_v16  ;;  %v280_v19 = vadd.f32 %v3325_v61, %v3311_v48 }
 0x836   :  { %1357 = vmatpush.msrb.mxu1 %v3405_v13  ;;  %1377 = vmatpush.msrb.mxu2 %v3437_v18 }
 0x838   :  { %1358 = vmatpush.msrb.mxu1 %v3418_v15  ;;  %1378 = vmatpush.msrb.mxu2 %v3495_v24 }
 0x83a   :  { %1359 = vmatpush.msrb.mxu1 %v3432_v17  ;;  %1379 = vmatpush.msrb.mxu2 %v3501_v25 }
 0x83c   :  { %1360 = vmatpush.msrb.mxu1 %v3446_v20  ;;  %1380 = vmatpush.msrb.mxu2 %v3507_v26 }
 0x83e   :  { %1361 = vmatpush.msrb.mxu1 %v3454_v21  ;;  %1381 = vmatpush.msrb.mxu2 %v3514_v27 }
 0x840   :  { %1362 = vmatpush.msrb.mxu1 %v3462_v22  ;;  %1382 = vmatpush.msrb.mxu2 %v3521_v28 }
 0x8ae   :  { %v780_v13 = vpop.f32.mrf.mxu1 }
 0x8af   :  { %v804_v14 = vadd.f32 %v780_v13, %v280_v19 }
 0x8b1   :  { %2884 = vtanh.f32 %v804_v14  ;;  %v2758_v20 = vmul.f32 -1.442695, %v804_v14 }
 0x8b4   :  { %v800_v15 = vpop.f32.mrf.mxu2 }
 0x8b5   :  { %v806_v16 = vadd.f32 %v800_v15, %v3332_v3 }
 0x8b7   :  { %v2885_v17 = vpop.eup %2884  ;;  %2886 = vtanh.f32 %v806_v16  ;;  %v2759_v21 = vmul.f32 -1.442695, %v806_v16 }
 0x8b8   :  { %829 = vrot.lane.b32.xlu0 %v2885_v17, %s3150_s24  ;;  %2888 = vpow2.f32 %v2758_v20 }
 0x8b9   :  { %2890 = vpow2.f32 %v2759_v21 }
 0x8bd   :  { %v2887_v18 = vpop.eup %2886 }
 0x8be   :  { %867 = vrot.lane.b32.xlu1 %v2887_v18, %s3150_s24  ;;  %v2889_v22 = vpop.eup %2888 }
 0x8bf   :  { %v810_v24 = vadd.f32 1.0, %v2889_v22  ;;  %v2891_v61 = vpop.eup %2890 }
 0x8c0   :  { %v848_v25 = vadd.f32 1.0, %v2891_v61 }
 0x8c1   :  { %2892 = vrcp.f32 %v810_v24  ;;  %v822_v46 = vand.u32 2147483648, %v810_v24  ;;  %vm816_vm9 = vweird.f32 %v810_v24  ;;  %v820_v51 = vand.u32 2147483647, %v810_v24 }
 0x8c2   :  { %2894 = vrcp.f32 %v848_v25  ;;  %v860_v2 = vand.u32 2147483648, %v848_v25  ;;  %vm854_vm13 = vweird.f32 %v848_v25  ;;  %v858_v8 = vand.u32 2147483647, %v848_v25 }
 0x8c3   :  { %v823_v10 = vor.u32 1.1754944e-38, %v822_v46  ;;  %vm821_vm11 = vcmp.eq.f32.partialorder %v820_v51, 8.507059e+37 }
 0x8c4   :  { %v861_v30 = vor.u32 1.1754944e-38, %v860_v2  ;;  %vm859_vm5 = vcmp.eq.f32.partialorder %v858_v8, 8.507059e+37 }
 0x8c7   :  { %v2893_v26 = vpop.eup %2892 }
 0x8c8   :  { %v812_v27 = vmul.f32 %v2893_v26, %v810_v24  ;;  %v2895_v3 = vpop.eup %2894  ;;  %vm817_vm8 = vweird.f32 %v2893_v26 }
 0x8c9   :  { %v850_v49 = vmul.f32 %v2895_v3, %v848_v25  ;;  %vm818_vm10 = vmor %vm816_vm9, %vm817_vm8  ;;  %vm855_vm12 = vweird.f32 %v2895_v3  ;;  %vm759_vm8 = vcmp.gt.s32.totalorder %v3358_v62, 4 }
 0x8ca   :  { %v813_v28 = vsub.f32 1.0, %v812_v27  ;;  %vm856_vm14 = vmor %vm854_vm13, %vm855_vm12 }
 0x8cb   :  { %v851_v50 = vsub.f32 1.0, %v850_v49 }
 0x8cc   :  { %v814_v43 = vmul.f32 %v2893_v26, %v813_v28 }
 0x8cd   :  { %v852_v4 = vmul.f32 %v2895_v3, %v851_v50 }
 0x8ce   :  { %v815_v45 = vadd.f32 %v2893_v26, %v814_v43 }
 0x8cf   :  { %v853_v55 = vadd.f32 %v2895_v3, %v852_v4 }
 0x8d0   :  { %v819_v52 = vsel %vm818_vm10, %v2893_v26, %v815_v45 }
 0x8d1   :  { %v824_v0 = vsel %vm821_vm11, %v823_v10, %v819_v52  ;;  %v857_v23 = vsel %vm856_vm14, %v2895_v3, %v853_v55 }
 0x8d2   :  { %v862_v32 = vsel %vm859_vm5, %v861_v30, %v857_v23  ;;  %v827_v35 = vmul.f32 %v824_v0, %v3706_v41  ;;  %vm758_vm5 = vcmp.gt.s32.totalorder %v3358_v62, 3 }
 0x8d3   :  { %v865_v42 = vmul.f32 %v862_v32, %v3717_v56 }
 0x92a   :  { %v830_v59 = vpop.permute.xlu0 %829 }
 0x92b   :  { %v832_v6 = vmul.f32 %v830_v59, %v824_v0 }
 0x92d   :  { %834 = vrot.lane.b32.xlu2 %v832_v6, %s3150_s24 }
 0x930   :  { %v868_v31 = vpop.permute.xlu1 %867 }
 0x931   :  { %v870_v34 = vmul.f32 %v868_v31, %v862_v32 }
 0x933   :  { %872 = vrot.lane.b32.xlu0 %v870_v34, %s3150_s24 }
 0x987   :  { %v835_v7 = vpop.permute.xlu2 %834 }
 0x988   :  { %v3709_v40 = vadd.f32 %v835_v7, %v827_v35 }
 0x98a   :  { %2896 = vtanh.f32 %v3709_v40 }
 0x990   :  { %v2897_v54 = vpop.eup %2896 }
 0x991   :  { %840 = vrot.lane.b32.xlu1 %v2897_v54, %s3150_s24 }
 0x9a5   :  { %v873_v33 = vpop.permute.xlu0 %872 }
 0x9a6   :  { %v3720_v44 = vadd.f32 %v873_v33, %v865_v42  ;;  %v3759_v42 = vsel %vm758_vm5, %v3709_v40, %v3706_v41 }
 0x9a8   :  { %2898 = vtanh.f32 %v3720_v44 }
 0x9ae   :  { %v2899_v19 = vpop.eup %2898 }
 0x9af   :  { %878 = vrot.lane.b32.xlu2 %v2899_v19, %s3150_s24 }
 0xa03   :  { %v841_v13 = vpop.permute.xlu1 %840 }
 0xa04   :  { %v3724_v14 = vmul.f32 %v841_v13, %v824_v0 }
 0xa06   :  { %v3731_v29 = vsel %vm758_vm5, %v3724_v14, %v3659_v37 }
 0xa07   :  { %886 = vrot.lane.b32.xlu0 %v3731_v29, %s3151_s0 }
 0xa09   :  { %v879_v58 = vpop.permute.xlu2 %878 }
 0xa0a   :  { %v3735_v15 = vmul.f32 %v879_v58, %v862_v32  ;;  %v3769_v58 = vsel %vm759_vm8, %v3720_v44, %v3717_v56 }
 0xa0c   :  { %v3742_v16 = vsel %vm759_vm8, %v3735_v15, %v3670_v39 }
 0xa0d   :  { %890 = vrot.lane.b32.xlu1 %v3742_v16, %s3152_s26 }
 0xa79   :  { %v887_v17 = vpop.permute.xlu0 %886 }
 0xa7f   :  { %v891_v37 = vpop.permute.xlu1 %890 }
 0xa80   :  { %v893_v18 = vsel %vm457_vm6, %v887_v17, %v891_v37 }
 0xa81   :  { %2760 = vmatmul.msk.f32.vlgmr.msrb.gmra.mxu0 %vm209_vm4, %v893_v18  ;;  %2761 = vmatmul.msk.f32.vlgmr.msra.gmra.mxu3 %vm209_vm4, %v893_v18 }
 0xafe   :  { %v926_v20 = vpop.f32.mrf.mxu0 }
 0xaff   :  { %v950_v21 = vadd.f32 %v926_v20, %v3330_v1 }
 0xb01   :  { %2900 = vtanh.f32 %v950_v21  ;;  %v2762_v25 = vmul.f32 -1.442695, %v950_v21 }
 0xb04   :  { %v946_v22 = vpop.f32.mrf.mxu3 }
 0xb05   :  { %v952_v24 = vadd.f32 %v946_v22, %v3327_v63 }
 0xb07   :  { %v2901_v39 = vpop.eup %2900  ;;  %2902 = vtanh.f32 %v952_v24  ;;  %v2763_v49 = vmul.f32 -1.442695, %v952_v24 }
 0xb08   :  { %975 = vrot.lane.b32.xlu2 %v2901_v39, %s3150_s24  ;;  %2904 = vpow2.f32 %v2762_v25 }
 0xb0d   :  { %v2903_v61 = vpop.eup %2902 }
 0xb0e   :  { %1013 = vrot.lane.b32.xlu0 %v2903_v61, %s3150_s24  ;;  %v2905_v26 = vpop.eup %2904 }
 0xb0f   :  { %v956_v27 = vadd.f32 1.0, %v2905_v26 }
 0xb11   :  { %2906 = vrcp.f32 %v956_v27  ;;  %v968_v63 = vand.u32 2147483648, %v956_v27  ;;  %vm962_vm10 = vweird.f32 %v956_v27  ;;  %v966_v46 = vand.u32 2147483647, %v956_v27 }
 0xb12   :  { %2908 = vpow2.f32 %v2763_v49 }
 0xb13   :  { %v969_v52 = vor.u32 1.1754944e-38, %v968_v63  ;;  %vm967_vm12 = vcmp.eq.f32.partialorder %v966_v46, 8.507059e+37 }
 0xb17   :  { %v2907_v3 = vpop.eup %2906 }
 0xb18   :  { %v958_v28 = vmul.f32 %v2907_v3, %v956_v27  ;;  %vm963_vm9 = vweird.f32 %v2907_v3  ;;  %v2909_v45 = vpop.eup %2908 }
 0xb19   :  { %vm964_vm11 = vmor %vm962_vm10, %vm963_vm9  ;;  %v994_v4 = vadd.f32 1.0, %v2909_v45 }
 0xb1a   :  { %v959_v1 = vsub.f32 1.0, %v958_v28 }
 0xb1b   :  { %2910 = vrcp.f32 %v994_v4  ;;  %v1006_v30 = vand.u32 2147483648, %v994_v4  ;;  %vm1000_vm14 = vweird.f32 %v994_v4  ;;  %v1004_v31 = vand.u32 2147483647, %v994_v4 }
 0xb1c   :  { %v960_v43 = vmul.f32 %v2907_v3, %v959_v1 }
 0xb1d   :  { %v1007_v34 = vor.u32 1.1754944e-38, %v1006_v30  ;;  %vm1005_vm10 = vcmp.eq.f32.partialorder %v1004_v31, 8.507059e+37 }
 0xb1e   :  { %v961_v50 = vadd.f32 %v2907_v3, %v960_v43 }
 0xb20   :  { %v965_v51 = vsel %vm964_vm11, %v2907_v3, %v961_v50 }
 0xb21   :  { %v970_v55 = vsel %vm967_vm12, %v969_v52, %v965_v51  ;;  %v2911_v0 = vpop.eup %2910 }
 0xb22   :  { %v996_v2 = vmul.f32 %v2911_v0, %v994_v4  ;;  %vm1001_vm13 = vweird.f32 %v2911_v0  ;;  %v973_v33 = vmul.f32 %v970_v55, %v3759_v42 }
 0xb23   :  { %vm1002_vm9 = vmor %vm1000_vm14, %vm1001_vm13 }
 0xb24   :  { %v997_v6 = vsub.f32 1.0, %v996_v2 }
 0xb26   :  { %v998_v8 = vmul.f32 %v2911_v0, %v997_v6 }
 0xb28   :  { %v999_v23 = vadd.f32 %v2911_v0, %v998_v8 }
 0xb2a   :  { %v1003_v32 = vsel %vm1002_vm9, %v2911_v0, %v999_v23 }
 0xb2b   :  { %v1008_v7 = vsel %vm1005_vm10, %v1007_v34, %v1003_v32 }
 0xb2c   :  { %v1011_v17 = vmul.f32 %v1008_v7, %v3769_v58 }
 0xb62   :  { %v976_v10 = vpop.permute.xlu2 %975 }
 0xb63   :  { %v978_v59 = vmul.f32 %v976_v10, %v970_v55 }
 0xb65   :  { %980 = vrot.lane.b32.xlu1 %v978_v59, %s3150_s24 }
 0xb80   :  { %v1014_v35 = vpop.permute.xlu0 %1013 }
 0xb81   :  { %v1016_v54 = vmul.f32 %v1014_v35, %v1008_v7 }
 0xb83   :  { %1018 = vrot.lane.b32.xlu2 %v1016_v54, %s3150_s24 }
 0xbd7   :  { %v981_v19 = vpop.permute.xlu1 %980 }
 0xbd8   :  { %v3762_v13 = vadd.f32 %v981_v19, %v973_v33 }
 0xbda   :  { %2912 = vtanh.f32 %v3762_v13 }
 0xbdd   :  { %v1019_v37 = vpop.permute.xlu2 %1018 }
 0xbde   :  { %v3772_v18 = vadd.f32 %v1019_v37, %v1011_v17 }
 0xbe0   :  { %v2913_v41 = vpop.eup %2912  ;;  %2914 = vtanh.f32 %v3772_v18  ;;  %v3810_v37 = vsel %vm758_vm5, %v3772_v18, %v3769_v58 }
 0xbe1   :  { %986 = vrot.lane.b32.xlu0 %v2913_v41, %s3150_s24 }
 0xbe6   :  { %v2915_v40 = vpop.eup %2914 }
 0xbe7   :  { %1024 = vrot.lane.b32.xlu1 %v2915_v40, %s3150_s24 }
 0xc53   :  { %v987_v20 = vpop.permute.xlu0 %986 }
 0xc54   :  { %v3777_v21 = vmul.f32 %v987_v20, %v970_v55 }
 0xc56   :  { %v3783_v56 = vsel %vm759_vm8, %v3777_v21, %v3731_v29 }
 0xc57   :  { %1032 = vrot.lane.b32.xlu2 %v3783_v56, %s3151_s0 }
 0xc59   :  { %v1025_v44 = vpop.permute.xlu1 %1024 }
 0xc5a   :  { %v3787_v22 = vmul.f32 %v1025_v44, %v1008_v7 }
 0xc5c   :  { %v3793_v24 = vsel %vm758_vm5, %v3787_v22, %v3742_v16 }
 0xc5d   :  { %1036 = vrot.lane.b32.xlu0 %v3793_v24, %s3152_s26 }
 0xcb1   :  { %v1033_v39 = vpop.permute.xlu2 %1032 }
 0xccf   :  { %v1037_v61 = vpop.permute.xlu0 %1036 }
 0xcd0   :  { %v1039_v29 = vsel %vm457_vm6, %v1033_v39, %v1037_v61  ;;  %v3821_v39 = vsel %vm759_vm8, %v3762_v13, %v3759_v42 }
 0xcd1   :  { %2764 = vmatmul.msk.f32.vlgmr.msra.gmra.mxu1 %vm209_vm4, %v1039_v29  ;;  %2765 = vmatmul.msk.f32.vlgmr.msra.gmra.mxu2 %vm209_vm4, %v1039_v29 }
 0xd4e   :  { %v1072_v25 = vpop.f32.mrf.mxu1 }
 0xd4f   :  { %v1096_v26 = vadd.f32 %v1072_v25, %v3335_v5 }
 0xd51   :  { %2916 = vtanh.f32 %v1096_v26  ;;  %v2766_v50 = vmul.f32 -1.442695, %v1096_v26 }
 0xd54   :  { %v1092_v27 = vpop.f32.mrf.mxu2 }
 0xd55   :  { %v1098_v3 = vadd.f32 %v1092_v27, %v3323_v60 }
 0xd57   :  { %v2917_v16 = vpop.eup %2916  ;;  %2918 = vtanh.f32 %v1098_v3  ;;  %v2767_v49 = vmul.f32 -1.442695, %v1098_v3 }
 0xd58   :  { %1121 = vrot.lane.b32.xlu1 %v2917_v16, %s3150_s24 }
 0xd59   :  { %2920 = vpow2.f32 %v2767_v49 }
 0xd5d   :  { %v2919_v28 = vpop.eup %2918 }
 0xd5e   :  { %1159 = vrot.lane.b32.xlu2 %v2919_v28, %s3150_s24 }
 0xd5f   :  { %v2921_v1 = vpop.eup %2920 }
 0xd60   :  { %v1140_v43 = vadd.f32 1.0, %v2921_v1 }
 0xd62   :  { %2922 = vrcp.f32 %v1140_v43  ;;  %v1152_v52 = vand.u32 2147483648, %v1140_v43  ;;  %vm1146_vm12 = vweird.f32 %v1140_v43  ;;  %v1150_v10 = vand.u32 2147483647, %v1140_v43 }
 0xd63   :  { %2924 = vpow2.f32 %v2766_v50 }
 0xd64   :  { %v1153_v0 = vor.u32 1.1754944e-38, %v1152_v52  ;;  %vm1151_vm14 = vcmp.eq.f32.partialorder %v1150_v10, 8.507059e+37 }
 0xd68   :  { %v2923_v63 = vpop.eup %2922 }
 0xd69   :  { %v1142_v5 = vmul.f32 %v2923_v63, %v1140_v43  ;;  %v2925_v45 = vpop.eup %2924  ;;  %vm1147_vm11 = vweird.f32 %v2923_v63 }
 0xd6a   :  { %v1102_v51 = vadd.f32 1.0, %v2925_v45  ;;  %vm1148_vm13 = vmor %vm1146_vm12, %vm1147_vm11 }
 0xd6b   :  { %v1143_v46 = vsub.f32 1.0, %v1142_v5 }
 0xd6c   :  { %2926 = vrcp.f32 %v1102_v51  ;;  %v1114_v34 = vand.u32 2147483648, %v1102_v51  ;;  %vm1108_vm10 = vweird.f32 %v1102_v51  ;;  %v1112_v35 = vand.u32 2147483647, %v1102_v51 }
 0xd6d   :  { %v1144_v60 = vmul.f32 %v2923_v63, %v1143_v46 }
 0xd6e   :  { %v1115_v54 = vor.u32 1.1754944e-38, %v1114_v34  ;;  %vm1113_vm11 = vcmp.eq.f32.partialorder %v1112_v35, 8.507059e+37 }
 0xd6f   :  { %v1145_v4 = vadd.f32 %v2923_v63, %v1144_v60 }
 0xd71   :  { %v1149_v59 = vsel %vm1148_vm13, %v2923_v63, %v1145_v4 }
 0xd72   :  { %v2927_v55 = vpop.eup %2926  ;;  %v1154_v8 = vsel %vm1151_vm14, %v1153_v0, %v1149_v59 }
 0xd73   :  { %v1104_v2 = vmul.f32 %v2927_v55, %v1102_v51  ;;  %vm1109_vm9 = vweird.f32 %v2927_v55  ;;  %v1157_v41 = vmul.f32 %v1154_v8, %v3810_v37 }
 0xd74   :  { %vm1110_vm3 = vmor %vm1108_vm10, %vm1109_vm9 }
 0xd75   :  { %v1105_v30 = vsub.f32 1.0, %v1104_v2 }
 0xd77   :  { %v1106_v31 = vmul.f32 %v2927_v55, %v1105_v30 }
 0xd79   :  { %v1107_v32 = vadd.f32 %v2927_v55, %v1106_v31 }
 0xd7b   :  { %v1111_v7 = vsel %vm1110_vm3, %v2927_v55, %v1107_v32 }
 0xd7c   :  { %v1116_v19 = vsel %vm1113_vm11, %v1115_v54, %v1111_v7 }
 0xd7d   :  { %v1119_v61 = vmul.f32 %v1116_v19, %v3821_v39 }
 0xdb8   :  { %v1160_v6 = vpop.permute.xlu2 %1159 }
 0xdb9   :  { %v1162_v23 = vmul.f32 %v1160_v6, %v1154_v8 }
 0xdbb   :  { %1164 = vrot.lane.b32.xlu1 %v1162_v23, %s3150_s24 }
 0xdca   :  { %v1122_v33 = vpop.permute.xlu1 %1121 }
 0xdcb   :  { %v1124_v17 = vmul.f32 %v1122_v33, %v1116_v19 }
 0xdcd   :  { %1126 = vrot.lane.b32.xlu0 %v1124_v17, %s3150_s24 }
 0xe2d   :  { %v1165_v40 = vpop.permute.xlu1 %1164 }
 0xe2e   :  { %v3813_v20 = vadd.f32 %v1165_v40, %v1157_v41 }
 0xe30   :  { %2928 = vtanh.f32 %v3813_v20 }
 0xe36   :  { %v2929_v44 = vpop.eup %2928 }
 0xe37   :  { %1170 = vrot.lane.b32.xlu0 %v2929_v44, %s3150_s24 }
 0xe3f   :  { %v1127_v58 = vpop.permute.xlu0 %1126 }
 0xe40   :  { %v3824_v18 = vadd.f32 %v1127_v58, %v1119_v61 }
 0xe42   :  { %2930 = vtanh.f32 %v3824_v18  ;;  %v3861_v61 = vsel %vm611_vm2, %v3824_v18, %v3821_v39 }
 0xe48   :  { %v2931_v29 = vpop.eup %2930 }
 0xe49   :  { %1132 = vrot.lane.b32.xlu2 %v2931_v29, %s3150_s24 }
 0xea3   :  { %v1133_v25 = vpop.permute.xlu2 %1132 }
 0xea4   :  { %v3828_v26 = vmul.f32 %v1133_v25, %v1116_v19 }
 0xea6   :  { %v3834_v27 = vsel %vm611_vm2, %v3828_v26, %v3783_v56 }
 0xea7   :  { %1178 = vrot.lane.b32.xlu1 %v3834_v27, %s3151_s0 }
 0xea9   :  { %v1171_v42 = vpop.permute.xlu0 %1170 }
 0xeaa   :  { %v3838_v13 = vmul.f32 %v1171_v42, %v1154_v8 }
 0xeac   :  { %v3844_v3 = vsel %vm610_vm15, %v3838_v13, %v3793_v24 }
 0xead   :  { %1182 = vrot.lane.b32.xlu2 %v3844_v3, %s3152_s26 }
 0xf07   :  { %v1183_v16 = vpop.permute.xlu2 %1182 }
 0xf19   :  { %v1179_v28 = vpop.permute.xlu1 %1178 }
 0xf1a   :  { %v1185_v56 = vsel %vm457_vm6, %v1179_v28, %v1183_v16  ;;  %v3872_v16 = vsel %vm610_vm15, %v3813_v20, %v3810_v37 }
 0xf1b   :  { %2768 = vmatmul.msk.f32.vlgmr.msra.gmra.mxu0 %vm209_vm4, %v1185_v56  ;;  %2769 = vmatmul.msk.f32.vlgmr.msrb.gmra.mxu3 %vm209_vm4, %v1185_v56 }
 0xf98   :  { %v1218_v49 = vpop.f32.mrf.mxu0 }
 0xf99   :  { %v1242_v1 = vadd.f32 %v1218_v49, %v3340_v9 }
 0xf9b   :  { %2932 = vtanh.f32 %v1242_v1  ;;  %v2770_v5 = vmul.f32 -1.442695, %v1242_v1 }
 0xf9e   :  { %v1238_v43 = vpop.f32.mrf.mxu3 }
 0xf9f   :  { %v1244_v50 = vadd.f32 %v1238_v43, %v3319_v57 }
 0xfa1   :  { %v2933_v24 = vpop.eup %2932  ;;  %2934 = vtanh.f32 %v1244_v50  ;;  %v2771_v45 = vmul.f32 -1.442695, %v1244_v50 }
 0xfa2   :  { %1267 = vrot.lane.b32.xlu0 %v2933_v24, %s3150_s24  ;;  %2936 = vpow2.f32 %v2770_v5 }
 0xfa3   :  { %2938 = vpow2.f32 %v2771_v45 }
 0xfa7   :  { %v2935_v63 = vpop.eup %2934 }
 0xfa8   :  { %1305 = vrot.lane.b32.xlu1 %v2935_v63, %s3150_s24  ;;  %v2937_v46 = vpop.eup %2936 }
 0xfa9   :  { %v1248_v51 = vadd.f32 1.0, %v2937_v46  ;;  %v2939_v60 = vpop.eup %2938 }
 0xfaa   :  { %v1286_v9 = vadd.f32 1.0, %v2939_v60 }
 0xfab   :  { %2940 = vrcp.f32 %v1248_v51  ;;  %v1260_v6 = vand.u32 2147483648, %v1248_v51  ;;  %vm1254_vm12 = vweird.f32 %v1248_v51  ;;  %v1258_v8 = vand.u32 2147483647, %v1248_v51 }
 0xfac   :  { %2942 = vrcp.f32 %v1286_v9  ;;  %v1298_v7 = vand.u32 2147483648, %v1286_v9  ;;  %vm1292_vm10 = vweird.f32 %v1286_v9  ;;  %v1296_v33 = vand.u32 2147483647, %v1286_v9 }
 0xfad   :  { %v1261_v31 = vor.u32 1.1754944e-38, %v1260_v6  ;;  %vm1259_vm14 = vcmp.eq.f32.partialorder %v1258_v8, 8.507059e+37 }
 0xfae   :  { %v1299_v17 = vor.u32 1.1754944e-38, %v1298_v7  ;;  %vm1297_vm7 = vcmp.eq.f32.partialorder %v1296_v33, 8.507059e+37 }
 0xfb1   :  { %v2941_v4 = vpop.eup %2940 }
 0xfb2   :  { %v1250_v52 = vmul.f32 %v2941_v4, %v1248_v51  ;;  %v2943_v57 = vpop.eup %2942  ;;  %vm1255_vm3 = vweird.f32 %v2941_v4 }
 0xfb3   :  { %v1288_v55 = vmul.f32 %v2943_v57, %v1286_v9  ;;  %vm1256_vm13 = vmor %vm1254_vm12, %vm1255_vm3  ;;  %vm1293_vm9 = vweird.f32 %v2943_v57 }
 0xfb4   :  { %v1251_v10 = vsub.f32 1.0, %v1250_v52  ;;  %vm1294_vm11 = vmor %vm1292_vm10, %vm1293_vm9 }
 0xfb5   :  { %v1289_v0 = vsub.f32 1.0, %v1288_v55 }
 0xfb6   :  { %v1252_v59 = vmul.f32 %v2941_v4, %v1251_v10 }
 0xfb7   :  { %v1290_v23 = vmul.f32 %v2943_v57, %v1289_v0 }
 0xfb8   :  { %v1253_v2 = vadd.f32 %v2941_v4, %v1252_v59 }
 0xfb9   :  { %v1291_v32 = vadd.f32 %v2943_v57, %v1290_v23 }
 0xfba   :  { %v1257_v30 = vsel %vm1256_vm13, %v2941_v4, %v1253_v2 }
 0xfbb   :  { %v1262_v35 = vsel %vm1259_vm14, %v1261_v31, %v1257_v30  ;;  %v1295_v19 = vsel %vm1294_vm11, %v2943_v57, %v1291_v32 }
 0xfbc   :  { %v1300_v40 = vsel %vm1297_vm7, %v1299_v17, %v1295_v19  ;;  %v1265_v58 = vmul.f32 %v1262_v35, %v3861_v61 }
 0xfbd   :  { %v1303_v28 = vmul.f32 %v1300_v40, %v3872_v16 }
0x1014   :  { %v1268_v34 = vpop.permute.xlu0 %1267 }
0x1015   :  { %v1270_v54 = vmul.f32 %v1268_v34, %v1262_v35 }
0x1017   :  { %1272 = vrot.lane.b32.xlu2 %v1270_v54, %s3150_s24 }
0x101a   :  { %v1306_v41 = vpop.permute.xlu1 %1305 }
0x101b   :  { %v1308_v44 = vmul.f32 %v1306_v41, %v1300_v40 }
0x101d   :  { %1310 = vrot.lane.b32.xlu0 %v1308_v44, %s3150_s24 }
0x1071   :  { %v1273_v29 = vpop.permute.xlu2 %1272 }
0x1072   :  { %v3864_v25 = vadd.f32 %v1273_v29, %v1265_v58 }
0x1074   :  { %2944 = vtanh.f32 %v3864_v25 }
0x107a   :  { %v2945_v42 = vpop.eup %2944 }
0x107b   :  { %1278 = vrot.lane.b32.xlu1 %v2945_v42, %s3150_s24 }
0x108f   :  { %v1311_v39 = vpop.permute.xlu0 %1310 }
0x1090   :  { %v3875_v18 = vadd.f32 %v1311_v39, %v1303_v28  ;;  %v1192_v39 = vsel %vm610_vm15, %v3838_v13, 0.0 }
0x1092   :  { %2946 = vtanh.f32 %v3875_v18 }
0x1098   :  { %v2947_v56 = vpop.eup %2946 }
0x1099   :  { %1316 = vrot.lane.b32.xlu2 %v2947_v56, %s3150_s24  ;;  %v900_v56 = vsel %vm759_vm8, %v3735_v15, 0.0  ;;  %v1282_v15 = vsel %vm463_vm1, %v3864_v25, %v3861_v61  ;;  %v1046_v61 = vsel %vm758_vm5, %v3787_v22, 0.0  ;;  %v752_v25 = vsel %vm611_vm2, %v3663_v38, 0.0 }
0x10ed   :  { %v1279_v49 = vpop.permute.xlu1 %1278 }
0x10ee   :  { %v3879_v1 = vmul.f32 %v1279_v49, %v1262_v35  ;;  %v1186_v49 = vsel %vm611_vm2, %v3828_v26, 0.0  ;;  %v598_v26 = vsel %vm462_vm0, %v3582_v12, 0.0 }
0x10f0   :  { %v1321_v43 = vsel %vm463_vm1, %v3879_v1, %v3834_v27  ;;  %v292_v27 = vadd.f32 %v3693_v11, %v3311_v48 }
0x10f1   :  { %1324 = vrot.lane.b32.xlu0 %v1321_v43, %s3151_s0  ;;  %v1320_v43 = vsel %vm462_vm0, %v3875_v18, %v3872_v16 }
0x10f3   :  { %v1317_v37 = vpop.permute.xlu2 %1316 }
0x10f4   :  { %v3886_v20 = vmul.f32 %v1317_v37, %v1300_v40 }
0x10f6   :  { %v1322_v50 = vsel %vm462_vm0, %v3886_v20, %v3844_v3  ;;  %v1338_v28 = vsel %vm462_vm0, %v3886_v20, 0.0 }
0x10f7   :  { %1328 = vrot.lane.b32.xlu1 %v1322_v50, %s3152_s26 }
0x1163   :  { %v1325_v24 = vpop.permute.xlu0 %1324 }
0x1169   :  { %v1329_v63 = vpop.permute.xlu1 %1328 }
0x116a   :  { %v1331_v5 = vsel %vm457_vm6, %v1325_v24, %v1329_v63  ;;  %v746_v63 = vsel %vm610_vm15, %v3652_v36, 0.0  ;;  %v1332_v36 = vsel %vm463_vm1, %v3879_v1, 0.0  ;;  %v1495_v1 = vld [vmem:[#allocation4 + $0x50] sm:$0xff] }
0x116b   :  { %2772 = vmatmul.msk.f32.vlgmr.msrb.gmra.mxu1 %vm209_vm4, %v1331_v5  ;;  %2773 = vmatmul.msk.f32.vlgmr.msrb.gmra.mxu2 %vm209_vm4, %v1331_v5 }
0x11e8   :  { %v1364_v45 = vpop.f32.mrf.mxu1 }
0x11e9   :  { %v1388_v46 = vadd.f32 %v1364_v45, %v292_v27 }
0x11eb   :  { %2948 = vtanh.f32 %v1388_v46  ;;  %v2774_v10 = vmul.f32 -1.442695, %v1388_v46 }
0x11ee   :  { %v1384_v51 = vpop.f32.mrf.mxu2 }
0x11ef   :  { %v1390_v60 = vadd.f32 %v1384_v51, %v3314_v53  ;;  %v1499_v51 = vld [vmem:[#allocation4 + $0x70] sm:$0xff] }
0x11f0   :  { %1539 = vmatpush.msrb.mxu0 %v1499_v51 }
0x11f1   :  { %v2949_v3 = vpop.eup %2948  ;;  %2950 = vtanh.f32 %v1390_v60  ;;  %v2775_v4 = vmul.f32 -1.442695, %v1390_v60  ;;  %v1500_v60 = vld [vmem:[#allocation4 + $0x78] sm:$0xff] }
0x11f2   :  { %1413 = vrot.lane.b32.xlu1 %v2949_v3, %s3150_s24  ;;  %v1497_v3 = vld [vmem:[#allocation4 + $0x60] sm:$0xff]  ;;  %1580 = vmatpush.msra.mxu3 %v1500_v60 }
0x11f3   :  { %2952 = vpow2.f32 %v2775_v4  ;;  %v1496_v4 = vld [vmem:[#allocation4 + $0x58] sm:$0xff]  ;;  %1540 = vmatpush.msrb.mxu0 %v1497_v3 }
0x11f5   :  { %1541 = vmatpush.msrb.mxu0 %v1495_v1 }
0x11f7   :  { %v2951_v9 = vpop.eup %2950 }
0x11f8   :  { %1450 = vrot.lane.b32.xlu2 %v2951_v9, %s3150_s24  ;;  %v1498_v9 = vld [vmem:[#allocation4 + $0x68] sm:$0xff] }
0x11f9   :  { %v2953_v52 = vpop.eup %2952  ;;  %1581 = vmatpush.msra.mxu3 %v1498_v9 }
0x11fa   :  { %v1431_v57 = vadd.f32 1.0, %v2953_v52 }
0x11fb   :  { %1582 = vmatpush.msra.mxu3 %v1496_v4 }
0x11fc   :  { %2954 = vrcp.f32 %v1431_v57  ;;  %v1443_v6 = vand.u32 2147483648, %v1431_v57  ;;  %vm1437_vm3 = vweird.f32 %v1431_v57  ;;  %v1441_v8 = vand.u32 2147483647, %v1431_v57 }
0x11fd   :  { %2956 = vpow2.f32 %v2774_v10  ;;  %v1494_v10 = vld [vmem:[#allocation4 + $0x48] sm:$0xff] }
0x11fe   :  { %v1444_v31 = vor.u32 1.1754944e-38, %v1443_v6  ;;  %vm1442_vm13 = vcmp.eq.f32.partialorder %v1441_v8, 8.507059e+37  ;;  %1583 = vmatpush.msra.mxu3 %v1494_v10  ;;  %v1492_v6 = vld [vmem:[#allocation4 + $0x38] sm:$0xff]  ;;  %v1489_v8 = vld [vmem:[#allocation4 + $0x20] sm:$0xff] }
0x1200   :  { %1584 = vmatpush.msra.mxu3 %v1492_v6 }
0x1202   :  { %v2955_v48 = vpop.eup %2954 }
0x1203   :  { %v1433_v11 = vmul.f32 %v2955_v48, %v1431_v57  ;;  %v2957_v55 = vpop.eup %2956  ;;  %vm1438_vm7 = vweird.f32 %v2955_v48  ;;  %v1493_v57 = vld [vmem:[#allocation4 + $0x40] sm:$0xff] }
0x1204   :  { %v1394_v0 = vadd.f32 1.0, %v2957_v55  ;;  %vm1439_vm12 = vmor %vm1437_vm3, %vm1438_vm7  ;;  %vm4548_vm7 = vcmask 523520   ;;  %vm4549_vm3 = vcmp.gt.s32.totalorder %v3358_v62, 0  ;;  %1542 = vmatpush.msrb.mxu0 %v1493_v57 }
0x1205   :  { %v1434_v59 = vsub.f32 1.0, %v1433_v11  ;;  %v894_v11 = vsel %vm758_vm5, %v3724_v14, 0.0  ;;  %v1491_v14 = vld [vmem:[#allocation4 + $0x30] sm:$0xff] }
0x1206   :  { %2958 = vrcp.f32 %v1394_v0  ;;  %v1406_v17 = vand.u32 2147483648, %v1394_v0  ;;  %vm1400_vm9 = vweird.f32 %v1394_v0  ;;  %v1404_v41 = vand.u32 2147483647, %v1394_v0  ;;  %1543 = vmatpush.msrb.mxu0 %v1491_v14 }
0x1207   :  { %v1435_v53 = vmul.f32 %v2955_v48, %v1434_v59  ;;  %v1040_v59 = vsel %vm759_vm8, %v3777_v21, 0.0  ;;  %v1490_v21 = vld [vmem:[#allocation4 + $0x28] sm:$0xff] }
0x1208   :  { %v1407_v44 = vor.u32 1.1754944e-38, %v1406_v17  ;;  %vm1405_vm11 = vcmp.eq.f32.partialorder %v1404_v41, 8.507059e+37  ;;  %1544 = vmatpush.msrb.mxu0 %v1489_v8  ;;  %1585 = vmatpush.msra.mxu3 %v1490_v21 }
0x1209   :  { %v1436_v2 = vadd.f32 %v2955_v48, %v1435_v53 }
0x120b   :  { %v1440_v30 = vsel %vm1439_vm12, %v2955_v48, %v1436_v2  ;;  %vm4550_vm12 = vmmov %vm4548_vm7  ;;  %v604_v2 = vsel %vm463_vm1, %v3593_v47, 0.0 }
0x120c   :  { %v2959_v23 = vpop.eup %2958  ;;  %v1445_v35 = vsel %vm1442_vm13, %v1444_v31, %v1440_v30  ;;  %vm4551_vm13 = vmmov %vm4548_vm7  ;;  %v1488_v30 = vld [vmem:[#allocation4 + $0x18] sm:$0xff]  ;;  %v1485_v31 = vld [vmem:[#allocation4] sm:$0xff] }
0x120d   :  { %v1396_v32 = vmul.f32 %v2959_v23, %v1394_v0  ;;  %vm1401_vm14 = vweird.f32 %v2959_v23  ;;  %v1448_v13 = vmul.f32 %v1445_v35, %v1320_v43  ;;  %1586 = vmatpush.msra.mxu3 %v1488_v30 }
0x120e   :  { %vm1402_vm10 = vmor %vm1400_vm9, %vm1401_vm14 }
0x120f   :  { %v1397_v54 = vsub.f32 1.0, %v1396_v32  ;;  %vm4552_vm14 = vmmov %vm4548_vm7  ;;  %v1486_v32 = vld [vmem:[#allocation4 + $0x8] sm:$0xff] }
0x1210   :  { %1587 = vmatpush.msra.mxu3 %v1486_v32  ;;  %vm4553_vm9 = vmmov %vm4548_vm7 }
0x1211   :  { %v1398_v33 = vmul.f32 %v2959_v23, %v1397_v54 }
0x1213   :  { %v1399_v19 = vadd.f32 %v2959_v23, %v1398_v33 }
0x1215   :  { %v1403_v40 = vsel %vm1402_vm10, %v2959_v23, %v1399_v19  ;;  %v1487_v23 = vld [vmem:[#allocation4 + $0x10] sm:$0xff]  ;;  %vm4554_vm10 = vcmp.gt.s32.totalorder %v3358_v62, 7 }
0x1216   :  { %v3902_v29 = vsel %vm1405_vm11, %v1407_v44, %v1403_v40  ;;  %1545 = vmatpush.msrb.mxu0 %v1487_v23  ;;  %vm4555_vm11 = vmmov %vm4548_vm7 }
0x1217   :  { %v1411_v24 = vmul.f32 %v3902_v29, %v1282_v15 }
0x1218   :  { %1546 = vmatpush.msrb.mxu0 %v1485_v31 }
0x1252   :  { %v1451_v34 = vpop.permute.xlu2 %1450 }
0x1253   :  { %v1453_v7 = vmul.f32 %v1451_v34, %v1445_v35 }
0x1255   :  { %1455 = vrot.lane.b32.xlu0 %v1453_v7, %s3150_s24 }
0x1264   :  { %v1414_v58 = vpop.permute.xlu1 %1413 }
0x1265   :  { %v1416_v42 = vmul.f32 %v1414_v58, %v3902_v29 }
0x1267   :  { %1418 = vrot.lane.b32.xlu0 %v1416_v42, %s3150_s24 }
0x126f   :  { %1340 = vrot.lane.b32.xlu0 %v1338_v28, %s3152_s26 }
0x1277   :  { %1194 = vrot.lane.b32.xlu0 %v1192_v39, %s3152_s26 }
0x127f   :  { %902 = vrot.lane.b32.xlu0 %v900_v56, %s3152_s26  ;;  %v1501_v56 = vld [vmem:[%s4541_s8] sm:$0x3] }
0x1280   :  { %v4024_v4 = vperm.slane %v1501_v56, 1 }
0x1287   :  { %1188 = vrot.lane.b32.xlu0 %v1186_v49, %s3151_s0  ;;  %v4003_v49 = vperm.slane %v1501_v56, 0  ;;  %v4055_v56 = vld [vmem:[#allocation6 + $0x58] sm:$0xff] }
0x12c7   :  { %v1456_v37 = vpop.permute.xlu0 %1455 }
0x12c8   :  { %v1458_v20 = vadd.f32 %v1456_v37, %v1448_v13 }
0x12ca   :  { %2960 = vtanh.f32 %v1458_v20 }
0x12d0   :  { %v2961_v50 = vpop.eup %2960 }
0x12d1   :  { %1461 = vrot.lane.b32.xlu2 %v2961_v50, %s3150_s24 }
0x12d9   :  { %600 = vrot.lane.b32.xlu2 %v598_v26, %s3151_s0  ;;  %v1419_v16 = vpop.permute.xlu0 %1418 }
0x12da   :  { %v1421_v18 = vadd.f32 %v1419_v16, %v1411_v24 }
0x12dc   :  { %2962 = vtanh.f32 %v1421_v18 }
0x12e1   :  { %748 = vrot.lane.b32.xlu2 %v746_v63, %s3151_s0  ;;  %v1341_v5 = vpop.permute.xlu0 %1340 }
0x12e2   :  { %v2963_v52 = vpop.eup %2962 }
0x12e9   :  { %1048 = vrot.lane.b32.xlu2 %v1046_v61, %s3152_s26  ;;  %v1195_v12 = vpop.permute.xlu0 %1194 }
0x12f1   :  { %754 = vrot.lane.b32.xlu2 %v752_v25, %s3152_s26  ;;  %v903_v27 = vpop.permute.xlu0 %902 }
0x12f2   :  { %905 = vst.msk [vmem:[#allocation2 + $0x20] sm:$0xff] %vm4548_vm7, %v903_v27 }
0x12f9   :  { %1334 = vrot.lane.b32.xlu2 %v1332_v36, %s3151_s0  ;;  %v1189_v53 = vpop.permute.xlu0 %1188 }
0x132b   :  { %v1462_v45 = vpop.permute.xlu2 %1461 }
0x132c   :  { %v1464_v22 = vmul.f32 %v1462_v45, %v1445_v35 }
0x132e   :  { %v1471_v46 = vsel %vm4549_vm3, %v1464_v22, 0.0 }
0x132f   :  { %1473 = vrot.lane.b32.xlu1 %v1471_v46, %s3152_s26 }
0x1333   :  { %v601_v38 = vpop.permute.xlu2 %600 }
0x1334   :  { %603 = vst.msk [vmem:[#allocation2 + $0x8] sm:$0xff] %vm457_vm6, %v601_v38 }
0x1335   :  { %1343 = vst.msk [vmem:[#allocation2 + $0x8] sm:$0xff] %vm4550_vm12, %v1341_v5 }
0x1337   :  { %1424 = vrot.lane.b32.xlu1 %v2963_v52, %s3150_s24 }
0x133b   :  { %v749_v48 = vpop.permute.xlu2 %748 }
0x133c   :  { %751 = vst.msk [vmem:[#allocation2 + $0x10] sm:$0xff] %vm457_vm6, %v749_v48  ;;  %v1478_v19 = vld [vmem:[#allocation2 + $0x8] sm:$0xff] }
0x133d   :  { %1197 = vst.msk [vmem:[#allocation2 + $0x10] sm:$0xff] %vm4551_vm13, %v1195_v12 }
0x133f   :  { %896 = vrot.lane.b32.xlu1 %v894_v11, %s3151_s0 }
0x1343   :  { %v1049_v55 = vpop.permute.xlu2 %1048 }
0x1344   :  { %v1479_v41 = vld [vmem:[#allocation2 + $0x10] sm:$0xff] }
0x1347   :  { %1042 = vrot.lane.b32.xlu1 %v1040_v59, %s3151_s0 }
0x134b   :  { %v755_v0 = vpop.permute.xlu2 %754 }
0x134c   :  { %757 = vst.msk [vmem:[#allocation2 + $0x28] sm:$0xff] %vm4552_vm14, %v755_v0 }
0x134d   :  { %1191 = vst.msk [vmem:[#allocation2 + $0x28] sm:$0xff] %vm457_vm6, %v1189_v53 }
0x134f   :  { %606 = vrot.lane.b32.xlu1 %v604_v2, %s3152_s26 }
0x1353   :  { %v1335_v58 = vpop.permute.xlu2 %1334 }
0x1354   :  { %v1482_v42 = vld [vmem:[#allocation2 + $0x28] sm:$0xff] }
0x13a1   :  { %v1474_v34 = vpop.permute.xlu1 %1473 }
0x13a2   :  { %1476 = vst.msk [vmem:[#allocation2] sm:$0xff] %vm4553_vm9, %v1474_v34 }
0x13a9   :  { %v1425_v47 = vpop.permute.xlu1 %1424  ;;  %v1477_v35 = vld [vmem:[#allocation2] sm:$0xff] }
0x13aa   :  { %v1427_v7 = vmul.f32 %v1425_v47, %v3902_v29  ;;  %2776 = vmatmul.msk.f32.vlgmr.msrb.gmra.mxu0 %vm209_vm4, %v1477_v35  ;;  %2784 = vmatmul.msk.f32.vlgmr.msra.gmra.mxu3 %vm209_vm4, %v1477_v35 }
0x13ac   :  { %v1465_v54 = vsel %vm4554_vm10, %v1427_v7, 0.0 }
0x13ad   :  { %1467 = vrot.lane.b32.xlu0 %v1465_v54, %s3151_s0 }
0x13b1   :  { %v897_v33 = vpop.permute.xlu1 %896 }
0x13b2   :  { %899 = vst.msk [vmem:[#allocation2 + $0x18] sm:$0xff] %vm457_vm6, %v897_v33  ;;  %2777 = vmatmul.msk.f32.gmra.mxu0 %vm209_vm4, %v1478_v19  ;;  %2785 = vmatmul.msk.f32.gmra.mxu3 %vm209_vm4, %v1478_v19 }
0x13b3   :  { %1051 = vst.msk [vmem:[#allocation2 + $0x18] sm:$0xff] %vm4555_vm11, %v1049_v55 }
0x13b9   :  { %v1043_v17 = vpop.permute.xlu1 %1042 }
0x13ba   :  { %1045 = vst.msk [vmem:[#allocation2 + $0x20] sm:$0xff] %vm457_vm6, %v1043_v17  ;;  %2778 = vmatmul.msk.f32.gmra.mxu0 %vm209_vm4, %v1479_v41  ;;  %2786 = vmatmul.msk.f32.gmra.mxu3 %vm209_vm4, %v1479_v41  ;;  %v1480_v44 = vld [vmem:[#allocation2 + $0x18] sm:$0xff] }
0x13c1   :  { %v607_v40 = vpop.permute.xlu1 %606  ;;  %v1481_v29 = vld [vmem:[#allocation2 + $0x20] sm:$0xff] }
0x13c2   :  { %609 = vst.msk [vmem:[#allocation2 + $0x30] sm:$0xff] %vm4548_vm7, %v607_v40  ;;  %2779 = vmatmul.msk.f32.gmra.mxu0 %vm209_vm4, %v1480_v44  ;;  %2787 = vmatmul.msk.f32.gmra.mxu3 %vm209_vm4, %v1480_v44 }
0x13c3   :  { %1337 = vst.msk [vmem:[#allocation2 + $0x30] sm:$0xff] %vm457_vm6, %v1335_v58  ;;  %v4043_v58 = vld [vmem:[#allocation6 + $0x70] sm:$0xff] }
0x13c4   :  { %1745 = vmatpush.msra.mxu1 %v4043_v58  ;;  %2281 = vmatpush.msra.mxu0 %v4043_v58 }
0x13ca   :  { %2780 = vmatmul.msk.f32.gmra.mxu0 %vm209_vm4, %v1481_v29  ;;  %2788 = vmatmul.msk.f32.gmra.mxu3 %vm209_vm4, %v1481_v29  ;;  %v1483_v28 = vld [vmem:[#allocation2 + $0x30] sm:$0xff]  ;;  %v4045_v29 = vld [vmem:[#allocation6 + $0x78] sm:$0xff] }
0x13cb   :  { %1765 = vmatpush.msra.mxu2 %v4045_v29  ;;  %2301 = vmatpush.msrb.mxu3 %v4045_v29 }
0x13d2   :  { %2781 = vmatmul.msk.f32.gmra.mxu0 %vm209_vm4, %v1482_v42  ;;  %2789 = vmatmul.msk.f32.gmra.mxu3 %vm209_vm4, %v1482_v42  ;;  %v4047_v42 = vld [vmem:[#allocation6 + $0x60] sm:$0xff] }
0x13d3   :  { %1746 = vmatpush.msra.mxu1 %v4047_v42  ;;  %2282 = vmatpush.msra.mxu0 %v4047_v42 }
0x13da   :  { %2782 = vmatmul.msk.f32.gmra.mxu0 %vm209_vm4, %v1483_v28  ;;  %2790 = vmatmul.msk.f32.gmra.mxu3 %vm209_vm4, %v1483_v28  ;;  %v4051_v28 = vld [vmem:[#allocation6 + $0x68] sm:$0xff] }
0x13db   :  { %1766 = vmatpush.msra.mxu2 %v4051_v28  ;;  %2302 = vmatpush.msrb.mxu3 %v4051_v28 }
0x13dd   :  { %1767 = vmatpush.msra.mxu2 %v4055_v56  ;;  %2303 = vmatpush.msrb.mxu3 %v4055_v56 }
0x141f   :  { %v1468_v39 = vpop.permute.xlu0 %1467 }
0x1420   :  { %1470 = vst.msk [vmem:[#allocation2 + $0x38] sm:$0xff] %vm457_vm6, %v1468_v39  ;;  %v4053_v39 = vld [vmem:[#allocation6 + $0x50] sm:$0xff] }
0x1421   :  { %1747 = vmatpush.msra.mxu1 %v4053_v39  ;;  %2283 = vmatpush.msra.mxu0 %v4053_v39 }
0x1427   :  { %v1548_v43 = vpop.f32.mrf.mxu0  ;;  %v1484_v13 = vld [vmem:[#allocation2 + $0x38] sm:$0xff] }
0x1428   :  { %v1549_v37 = vadd.f32 %v1548_v43, %v4003_v49  ;;  %2783 = vmatmul.msk.f32.gmra.mxu0 %vm209_vm4, %v1484_v13  ;;  %2791 = vmatmul.msk.f32.gmra.mxu3 %vm209_vm4, %v1484_v13  ;;  %v4061_v43 = vld [vmem:[#allocation6 + $0x40] sm:$0xff]  ;;  %v4063_v13 = vld [vmem:[#allocation6 + $0x48] sm:$0xff] }
0x1429   :  { %1748 = vmatpush.msra.mxu1 %v4061_v43  ;;  %1768 = vmatpush.msra.mxu2 %v4063_v13 }
0x142a   :  { %2964 = vtanh.f32 %v1549_v37  ;;  %v2792_v26 = vmul.f32 -1.442695, %v1549_v37  ;;  %v4069_v37 = vld [vmem:[#allocation6 + $0x30] sm:$0xff]  ;;  %2304 = vmatpush.msrb.mxu3 %v4063_v13  ;;  %2284 = vmatpush.msra.mxu0 %v4061_v43 }
0x142b   :  { %1749 = vmatpush.msra.mxu1 %v4069_v37 }
0x142c   :  { %2966 = vpow2.f32 %v2792_v26  ;;  %v4077_v26 = vld [vmem:[#allocation6 + $0x20] sm:$0xff]  ;;  %2285 = vmatpush.msra.mxu0 %v4069_v37 }
0x142d   :  { %v4009_v50 = vpop.f32.mrf.mxu3  ;;  %1750 = vmatpush.msra.mxu1 %v4077_v26 }
0x142e   :  { %2286 = vmatpush.msra.mxu0 %v4077_v26 }
0x1430   :  { %v2965_v20 = vpop.eup %2964 }
0x1431   :  { %1669 = vrot.lane.b32.xlu1 %v2965_v20, %s3150_s24  ;;  %v4071_v20 = vld [vmem:[#allocation6 + $0x38] sm:$0xff] }
0x1432   :  { %v2967_v16 = vpop.eup %2966  ;;  %1769 = vmatpush.msra.mxu2 %v4071_v20  ;;  %2305 = vmatpush.msrb.mxu3 %v4071_v20 }
0x1433   :  { %v1650_v18 = vadd.f32 1.0, %v2967_v16  ;;  %v4079_v16 = vld [vmem:[#allocation6 + $0x28] sm:$0xff] }
0x1434   :  { %1770 = vmatpush.msra.mxu2 %v4079_v16  ;;  %2306 = vmatpush.msrb.mxu3 %v4079_v16 }
0x1435   :  { %v4011_v15 = vpop.f32.mrf.mxu3  ;;  %2968 = vrcp.f32 %v1650_v18  ;;  %v1662_v22 = vand.u32 2147483648, %v1650_v18  ;;  %vm1656_vm12 = vweird.f32 %v1650_v18  ;;  %v1660_v46 = vand.u32 2147483647, %v1650_v18 }
0x1437   :  { %v1663_v51 = vor.u32 1.1754944e-38, %v1662_v22  ;;  %vm1661_vm14 = vcmp.eq.f32.partialorder %v1660_v46, 8.507059e+37  ;;  %v4107_v22 = vld [vmem:[#allocation6 + $0x8] sm:$0xff] }
0x143b   :  { %v2969_v5 = vpop.eup %2968 }
0x143c   :  { %v1652_v12 = vmul.f32 %v2969_v5, %v1650_v18  ;;  %vm1657_vm3 = vweird.f32 %v2969_v5  ;;  %v4085_v18 = vld [vmem:[#allocation6 + $0x10] sm:$0xff] }
0x143d   :  { %v4013_v24 = vpop.f32.mrf.mxu3  ;;  %vm1658_vm13 = vmor %vm1656_vm12, %vm1657_vm3  ;;  %vm4556_vm3 = vcmp.gt.s32.totalorder %v3358_v62, 0  ;;  %1751 = vmatpush.msra.mxu1 %v4085_v18  ;;  %2287 = vmatpush.msra.mxu0 %v4085_v18  ;;  %vm4557_vm12 = vcmp.gt.s32.totalorder %v3358_v62, 7 }
0x143e   :  { %v1653_v25 = vsub.f32 1.0, %v1652_v12 }
0x1440   :  { %v1654_v27 = vmul.f32 %v2969_v5, %v1653_v25 }
0x1442   :  { %v1655_v45 = vadd.f32 %v2969_v5, %v1654_v27 }
0x1444   :  { %v1659_v38 = vsel %vm1658_vm13, %v2969_v5, %v1655_v45  ;;  %v4087_v5 = vld [vmem:[#allocation6 + $0x18] sm:$0xff]  ;;  %v4105_v45 = vld [vmem:[#allocation6] sm:$0xff] }
0x1445   :  { %v4015_v63 = vpop.f32.mrf.mxu3  ;;  %v1664_v3 = vsel %vm1661_vm14, %v1663_v51, %v1659_v38  ;;  %1771 = vmatpush.msra.mxu2 %v4087_v5  ;;  %2307 = vmatpush.msrb.mxu3 %v4087_v5 }
0x1446   :  { %v1667_v34 = vmul.f32 0.0, %v1664_v3  ;;  %1752 = vmatpush.msra.mxu1 %v4105_v45  ;;  %2288 = vmatpush.msra.mxu0 %v4105_v45 }
0x1447   :  { %1772 = vmatpush.msra.mxu2 %v4107_v22  ;;  %2308 = vmatpush.msrb.mxu3 %v4107_v22 }
0x1448   :  { %1879 = vmatpush.msrb.mxu1 %v4043_v58  ;;  %2549 = vmatpush.msrb.mxu0 %v4043_v58 }
0x1449   :  { %1899 = vmatpush.msrb.mxu2 %v4045_v29  ;;  %2569 = vmatpush.msra.mxu3 %v4045_v29 }
0x144a   :  { %1880 = vmatpush.msrb.mxu1 %v4047_v42  ;;  %2550 = vmatpush.msrb.mxu0 %v4047_v42 }
0x144b   :  { %1900 = vmatpush.msrb.mxu2 %v4051_v28  ;;  %2570 = vmatpush.msra.mxu3 %v4051_v28 }
0x144c   :  { %1881 = vmatpush.msrb.mxu1 %v4053_v39  ;;  %2551 = vmatpush.msrb.mxu0 %v4053_v39 }
0x144d   :  { %v4017_v61 = vpop.f32.mrf.mxu3  ;;  %1901 = vmatpush.msrb.mxu2 %v4055_v56  ;;  %2571 = vmatpush.msra.mxu3 %v4055_v56 }
0x144e   :  { %1882 = vmatpush.msrb.mxu1 %v4061_v43  ;;  %2552 = vmatpush.msrb.mxu0 %v4061_v43 }
0x144f   :  { %1902 = vmatpush.msrb.mxu2 %v4063_v13  ;;  %2572 = vmatpush.msra.mxu3 %v4063_v13 }
0x1450   :  { %1883 = vmatpush.msrb.mxu1 %v4069_v37  ;;  %2553 = vmatpush.msrb.mxu0 %v4069_v37 }
0x1451   :  { %1903 = vmatpush.msrb.mxu2 %v4071_v20  ;;  %2573 = vmatpush.msra.mxu3 %v4071_v20 }
0x1452   :  { %1884 = vmatpush.msrb.mxu1 %v4077_v26  ;;  %2554 = vmatpush.msrb.mxu0 %v4077_v26 }
0x1453   :  { %1904 = vmatpush.msrb.mxu2 %v4079_v16  ;;  %2574 = vmatpush.msra.mxu3 %v4079_v16 }
0x1454   :  { %1885 = vmatpush.msrb.mxu1 %v4085_v18  ;;  %2555 = vmatpush.msrb.mxu0 %v4085_v18 }
0x1455   :  { %v4019_v36 = vpop.f32.mrf.mxu3  ;;  %1905 = vmatpush.msrb.mxu2 %v4087_v5  ;;  %2575 = vmatpush.msra.mxu3 %v4087_v5 }
0x1456   :  { %1886 = vmatpush.msrb.mxu1 %v4105_v45  ;;  %2556 = vmatpush.msrb.mxu0 %v4105_v45 }
0x1457   :  { %1906 = vmatpush.msrb.mxu2 %v4107_v22  ;;  %2576 = vmatpush.msra.mxu3 %v4107_v22 }
0x145d   :  { %v4021_v60 = vpop.f32.mrf.mxu3 }
0x14a3   :  { %v1670_v9 = vpop.permute.xlu1 %1669 }
0x14a4   :  { %v1672_v1 = vmul.f32 %v1670_v9, %v1664_v3 }
0x14a6   :  { %1674 = vrot.lane.b32.xlu0 %v1672_v1, %s3150_s24 }
0x14ab   :  { %v1610_v52 = vpop.f32.mrf.mxu3 }
0x14ac   :  { %v1611_v57 = vadd.f32 %v1610_v52, %v4024_v4 }
0x14ae   :  { %2970 = vtanh.f32 %v1611_v57  ;;  %v2793_v48 = vmul.f32 -1.442695, %v1611_v57  ;;  %v1608_v57 = vadd.f32 %v4021_v60, %v4024_v4 }
0x14b0   :  { %2972 = vpow2.f32 %v2793_v48 }
0x14b4   :  { %v2971_v10 = vpop.eup %2970 }
0x14b5   :  { %1707 = vrot.lane.b32.xlu2 %v2971_v10, %s3150_s24 }
0x14b6   :  { %v2973_v11 = vpop.eup %2972 }
0x14b7   :  { %v1688_v55 = vadd.f32 1.0, %v2973_v11 }
0x14b9   :  { %2974 = vrcp.f32 %v1688_v55  ;;  %v1700_v6 = vand.u32 2147483648, %v1688_v55  ;;  %vm1694_vm10 = vweird.f32 %v1688_v55  ;;  %v1698_v8 = vand.u32 2147483647, %v1688_v55 }
0x14bb   :  { %v1701_v23 = vor.u32 1.1754944e-38, %v1700_v6  ;;  %vm1699_vm7 = vcmp.eq.f32.partialorder %v1698_v8, 8.507059e+37 }
0x14bf   :  { %v2975_v59 = vpop.eup %2974 }
0x14c0   :  { %v1690_v0 = vmul.f32 %v2975_v59, %v1688_v55  ;;  %vm1695_vm9 = vweird.f32 %v2975_v59 }
0x14c1   :  { %vm1696_vm11 = vmor %vm1694_vm10, %vm1695_vm9 }
0x14c2   :  { %v1691_v53 = vsub.f32 1.0, %v1690_v0 }
0x14c4   :  { %v1692_v2 = vmul.f32 %v2975_v59, %v1691_v53 }
0x14c6   :  { %v1693_v14 = vadd.f32 %v2975_v59, %v1692_v2 }
0x14c8   :  { %v1697_v21 = vsel %vm1696_vm11, %v2975_v59, %v1693_v14 }
0x14c9   :  { %v1702_v31 = vsel %vm1699_vm7, %v1701_v23, %v1697_v21 }
0x14ca   :  { %v1705_v17 = vmul.f32 0.0, %v1702_v31 }
0x150f   :  { %v1708_v30 = vpop.permute.xlu2 %1707 }
0x1510   :  { %v1710_v32 = vmul.f32 %v1708_v30, %v1702_v31 }
0x1512   :  { %1712 = vrot.lane.b32.xlu1 %v1710_v32, %s3150_s24 }
0x1518   :  { %v1675_v47 = vpop.permute.xlu0 %1674 }
0x1519   :  { %v4029_v35 = vadd.f32 %v1675_v47, %v1667_v34 }
0x151b   :  { %2976 = vtanh.f32 %v4029_v35 }
0x1521   :  { %v2977_v7 = vpop.eup %2976 }
0x1522   :  { %1680 = vrot.lane.b32.xlu2 %v2977_v7, %s3150_s24 }
0x157c   :  { %v1681_v54 = vpop.permute.xlu2 %1680 }
0x157d   :  { %v1683_v33 = vmul.f32 %v1681_v54, %v1664_v3  ;;  %v1551_v3 = vpop.f32.mrf.mxu0 }
0x157e   :  { %v1552_v9 = vadd.f32 %v1551_v3, %v4003_v49 }
0x157f   :  { %v4035_v19 = vsel %vm4556_vm3, %v1683_v33, 0.0 }
0x1580   :  { %1726 = vrot.lane.b32.xlu1 %v4035_v19, %s3151_s0 }
0x1584   :  { %v1713_v41 = vpop.permute.xlu1 %1712 }
0x1585   :  { %v4039_v40 = vadd.f32 %v1713_v41, %v1705_v17 }
0x1587   :  { %2978 = vtanh.f32 %v4039_v40 }
0x158d   :  { %v2979_v44 = vpop.eup %2978 }
0x158e   :  { %1718 = vrot.lane.b32.xlu0 %v2979_v44, %s3150_s24 }
0x15f2   :  { %v1727_v46 = vpop.permute.xlu1 %1726 }
0x1600   :  { %v1719_v12 = vpop.permute.xlu0 %1718 }
0x1601   :  { %v1721_v25 = vmul.f32 %v1719_v12, %v1702_v31 }
0x1603   :  { %v4101_v27 = vsel %vm4557_vm12, %v1721_v25, 0.0 }
0x1604   :  { %1730 = vrot.lane.b32.xlu2 %v4101_v27, %s3152_s26 }
0x165e   :  { %v1731_v38 = vpop.permute.xlu2 %1730 }
0x165f   :  { %v1733_v51 = vsel %vm457_vm6, %v1727_v46, %v1731_v38 }
0x1660   :  { %2794 = vmatmul.msk.f32.vlgmr.msra.gmra.mxu1 %vm209_vm4, %v1733_v51  ;;  %2795 = vmatmul.msk.f32.vlgmr.msra.gmra.mxu2 %vm209_vm4, %v1733_v51 }
0x1661   :  { %2013 = vmatpush.msra.mxu1 %v4043_v58  ;;  %2033 = vmatpush.msra.mxu2 %v4045_v29 }
0x1663   :  { %2014 = vmatpush.msra.mxu1 %v4047_v42  ;;  %2034 = vmatpush.msra.mxu2 %v4051_v28 }
0x1665   :  { %2015 = vmatpush.msra.mxu1 %v4053_v39  ;;  %2035 = vmatpush.msra.mxu2 %v4055_v56 }
0x1667   :  { %2016 = vmatpush.msra.mxu1 %v4061_v43  ;;  %2036 = vmatpush.msra.mxu2 %v4063_v13 }
0x1669   :  { %2017 = vmatpush.msra.mxu1 %v4069_v37  ;;  %2037 = vmatpush.msra.mxu2 %v4071_v20 }
0x166b   :  { %2018 = vmatpush.msra.mxu1 %v4077_v26  ;;  %2038 = vmatpush.msra.mxu2 %v4079_v16 }
0x166d   :  { %2019 = vmatpush.msra.mxu1 %v4085_v18  ;;  %2039 = vmatpush.msra.mxu2 %v4087_v5 }
0x166f   :  { %2020 = vmatpush.msra.mxu1 %v4105_v45  ;;  %2040 = vmatpush.msra.mxu2 %v4107_v22 }
0x16dd   :  { %v1754_v1 = vpop.f32.mrf.mxu1 }
0x16de   :  { %v1778_v52 = vadd.f32 %v1754_v1, %v1552_v9 }
0x16e0   :  { %2980 = vtanh.f32 %v1778_v52  ;;  %v2796_v59 = vmul.f32 -1.442695, %v1778_v52 }
0x16e3   :  { %v1774_v10 = vpop.f32.mrf.mxu2 }
0x16e4   :  { %v1780_v48 = vadd.f32 %v1774_v10, %v1608_v57 }
0x16e6   :  { %v2981_v11 = vpop.eup %2980  ;;  %2982 = vtanh.f32 %v1780_v48  ;;  %v2797_v0 = vmul.f32 -1.442695, %v1780_v48 }
0x16e7   :  { %1803 = vrot.lane.b32.xlu0 %v2981_v11, %s3150_s24  ;;  %2984 = vpow2.f32 %v2796_v59 }
0x16e8   :  { %2986 = vpow2.f32 %v2797_v0 }
0x16ec   :  { %v2983_v55 = vpop.eup %2982 }
0x16ed   :  { %1841 = vrot.lane.b32.xlu1 %v2983_v55, %s3150_s24  ;;  %v2985_v53 = vpop.eup %2984 }
0x16ee   :  { %v1784_v2 = vadd.f32 1.0, %v2985_v53  ;;  %v2987_v14 = vpop.eup %2986 }
0x16ef   :  { %v1822_v6 = vadd.f32 1.0, %v2987_v14 }
0x16f0   :  { %2988 = vrcp.f32 %v1784_v2  ;;  %v1796_v47 = vand.u32 2147483648, %v1784_v2  ;;  %vm1790_vm14 = vweird.f32 %v1784_v2  ;;  %v1794_v7 = vand.u32 2147483647, %v1784_v2 }
0x16f1   :  { %2990 = vrcp.f32 %v1822_v6  ;;  %v1834_v25 = vand.u32 2147483648, %v1822_v6  ;;  %vm1828_vm7 = vweird.f32 %v1822_v6  ;;  %v1832_v38 = vand.u32 2147483647, %v1822_v6 }
0x16f2   :  { %v1797_v17 = vor.u32 1.1754944e-38, %v1796_v47  ;;  %vm1795_vm10 = vcmp.eq.f32.partialorder %v1794_v7, 8.507059e+37  ;;  %v1605_v47 = vadd.f32 %v4019_v36, %v4024_v4 }
0x16f3   :  { %v1835_v3 = vor.u32 1.1754944e-38, %v1834_v25  ;;  %vm1833_vm12 = vcmp.eq.f32.partialorder %v1832_v38, 8.507059e+37 }
0x16f6   :  { %v2989_v8 = vpop.eup %2988 }
0x16f7   :  { %v1786_v60 = vmul.f32 %v2989_v8, %v1784_v2  ;;  %v2991_v21 = vpop.eup %2990  ;;  %vm1791_vm13 = vweird.f32 %v2989_v8 }
0x16f8   :  { %v1824_v30 = vmul.f32 %v2991_v21, %v1822_v6  ;;  %vm1792_vm9 = vmor %vm1790_vm14, %vm1791_vm13  ;;  %vm1829_vm11 = vweird.f32 %v2991_v21  ;;  %vm4558_vm13 = vcmp.gt.s32.totalorder %v3358_v62, 0  ;;  %vm4559_vm14 = vcmp.gt.s32.totalorder %v3358_v62, 7 }
0x16f9   :  { %v1787_v23 = vsub.f32 1.0, %v1786_v60  ;;  %vm1830_vm3 = vmor %vm1828_vm7, %vm1829_vm11  ;;  %v4174_v57 = vsel %vm4558_vm13, %v4029_v35, 0.0  ;;  %v4184_v59 = vsel %vm4559_vm14, %v4039_v40, 0.0 }
0x16fa   :  { %v1825_v32 = vsub.f32 1.0, %v1824_v30 }
0x16fb   :  { %v1788_v31 = vmul.f32 %v2989_v8, %v1787_v23 }
0x16fc   :  { %v1826_v54 = vmul.f32 %v2991_v21, %v1825_v32 }
0x16fd   :  { %v1789_v34 = vadd.f32 %v2989_v8, %v1788_v31 }
0x16fe   :  { %v1827_v41 = vadd.f32 %v2991_v21, %v1826_v54 }
0x16ff   :  { %v1793_v33 = vsel %vm1792_vm9, %v2989_v8, %v1789_v34 }
0x1700   :  { %v1798_v12 = vsel %vm1795_vm10, %v1797_v17, %v1793_v33  ;;  %v1831_v51 = vsel %vm1830_vm3, %v2991_v21, %v1827_v41 }
0x1701   :  { %v1836_v1 = vsel %vm1833_vm12, %v1835_v3, %v1831_v51  ;;  %v1801_v10 = vmul.f32 %v1798_v12, %v4174_v57 }
0x1702   :  { %v1839_v0 = vmul.f32 %v1836_v1, %v4184_v59 }
0x1759   :  { %v1804_v44 = vpop.permute.xlu0 %1803 }
0x175a   :  { %v1806_v46 = vmul.f32 %v1804_v44, %v1798_v12 }
0x175c   :  { %1808 = vrot.lane.b32.xlu2 %v1806_v46, %s3150_s24 }
0x175f   :  { %v1842_v9 = vpop.permute.xlu1 %1841 }
0x1760   :  { %v1844_v52 = vmul.f32 %v1842_v9, %v1836_v1 }
0x1762   :  { %1846 = vrot.lane.b32.xlu0 %v1844_v52, %s3150_s24 }
0x17b6   :  { %v1809_v48 = vpop.permute.xlu2 %1808 }
0x17b7   :  { %v4177_v11 = vadd.f32 %v1809_v48, %v1801_v10 }
0x17b9   :  { %2992 = vtanh.f32 %v4177_v11 }
0x17bf   :  { %v2993_v55 = vpop.eup %2992 }
0x17c0   :  { %1814 = vrot.lane.b32.xlu1 %v2993_v55, %s3150_s24 }
0x17d4   :  { %v1847_v53 = vpop.permute.xlu0 %1846 }
0x17d5   :  { %v4187_v35 = vadd.f32 %v1847_v53, %v1839_v0 }
0x17d7   :  { %2994 = vtanh.f32 %v4187_v35 }
0x17dd   :  { %v2995_v2 = vpop.eup %2994 }
0x17de   :  { %1852 = vrot.lane.b32.xlu2 %v2995_v2, %s3150_s24 }
0x1832   :  { %v1815_v14 = vpop.permute.xlu1 %1814 }
0x1833   :  { %v1817_v6 = vmul.f32 %v1815_v14, %v1798_v12 }
0x1835   :  { %v4194_v8 = vsel %vm462_vm0, %v1817_v6, %v4035_v19  ;;  %v1554_v19 = vpop.f32.mrf.mxu0 }
0x1836   :  { %1860 = vrot.lane.b32.xlu0 %v4194_v8, %s3151_s0 }
0x1838   :  { %v1853_v40 = vpop.permute.xlu2 %1852 }
0x1839   :  { %v1855_v60 = vmul.f32 %v1853_v40, %v1836_v1 }
0x183b   :  { %v4201_v21 = vsel %vm463_vm1, %v1855_v60, %v4101_v27  ;;  %v1555_v27 = vadd.f32 %v1554_v19, %v4003_v49 }
0x183c   :  { %1864 = vrot.lane.b32.xlu1 %v4201_v21, %s3152_s26 }
0x18a8   :  { %v1861_v23 = vpop.permute.xlu0 %1860 }
0x18ae   :  { %v1865_v30 = vpop.permute.xlu1 %1864 }
0x18af   :  { %v1867_v31 = vsel %vm457_vm6, %v1861_v23, %v1865_v30 }
0x18b0   :  { %2798 = vmatmul.msk.f32.vlgmr.msrb.gmra.mxu1 %vm209_vm4, %v1867_v31  ;;  %2799 = vmatmul.msk.f32.vlgmr.msrb.gmra.mxu2 %vm209_vm4, %v1867_v31 }
0x18b1   :  { %2147 = vmatpush.msrb.mxu1 %v4043_v58  ;;  %2167 = vmatpush.msrb.mxu2 %v4045_v29 }
0x18b3   :  { %2148 = vmatpush.msrb.mxu1 %v4047_v42  ;;  %2168 = vmatpush.msrb.mxu2 %v4051_v28 }
0x18b5   :  { %2149 = vmatpush.msrb.mxu1 %v4053_v39  ;;  %2169 = vmatpush.msrb.mxu2 %v4055_v56 }
0x18b7   :  { %2150 = vmatpush.msrb.mxu1 %v4061_v43  ;;  %2170 = vmatpush.msrb.mxu2 %v4063_v13 }
0x18b9   :  { %2151 = vmatpush.msrb.mxu1 %v4069_v37  ;;  %2171 = vmatpush.msrb.mxu2 %v4071_v20 }
0x18bb   :  { %2152 = vmatpush.msrb.mxu1 %v4077_v26  ;;  %2172 = vmatpush.msrb.mxu2 %v4079_v16 }
0x18bd   :  { %2153 = vmatpush.msrb.mxu1 %v4085_v18  ;;  %2173 = vmatpush.msrb.mxu2 %v4087_v5 }
0x18bf   :  { %2154 = vmatpush.msrb.mxu1 %v4105_v45  ;;  %2174 = vmatpush.msrb.mxu2 %v4107_v22 }
0x192d   :  { %v1888_v32 = vpop.f32.mrf.mxu1 }
0x192e   :  { %v1912_v34 = vadd.f32 %v1888_v32, %v1555_v27 }
0x1930   :  { %2996 = vtanh.f32 %v1912_v34  ;;  %v2800_v41 = vmul.f32 -1.442695, %v1912_v34 }
0x1933   :  { %v1908_v7 = vpop.f32.mrf.mxu2 }
0x1934   :  { %v1914_v54 = vadd.f32 %v1908_v7, %v1605_v47  ;;  %v4235_v7 = vsel %vm462_vm0, %v4177_v11, %v4174_v57 }
0x1936   :  { %v2997_v33 = vpop.eup %2996  ;;  %2998 = vtanh.f32 %v1914_v54  ;;  %v2801_v38 = vmul.f32 -1.442695, %v1914_v54 }
0x1937   :  { %1937 = vrot.lane.b32.xlu2 %v2997_v33, %s3150_s24  ;;  %3000 = vpow2.f32 %v2800_v41  ;;  %v4245_v41 = vsel %vm463_vm1, %v4187_v35, %v4184_v59 }
0x193c   :  { %v2999_v17 = vpop.eup %2998 }
0x193d   :  { %1975 = vrot.lane.b32.xlu0 %v2999_v17, %s3150_s24  ;;  %v3001_v44 = vpop.eup %3000 }
0x193e   :  { %v1918_v12 = vadd.f32 1.0, %v3001_v44 }
0x1940   :  { %3002 = vrcp.f32 %v1918_v12  ;;  %v1930_v9 = vand.u32 2147483648, %v1918_v12  ;;  %vm1924_vm10 = vweird.f32 %v1918_v12  ;;  %v1928_v52 = vand.u32 2147483647, %v1918_v12 }
0x1941   :  { %3004 = vpow2.f32 %v2801_v38 }
0x1942   :  { %v1931_v55 = vor.u32 1.1754944e-38, %v1930_v9  ;;  %vm1929_vm7 = vcmp.eq.f32.partialorder %v1928_v52, 8.507059e+37 }
0x1946   :  { %v3003_v25 = vpop.eup %3002 }
0x1947   :  { %v1920_v46 = vmul.f32 %v3003_v25, %v1918_v12  ;;  %vm1925_vm9 = vweird.f32 %v3003_v25  ;;  %v3005_v1 = vpop.eup %3004 }
0x1948   :  { %vm1926_vm11 = vmor %vm1924_vm10, %vm1925_vm9  ;;  %v1956_v48 = vadd.f32 1.0, %v3005_v1 }
0x1949   :  { %v1921_v51 = vsub.f32 1.0, %v1920_v46 }
0x194a   :  { %3006 = vrcp.f32 %v1956_v48  ;;  %v1968_v30 = vand.u32 2147483648, %v1956_v48  ;;  %vm1962_vm12 = vweird.f32 %v1956_v48  ;;  %v1966_v31 = vand.u32 2147483647, %v1956_v48 }
0x194b   :  { %v1922_v36 = vmul.f32 %v3003_v25, %v1921_v51 }
0x194c   :  { %v1969_v27 = vor.u32 1.1754944e-38, %v1968_v30  ;;  %vm1967_vm14 = vcmp.eq.f32.partialorder %v1966_v31, 8.507059e+37 }
0x194d   :  { %v1923_v3 = vadd.f32 %v3003_v25, %v1922_v36 }
0x194f   :  { %v1927_v10 = vsel %vm1926_vm11, %v3003_v25, %v1923_v3 }
0x1950   :  { %v1932_v53 = vsel %vm1929_vm7, %v1931_v55, %v1927_v10  ;;  %v3007_v14 = vpop.eup %3006 }
0x1951   :  { %v1958_v6 = vmul.f32 %v3007_v14, %v1956_v48  ;;  %vm1963_vm3 = vweird.f32 %v3007_v14  ;;  %v1935_v54 = vmul.f32 %v1932_v53, %v4235_v7 }
0x1952   :  { %vm1964_vm13 = vmor %vm1962_vm12, %vm1963_vm3 }
0x1953   :  { %v1959_v40 = vsub.f32 1.0, %v1958_v6 }
0x1955   :  { %v1960_v60 = vmul.f32 %v3007_v14, %v1959_v40 }
0x1957   :  { %v1961_v23 = vadd.f32 %v3007_v14, %v1960_v60 }
0x1959   :  { %v1965_v19 = vsel %vm1964_vm13, %v3007_v14, %v1961_v23 }
0x195a   :  { %v1970_v34 = vsel %vm1967_vm14, %v1969_v27, %v1965_v19 }
0x195b   :  { %v1973_v44 = vmul.f32 %v1970_v34, %v4245_v41 }
0x1991   :  { %v1938_v0 = vpop.permute.xlu2 %1937 }
0x1992   :  { %v1940_v2 = vmul.f32 %v1938_v0, %v1932_v53 }
0x1994   :  { %1942 = vrot.lane.b32.xlu1 %v1940_v2, %s3150_s24 }
0x19af   :  { %v1976_v32 = vpop.permute.xlu0 %1975 }
0x19b0   :  { %v1978_v47 = vmul.f32 %v1976_v32, %v1970_v34 }
0x19b2   :  { %1980 = vrot.lane.b32.xlu2 %v1978_v47, %s3150_s24 }
0x1a06   :  { %v1943_v33 = vpop.permute.xlu1 %1942 }
0x1a07   :  { %v4238_v17 = vadd.f32 %v1943_v33, %v1935_v54 }
0x1a09   :  { %3008 = vtanh.f32 %v4238_v17 }
0x1a0c   :  { %v1981_v12 = vpop.permute.xlu2 %1980 }
0x1a0d   :  { %v4248_v25 = vadd.f32 %v1981_v12, %v1973_v44 }
0x1a0f   :  { %v3009_v57 = vpop.eup %3008  ;;  %3010 = vtanh.f32 %v4248_v25  ;;  %v4297_v33 = vsel %vm611_vm2, %v4248_v25, %v4245_v41 }
0x1a10   :  { %1948 = vrot.lane.b32.xlu0 %v3009_v57, %s3150_s24 }
0x1a15   :  { %v3011_v11 = vpop.eup %3010 }
0x1a16   :  { %1986 = vrot.lane.b32.xlu1 %v3011_v11, %s3150_s24 }
0x1a82   :  { %v1949_v46 = vpop.permute.xlu0 %1948 }
0x1a83   :  { %v1951_v38 = vmul.f32 %v1949_v46, %v1932_v53  ;;  %v4308_v46 = vsel %vm610_vm15, %v4238_v17, %v4235_v7 }
0x1a85   :  { %v4256_v59 = vsel %vm610_vm15, %v1951_v38, %v4194_v8 }
0x1a86   :  { %1994 = vrot.lane.b32.xlu2 %v4256_v59, %s3151_s0 }
0x1a88   :  { %v1987_v35 = vpop.permute.xlu1 %1986 }
0x1a89   :  { %v1989_v51 = vmul.f32 %v1987_v35, %v1970_v34 }
0x1a8b   :  { %v4263_v36 = vsel %vm611_vm2, %v1989_v51, %v4201_v21 }
0x1a8c   :  { %1998 = vrot.lane.b32.xlu0 %v4263_v36, %s3152_s26 }
0x1ae0   :  { %v1995_v3 = vpop.permute.xlu2 %1994 }
0x1afe   :  { %v1999_v9 = vpop.permute.xlu0 %1998 }
0x1aff   :  { %v2001_v1 = vsel %vm457_vm6, %v1995_v3, %v1999_v9 }
0x1b00   :  { %2802 = vmatmul.msk.f32.vlgmr.msra.gmra.mxu1 %vm209_vm4, %v2001_v1  ;;  %2803 = vmatmul.msk.f32.vlgmr.msra.gmra.mxu2 %vm209_vm4, %v2001_v1 }
0x1b01   :  { %2415 = vmatpush.msra.mxu1 %v4043_v58  ;;  %2435 = vmatpush.msra.mxu2 %v4045_v29  ;;  %v1557_v58 = vpop.f32.mrf.mxu0 }
0x1b02   :  { %v1558_v29 = vadd.f32 %v1557_v58, %v4003_v49 }
0x1b03   :  { %2416 = vmatpush.msra.mxu1 %v4047_v42  ;;  %2436 = vmatpush.msra.mxu2 %v4051_v28 }
0x1b05   :  { %2417 = vmatpush.msra.mxu1 %v4053_v39  ;;  %2437 = vmatpush.msra.mxu2 %v4055_v56  ;;  %v1602_v39 = vadd.f32 %v4017_v61, %v4024_v4 }
0x1b07   :  { %2418 = vmatpush.msra.mxu1 %v4061_v43  ;;  %2438 = vmatpush.msra.mxu2 %v4063_v13 }
0x1b09   :  { %2419 = vmatpush.msra.mxu1 %v4069_v37  ;;  %2439 = vmatpush.msra.mxu2 %v4071_v20 }
0x1b0b   :  { %2420 = vmatpush.msra.mxu1 %v4077_v26  ;;  %2440 = vmatpush.msra.mxu2 %v4079_v16 }
0x1b0d   :  { %2421 = vmatpush.msra.mxu1 %v4085_v18  ;;  %2441 = vmatpush.msra.mxu2 %v4087_v5 }
0x1b0f   :  { %2422 = vmatpush.msra.mxu1 %v4105_v45  ;;  %2442 = vmatpush.msra.mxu2 %v4107_v22 }
0x1b7d   :  { %v2022_v42 = vpop.f32.mrf.mxu1 }
0x1b7e   :  { %v2046_v28 = vadd.f32 %v2022_v42, %v1558_v29 }
0x1b80   :  { %3012 = vtanh.f32 %v2046_v28  ;;  %v2804_v18 = vmul.f32 -1.442695, %v2046_v28 }
0x1b83   :  { %v2042_v56 = vpop.f32.mrf.mxu2 }
0x1b84   :  { %v2048_v43 = vadd.f32 %v2042_v56, %v1602_v39 }
0x1b86   :  { %v3013_v13 = vpop.eup %3012  ;;  %3014 = vtanh.f32 %v2048_v43  ;;  %v2805_v20 = vmul.f32 -1.442695, %v2048_v43 }
0x1b87   :  { %2071 = vrot.lane.b32.xlu1 %v3013_v13, %s3150_s24 }
0x1b88   :  { %3016 = vpow2.f32 %v2805_v20 }
0x1b8c   :  { %v3015_v37 = vpop.eup %3014 }
0x1b8d   :  { %2109 = vrot.lane.b32.xlu2 %v3015_v37, %s3150_s24 }
0x1b8e   :  { %v3017_v26 = vpop.eup %3016 }
0x1b8f   :  { %v2090_v16 = vadd.f32 1.0, %v3017_v26 }
0x1b91   :  { %3018 = vrcp.f32 %v2090_v16  ;;  %v2102_v10 = vand.u32 2147483648, %v2090_v16  ;;  %vm2096_vm10 = vweird.f32 %v2090_v16  ;;  %v2100_v48 = vand.u32 2147483647, %v2090_v16 }
0x1b92   :  { %3020 = vpow2.f32 %v2804_v18 }
0x1b93   :  { %v2103_v53 = vor.u32 1.1754944e-38, %v2102_v10  ;;  %vm2101_vm7 = vcmp.eq.f32.partialorder %v2100_v48, 8.507059e+37 }
0x1b97   :  { %v3019_v5 = vpop.eup %3018 }
0x1b98   :  { %v2092_v45 = vmul.f32 %v3019_v5, %v2090_v16  ;;  %v3021_v22 = vpop.eup %3020  ;;  %vm2097_vm9 = vweird.f32 %v3019_v5 }
0x1b99   :  { %v2052_v8 = vadd.f32 1.0, %v3021_v22  ;;  %vm2098_vm11 = vmor %vm2096_vm10, %vm2097_vm9 }
0x1b9a   :  { %v2093_v61 = vsub.f32 1.0, %v2092_v45 }
0x1b9b   :  { %3022 = vrcp.f32 %v2052_v8  ;;  %v2064_v31 = vand.u32 2147483648, %v2052_v8  ;;  %vm2058_vm12 = vweird.f32 %v2052_v8  ;;  %v2062_v19 = vand.u32 2147483647, %v2052_v8 }
0x1b9c   :  { %v2094_v21 = vmul.f32 %v3019_v5, %v2093_v61 }
0x1b9d   :  { %v2065_v32 = vor.u32 1.1754944e-38, %v2064_v31  ;;  %vm2063_vm14 = vcmp.eq.f32.partialorder %v2062_v19, 8.507059e+37 }
0x1b9e   :  { %v2095_v52 = vadd.f32 %v3019_v5, %v2094_v21 }
0x1ba0   :  { %v2099_v0 = vsel %vm2098_vm11, %v3019_v5, %v2095_v52 }
0x1ba1   :  { %v3023_v55 = vpop.eup %3022  ;;  %v2104_v6 = vsel %vm2101_vm7, %v2103_v53, %v2099_v0 }
0x1ba2   :  { %v2054_v2 = vmul.f32 %v3023_v55, %v2052_v8  ;;  %vm2059_vm3 = vweird.f32 %v3023_v55  ;;  %v2107_v44 = vmul.f32 %v2104_v6, %v4297_v33 }
0x1ba3   :  { %vm2060_vm13 = vmor %vm2058_vm12, %vm2059_vm3 }
0x1ba4   :  { %v2055_v60 = vsub.f32 1.0, %v2054_v2 }
0x1ba6   :  { %v2056_v23 = vmul.f32 %v3023_v55, %v2055_v60 }
0x1ba8   :  { %v2057_v30 = vadd.f32 %v3023_v55, %v2056_v23 }
0x1baa   :  { %v2061_v27 = vsel %vm2060_vm13, %v3023_v55, %v2057_v30 }
0x1bab   :  { %v2066_v47 = vsel %vm2063_vm14, %v2065_v32, %v2061_v27 }
0x1bac   :  { %v2069_v38 = vmul.f32 %v2066_v47, %v4308_v46 }
0x1be7   :  { %v2110_v14 = vpop.permute.xlu2 %2109 }
0x1be8   :  { %v2112_v40 = vmul.f32 %v2110_v14, %v2104_v6 }
0x1bea   :  { %2114 = vrot.lane.b32.xlu1 %v2112_v40, %s3150_s24 }
0x1bf9   :  { %v2072_v34 = vpop.permute.xlu1 %2071 }
0x1bfa   :  { %v2074_v54 = vmul.f32 %v2072_v34, %v2066_v47 }
0x1bfc   :  { %2076 = vrot.lane.b32.xlu0 %v2074_v54, %s3150_s24 }
0x1c5c   :  { %v2115_v12 = vpop.permute.xlu1 %2114 }
0x1c5d   :  { %v4300_v57 = vadd.f32 %v2115_v12, %v2107_v44 }
0x1c5f   :  { %3024 = vtanh.f32 %v4300_v57 }
0x1c65   :  { %v3025_v11 = vpop.eup %3024 }
0x1c66   :  { %2120 = vrot.lane.b32.xlu0 %v3025_v11, %s3150_s24 }
0x1c6e   :  { %v2077_v41 = vpop.permute.xlu0 %2076 }
0x1c6f   :  { %v4311_v25 = vadd.f32 %v2077_v41, %v2069_v38 }
0x1c71   :  { %3026 = vtanh.f32 %v4311_v25  ;;  %v4343_v44 = vsel %vm758_vm5, %v4311_v25, %v4308_v46 }
0x1c77   :  { %v3027_v35 = vpop.eup %3026 }
0x1c78   :  { %2082 = vrot.lane.b32.xlu2 %v3027_v35, %s3150_s24  ;;  %v4354_v35 = vsel %vm759_vm8, %v4300_v57, %v4297_v33 }
0x1cd2   :  { %v2083_v51 = vpop.permute.xlu2 %2082 }
0x1cd3   :  { %v2085_v3 = vmul.f32 %v2083_v51, %v2066_v47 }
0x1cd5   :  { %v4318_v9 = vsel %vm758_vm5, %v2085_v3, %v4256_v59  ;;  %v1560_v59 = vpop.f32.mrf.mxu0 }
0x1cd6   :  { %2128 = vrot.lane.b32.xlu1 %v4318_v9, %s3151_s0  ;;  %v1561_v28 = vadd.f32 %v1560_v59, %v4003_v49 }
0x1cd8   :  { %v2121_v7 = vpop.permute.xlu0 %2120 }
0x1cd9   :  { %v2123_v17 = vmul.f32 %v2121_v7, %v2104_v6 }
0x1cdb   :  { %v4325_v1 = vsel %vm759_vm8, %v2123_v17, %v4263_v36  ;;  %v1599_v36 = vadd.f32 %v4015_v63, %v4024_v4 }
0x1cdc   :  { %2132 = vrot.lane.b32.xlu2 %v4325_v1, %s3152_s26 }
0x1d36   :  { %v2133_v58 = vpop.permute.xlu2 %2132 }
0x1d48   :  { %v2129_v29 = vpop.permute.xlu1 %2128 }
0x1d49   :  { %v2135_v42 = vsel %vm457_vm6, %v2129_v29, %v2133_v58 }
0x1d4a   :  { %2806 = vmatmul.msk.f32.vlgmr.msrb.gmra.mxu1 %vm209_vm4, %v2135_v42  ;;  %2807 = vmatmul.msk.f32.vlgmr.msrb.gmra.mxu2 %vm209_vm4, %v2135_v42 }
0x1dc7   :  { %v2156_v39 = vpop.f32.mrf.mxu1 }
0x1dc8   :  { %v2180_v56 = vadd.f32 %v2156_v39, %v1561_v28 }
0x1dca   :  { %3028 = vtanh.f32 %v2180_v56  ;;  %v2808_v26 = vmul.f32 -1.442695, %v2180_v56 }
0x1dcd   :  { %v2176_v43 = vpop.f32.mrf.mxu2 }
0x1dce   :  { %v2182_v13 = vadd.f32 %v2176_v43, %v1599_v36 }
0x1dd0   :  { %v3029_v37 = vpop.eup %3028  ;;  %3030 = vtanh.f32 %v2182_v13  ;;  %v2809_v16 = vmul.f32 -1.442695, %v2182_v13  ;;  %v1596_v13 = vadd.f32 %v4013_v24, %v4024_v4 }
0x1dd1   :  { %2205 = vrot.lane.b32.xlu0 %v3029_v37, %s3150_s24  ;;  %3032 = vpow2.f32 %v2808_v26 }
0x1dd2   :  { %3034 = vpow2.f32 %v2809_v16 }
0x1dd6   :  { %v3031_v20 = vpop.eup %3030 }
0x1dd7   :  { %2243 = vrot.lane.b32.xlu1 %v3031_v20, %s3150_s24  ;;  %v3033_v18 = vpop.eup %3032 }
0x1dd8   :  { %v2186_v5 = vadd.f32 1.0, %v3033_v18  ;;  %v3035_v45 = vpop.eup %3034 }
0x1dd9   :  { %v2224_v22 = vadd.f32 1.0, %v3035_v45 }
0x1dda   :  { %3036 = vrcp.f32 %v2186_v5  ;;  %v2198_v0 = vand.u32 2147483648, %v2186_v5  ;;  %vm2192_vm10 = vweird.f32 %v2186_v5  ;;  %v2196_v53 = vand.u32 2147483647, %v2186_v5 }
0x1ddb   :  { %3038 = vrcp.f32 %v2224_v22  ;;  %v2236_v30 = vand.u32 2147483648, %v2224_v22  ;;  %vm2230_vm12 = vweird.f32 %v2224_v22  ;;  %v2234_v19 = vand.u32 2147483647, %v2224_v22 }
0x1ddc   :  { %v2199_v6 = vor.u32 1.1754944e-38, %v2198_v0  ;;  %vm2197_vm7 = vcmp.eq.f32.partialorder %v2196_v53, 8.507059e+37 }
0x1ddd   :  { %v2237_v32 = vor.u32 1.1754944e-38, %v2236_v30  ;;  %vm2235_vm14 = vcmp.eq.f32.partialorder %v2234_v19, 8.507059e+37 }
0x1de0   :  { %v3037_v61 = vpop.eup %3036 }
0x1de1   :  { %v2188_v63 = vmul.f32 %v3037_v61, %v2186_v5  ;;  %v3039_v8 = vpop.eup %3038  ;;  %vm2193_vm9 = vweird.f32 %v3037_v61 }
0x1de2   :  { %v2226_v52 = vmul.f32 %v3039_v8, %v2224_v22  ;;  %vm2194_vm11 = vmor %vm2192_vm10, %vm2193_vm9  ;;  %vm2231_vm3 = vweird.f32 %v3039_v8 }
0x1de3   :  { %v2189_v21 = vsub.f32 1.0, %v2188_v63  ;;  %vm2232_vm13 = vmor %vm2230_vm12, %vm2231_vm3 }
0x1de4   :  { %v2227_v48 = vsub.f32 1.0, %v2226_v52 }
0x1de5   :  { %v2190_v10 = vmul.f32 %v3037_v61, %v2189_v21 }
0x1de6   :  { %v2228_v2 = vmul.f32 %v3039_v8, %v2227_v48 }
0x1de7   :  { %v2191_v55 = vadd.f32 %v3037_v61, %v2190_v10 }
0x1de8   :  { %v2229_v40 = vadd.f32 %v3039_v8, %v2228_v2 }
0x1de9   :  { %v2195_v14 = vsel %vm2194_vm11, %v3037_v61, %v2191_v55 }
0x1dea   :  { %v2200_v23 = vsel %vm2197_vm7, %v2199_v6, %v2195_v14  ;;  %v2233_v27 = vsel %vm2232_vm13, %v3039_v8, %v2229_v40 }
0x1deb   :  { %v2238_v47 = vsel %vm2235_vm14, %v2237_v32, %v2233_v27  ;;  %v2203_v12 = vmul.f32 %v2200_v23, %v4343_v44 }
0x1dec   :  { %v2241_v51 = vmul.f32 %v2238_v47, %v4354_v35 }
0x1e43   :  { %v2206_v60 = vpop.permute.xlu0 %2205 }
0x1e44   :  { %v2208_v31 = vmul.f32 %v2206_v60, %v2200_v23 }
0x1e46   :  { %2210 = vrot.lane.b32.xlu2 %v2208_v31, %s3150_s24 }
0x1e49   :  { %v2244_v34 = vpop.permute.xlu1 %2243 }
0x1e4a   :  { %v2246_v54 = vmul.f32 %v2244_v34, %v2238_v47 }
0x1e4c   :  { %2248 = vrot.lane.b32.xlu0 %v2246_v54, %s3150_s24 }
0x1ea0   :  { %v2211_v11 = vpop.permute.xlu2 %2210 }
0x1ea1   :  { %v4346_v38 = vadd.f32 %v2211_v11, %v2203_v12 }
0x1ea3   :  { %3040 = vtanh.f32 %v4346_v38  ;;  %v4393_v11 = vsel %vm759_vm8, %v4346_v38, %v4343_v44 }
0x1ea9   :  { %v3041_v41 = vpop.eup %3040 }
0x1eaa   :  { %2216 = vrot.lane.b32.xlu1 %v3041_v41, %s3150_s24 }
0x1ebe   :  { %v2249_v46 = vpop.permute.xlu0 %2248 }
0x1ebf   :  { %v4357_v25 = vadd.f32 %v2249_v46, %v2241_v51 }
0x1ec1   :  { %3042 = vtanh.f32 %v4357_v25 }
0x1ec7   :  { %v3043_v3 = vpop.eup %3042 }
0x1ec8   :  { %2254 = vrot.lane.b32.xlu2 %v3043_v3, %s3150_s24  ;;  %v4403_v3 = vsel %vm758_vm5, %v4357_v25, %v4354_v35 }
0x1f1c   :  { %v2217_v7 = vpop.permute.xlu1 %2216 }
0x1f1d   :  { %v2219_v17 = vmul.f32 %v2217_v7, %v2200_v23 }
0x1f1f   :  { %v4364_v58 = vsel %vm759_vm8, %v2219_v17, %v4318_v9  ;;  %v1563_v9 = vpop.f32.mrf.mxu0 }
0x1f20   :  { %2262 = vrot.lane.b32.xlu0 %v4364_v58, %s3151_s0  ;;  %v1564_v36 = vadd.f32 %v1563_v9, %v4003_v49 }
0x1f22   :  { %v2255_v33 = vpop.permute.xlu2 %2254 }
0x1f23   :  { %v2257_v57 = vmul.f32 %v2255_v33, %v2238_v47 }
0x1f25   :  { %v4371_v29 = vsel %vm758_vm5, %v2257_v57, %v4325_v1 }
0x1f26   :  { %2266 = vrot.lane.b32.xlu1 %v4371_v29, %s3152_s26 }
0x1f27   :  { %v4378_v39 = vpop.f32.mrf.mxu0 }
0x1f2f   :  { %v4380_v56 = vpop.f32.mrf.mxu0 }
0x1f92   :  { %v2263_v42 = vpop.permute.xlu0 %2262 }
0x1f98   :  { %v2267_v59 = vpop.permute.xlu1 %2266 }
0x1f99   :  { %v2269_v28 = vsel %vm457_vm6, %v2263_v42, %v2267_v59 }
0x1f9a   :  { %2810 = vmatmul.msk.f32.vlgmr.msra.gmra.mxu0 %vm209_vm4, %v2269_v28  ;;  %2811 = vmatmul.msk.f32.vlgmr.msrb.gmra.mxu3 %vm209_vm4, %v2269_v28 }
0x2017   :  { %v2290_v1 = vpop.f32.mrf.mxu0 }
0x2018   :  { %v2314_v43 = vadd.f32 %v2290_v1, %v1564_v36 }
0x201a   :  { %3044 = vtanh.f32 %v2314_v43  ;;  %v2812_v18 = vmul.f32 -1.442695, %v2314_v43 }
0x201d   :  { %v2310_v37 = vpop.f32.mrf.mxu3 }
0x201e   :  { %v2316_v20 = vadd.f32 %v2310_v37, %v1596_v13 }
0x2020   :  { %v3045_v26 = vpop.eup %3044  ;;  %3046 = vtanh.f32 %v2316_v20  ;;  %v2813_v63 = vmul.f32 -1.442695, %v2316_v20 }
0x2021   :  { %2339 = vrot.lane.b32.xlu2 %v3045_v26, %s3150_s24  ;;  %3048 = vpow2.f32 %v2812_v18 }
0x2026   :  { %v3047_v16 = vpop.eup %3046 }
0x2027   :  { %2377 = vrot.lane.b32.xlu0 %v3047_v16, %s3150_s24  ;;  %v3049_v5 = vpop.eup %3048 }
0x2028   :  { %v2320_v45 = vadd.f32 1.0, %v3049_v5 }
0x202a   :  { %3050 = vrcp.f32 %v2320_v45  ;;  %v2332_v52 = vand.u32 2147483648, %v2320_v45  ;;  %vm2326_vm10 = vweird.f32 %v2320_v45  ;;  %v2330_v48 = vand.u32 2147483647, %v2320_v45 }
0x202b   :  { %3052 = vpow2.f32 %v2813_v63 }
0x202c   :  { %v2333_v53 = vor.u32 1.1754944e-38, %v2332_v52  ;;  %vm2331_vm7 = vcmp.eq.f32.partialorder %v2330_v48, 8.507059e+37 }
0x2030   :  { %v3051_v22 = vpop.eup %3050 }
0x2031   :  { %v2322_v61 = vmul.f32 %v3051_v22, %v2320_v45  ;;  %vm2327_vm9 = vweird.f32 %v3051_v22  ;;  %v3053_v10 = vpop.eup %3052 }
0x2032   :  { %vm2328_vm11 = vmor %vm2326_vm10, %vm2327_vm9  ;;  %v2358_v0 = vadd.f32 1.0, %v3053_v10 }
0x2033   :  { %v2323_v8 = vsub.f32 1.0, %v2322_v61 }
0x2034   :  { %3054 = vrcp.f32 %v2358_v0  ;;  %v2370_v19 = vand.u32 2147483648, %v2358_v0  ;;  %vm2364_vm12 = vweird.f32 %v2358_v0  ;;  %v2368_v27 = vand.u32 2147483647, %v2358_v0 }
0x2035   :  { %v2324_v24 = vmul.f32 %v3051_v22, %v2323_v8 }
0x2036   :  { %v2371_v34 = vor.u32 1.1754944e-38, %v2370_v19  ;;  %vm2369_vm14 = vcmp.eq.f32.partialorder %v2368_v27, 8.507059e+37 }
0x2037   :  { %v2325_v21 = vadd.f32 %v3051_v22, %v2324_v24 }
0x2039   :  { %v2329_v55 = vsel %vm2328_vm11, %v3051_v22, %v2325_v21 }
0x203a   :  { %v2334_v14 = vsel %vm2331_vm7, %v2333_v53, %v2329_v55  ;;  %v3055_v40 = vpop.eup %3054 }
0x203b   :  { %v2360_v60 = vmul.f32 %v3055_v40, %v2358_v0  ;;  %vm2365_vm3 = vweird.f32 %v3055_v40  ;;  %v2337_v41 = vmul.f32 %v2334_v14, %v4393_v11 }
0x203c   :  { %vm2366_vm13 = vmor %vm2364_vm12, %vm2365_vm3 }
0x203d   :  { %v2361_v23 = vsub.f32 1.0, %v2360_v60 }
0x203f   :  { %v2362_v30 = vmul.f32 %v3055_v40, %v2361_v23 }
0x2041   :  { %v2363_v31 = vadd.f32 %v3055_v40, %v2362_v30 }
0x2043   :  { %v2367_v32 = vsel %vm2366_vm13, %v3055_v40, %v2363_v31 }
0x2044   :  { %v2372_v54 = vsel %vm2369_vm14, %v2371_v34, %v2367_v32 }
0x2045   :  { %v2375_v7 = vmul.f32 %v2372_v54, %v4403_v3 }
0x207b   :  { %v2340_v2 = vpop.permute.xlu2 %2339 }
0x207c   :  { %v2342_v6 = vmul.f32 %v2340_v2, %v2334_v14 }
0x207e   :  { %2344 = vrot.lane.b32.xlu1 %v2342_v6, %s3150_s24 }
0x2099   :  { %v2378_v47 = vpop.permute.xlu0 %2377 }
0x209a   :  { %v2380_v12 = vmul.f32 %v2378_v47, %v2372_v54 }
0x209c   :  { %2382 = vrot.lane.b32.xlu2 %v2380_v12, %s3150_s24 }
0x20f0   :  { %v2345_v51 = vpop.permute.xlu1 %2344 }
0x20f1   :  { %v4396_v46 = vadd.f32 %v2345_v51, %v2337_v41 }
0x20f3   :  { %3056 = vtanh.f32 %v4396_v46 }
0x20f6   :  { %v2383_v17 = vpop.permute.xlu2 %2382 }
0x20f7   :  { %v4406_v33 = vadd.f32 %v2383_v17, %v2375_v7  ;;  %v4451_v17 = vsel %vm611_vm2, %v4396_v46, %v4393_v11 }
0x20f9   :  { %v3057_v44 = vpop.eup %3056  ;;  %3058 = vtanh.f32 %v4406_v33 }
0x20fa   :  { %2350 = vrot.lane.b32.xlu0 %v3057_v44, %s3150_s24 }
0x20ff   :  { %v3059_v38 = vpop.eup %3058 }
0x2100   :  { %2388 = vrot.lane.b32.xlu1 %v3059_v38, %s3150_s24 }
0x216c   :  { %v2351_v57 = vpop.permute.xlu0 %2350 }
0x216d   :  { %v2353_v42 = vmul.f32 %v2351_v57, %v2334_v14 }
0x216f   :  { %v4414_v35 = vsel %vm611_vm2, %v2353_v42, %v4364_v58  ;;  %v1567_v58 = vadd.f32 %v4378_v39, %v4003_v49 }
0x2170   :  { %2396 = vrot.lane.b32.xlu2 %v4414_v35, %s3151_s0 }
0x2172   :  { %v2389_v25 = vpop.permute.xlu1 %2388 }
0x2173   :  { %v2391_v59 = vmul.f32 %v2389_v25, %v2372_v54  ;;  %v4440_v54 = vsel %vm610_vm15, %v4406_v33, %v4403_v3 }
0x2175   :  { %v4421_v28 = vsel %vm610_vm15, %v2391_v59, %v4371_v29  ;;  %v1593_v29 = vadd.f32 %v4011_v15, %v4024_v4 }
0x2176   :  { %2400 = vrot.lane.b32.xlu0 %v4421_v28, %s3152_s26 }
0x21ca   :  { %v2397_v9 = vpop.permute.xlu2 %2396 }
0x21e8   :  { %v2401_v36 = vpop.permute.xlu0 %2400 }
0x21e9   :  { %v2403_v1 = vsel %vm457_vm6, %v2397_v9, %v2401_v36 }
0x21ea   :  { %2814 = vmatmul.msk.f32.vlgmr.msra.gmra.mxu1 %vm209_vm4, %v2403_v1  ;;  %2815 = vmatmul.msk.f32.vlgmr.msra.gmra.mxu2 %vm209_vm4, %v2403_v1 }
0x2267   :  { %v2424_v43 = vpop.f32.mrf.mxu1 }
0x2268   :  { %v2448_v13 = vadd.f32 %v2424_v43, %v1567_v58 }
0x226a   :  { %3060 = vtanh.f32 %v2448_v13  ;;  %v2816_v39 = vmul.f32 -1.442695, %v2448_v13 }
0x226d   :  { %v2444_v37 = vpop.f32.mrf.mxu2 }
0x226e   :  { %v2450_v20 = vadd.f32 %v2444_v37, %v1593_v29 }
0x2270   :  { %v3061_v26 = vpop.eup %3060  ;;  %3062 = vtanh.f32 %v2450_v20  ;;  %v2817_v18 = vmul.f32 -1.442695, %v2450_v20 }
0x2271   :  { %2473 = vrot.lane.b32.xlu1 %v3061_v26, %s3150_s24 }
0x2272   :  { %3064 = vpow2.f32 %v2817_v18 }
0x2276   :  { %v3063_v16 = vpop.eup %3062 }
0x2277   :  { %2511 = vrot.lane.b32.xlu2 %v3063_v16, %s3150_s24 }
0x2278   :  { %v3065_v5 = vpop.eup %3064 }
0x2279   :  { %v2492_v45 = vadd.f32 1.0, %v3065_v5 }
0x227b   :  { %3066 = vrcp.f32 %v2492_v45  ;;  %v2504_v52 = vand.u32 2147483648, %v2492_v45  ;;  %vm2498_vm8 = vweird.f32 %v2492_v45  ;;  %v2502_v10 = vand.u32 2147483647, %v2492_v45 }
0x227c   :  { %3068 = vpow2.f32 %v2816_v39 }
0x227d   :  { %v2505_v0 = vor.u32 1.1754944e-38, %v2504_v52  ;;  %vm2503_vm10 = vcmp.eq.f32.partialorder %v2502_v10, 8.507059e+37 }
0x2281   :  { %v3067_v22 = vpop.eup %3066 }
0x2282   :  { %v2494_v61 = vmul.f32 %v3067_v22, %v2492_v45  ;;  %v3069_v63 = vpop.eup %3068  ;;  %vm2499_vm5 = vweird.f32 %v3067_v22 }
0x2283   :  { %v2454_v8 = vadd.f32 1.0, %v3069_v63  ;;  %vm2500_vm9 = vmor %vm2498_vm8, %vm2499_vm5 }
0x2284   :  { %v2495_v15 = vsub.f32 1.0, %v2494_v61 }
0x2285   :  { %3070 = vrcp.f32 %v2454_v8  ;;  %v2466_v30 = vand.u32 2147483648, %v2454_v8  ;;  %vm2460_vm7 = vweird.f32 %v2454_v8  ;;  %v2464_v31 = vand.u32 2147483647, %v2454_v8 }
0x2286   :  { %v2496_v24 = vmul.f32 %v3067_v22, %v2495_v15 }
0x2287   :  { %v2467_v27 = vor.u32 1.1754944e-38, %v2466_v30  ;;  %vm2465_vm12 = vcmp.eq.f32.partialorder %v2464_v31, 8.507059e+37 }
0x2288   :  { %v2497_v21 = vadd.f32 %v3067_v22, %v2496_v24 }
0x228a   :  { %v2501_v55 = vsel %vm2500_vm9, %v3067_v22, %v2497_v21 }
0x228b   :  { %v3071_v48 = vpop.eup %3070  ;;  %v2506_v14 = vsel %vm2503_vm10, %v2505_v0, %v2501_v55 }
0x228c   :  { %v2456_v53 = vmul.f32 %v3071_v48, %v2454_v8  ;;  %vm2461_vm11 = vweird.f32 %v3071_v48  ;;  %v2509_v12 = vmul.f32 %v2506_v14, %v4440_v54 }
0x228d   :  { %vm2462_vm3 = vmor %vm2460_vm7, %vm2461_vm11  ;;  %vm2705_vm11 = vcmask 15360  }
0x228e   :  { %v2457_v40 = vsub.f32 1.0, %v2456_v53 }
0x2290   :  { %v2458_v60 = vmul.f32 %v3071_v48, %v2457_v40 }
0x2292   :  { %v2459_v23 = vadd.f32 %v3071_v48, %v2458_v60 }
0x2294   :  { %v2463_v19 = vsel %vm2462_vm3, %v3071_v48, %v2459_v23 }
0x2295   :  { %v2468_v34 = vsel %vm2465_vm12, %v2467_v27, %v2463_v19 }
0x2296   :  { %v2471_v44 = vmul.f32 %v2468_v34, %v4451_v17 }
0x22d1   :  { %v2512_v2 = vpop.permute.xlu2 %2511 }
0x22d2   :  { %v2514_v6 = vmul.f32 %v2512_v2, %v2506_v14 }
0x22d4   :  { %2516 = vrot.lane.b32.xlu1 %v2514_v6, %s3150_s24 }
0x22e3   :  { %v2474_v32 = vpop.permute.xlu1 %2473 }
0x22e4   :  { %v2476_v47 = vmul.f32 %v2474_v32, %v2468_v34 }
0x22e6   :  { %2478 = vrot.lane.b32.xlu0 %v2476_v47, %s3150_s24 }
0x2346   :  { %v2517_v41 = vpop.permute.xlu1 %2516 }
0x2347   :  { %v4443_v51 = vadd.f32 %v2517_v41, %v2509_v12 }
0x2349   :  { %3072 = vtanh.f32 %v4443_v51  ;;  %v2526_v47 = vsel %vm462_vm0, %v4443_v51, %v4440_v54  ;;  %v2675_v54 = vld [vmem:[%s4542_s9 + $0x28] sm:$0xff]  ;;  %v2674_v51 = vld [vmem:[%s4542_s9 + $0x20] sm:$0xff] }
0x234f   :  { %v3073_v7 = vpop.eup %3072 }
0x2350   :  { %2522 = vrot.lane.b32.xlu0 %v3073_v7, %s3150_s24 }
0x2358   :  { %v2479_v3 = vpop.permute.xlu0 %2478 }
0x2359   :  { %v4454_v33 = vadd.f32 %v2479_v3, %v2471_v44  ;;  %v2676_v3 = vld [vmem:[%s4542_s9 + $0x30] sm:$0xff] }
0x235b   :  { %3074 = vtanh.f32 %v4454_v33  ;;  %v2488_v31 = vsel %vm463_vm1, %v4454_v33, %v4451_v17  ;;  %v2677_v17 = vld [vmem:[%s4542_s9 + $0x38] sm:$0xff] }
0x235c   :  { %2693 = vmatpush.msrb.mxu1 %v2677_v17 }
0x235e   :  { %2694 = vmatpush.msrb.mxu1 %v2676_v3 }
0x2360   :  { %2695 = vmatpush.msrb.mxu1 %v2675_v54 }
0x2361   :  { %v3075_v38 = vpop.eup %3074 }
0x2362   :  { %2484 = vrot.lane.b32.xlu2 %v3075_v38, %s3150_s24  ;;  %2696 = vmatpush.msrb.mxu1 %v2674_v51 }
0x23bc   :  { %v2485_v57 = vpop.permute.xlu2 %2484 }
0x23bd   :  { %v2487_v42 = vmul.f32 %v2485_v57, %v2468_v34 }
0x23bf   :  { %v4461_v25 = vsel %vm463_vm1, %v2487_v42, %v4414_v35  ;;  %v1570_v35 = vadd.f32 %v4380_v56, %v4003_v49  ;;  %vm4561_vm1 = vcmp.gt.s32.totalorder %v3358_v62, 0 }
0x23c0   :  { %2530 = vrot.lane.b32.xlu1 %v4461_v25, %s3151_s0 }
0x23c2   :  { %v2523_v11 = vpop.permute.xlu0 %2522 }
0x23c3   :  { %v2525_v46 = vmul.f32 %v2523_v11, %v2506_v14 }
0x23c5   :  { %v4468_v59 = vsel %vm462_vm0, %v2525_v46, %v4421_v28  ;;  %v1590_v28 = vadd.f32 %v4009_v50, %v4024_v4  ;;  %vm4560_vm0 = vcmp.gt.s32.totalorder %v3358_v62, 7  ;;  %v2670_v62 = vld [vmem:[%s4542_s9] sm:$0xff] }
0x23c6   :  { %2534 = vrot.lane.b32.xlu2 %v4468_v59, %s3152_s26 }
0x2420   :  { %v2535_v9 = vpop.permute.xlu2 %2534 }
0x2432   :  { %v2531_v36 = vpop.permute.xlu1 %2530 }
0x2433   :  { %v2537_v1 = vsel %vm457_vm6, %v2531_v36, %v2535_v9  ;;  %v2673_v9 = vld [vmem:[%s4542_s9 + $0x18] sm:$0xff]  ;;  %v2672_v36 = vld [vmem:[%s4542_s9 + $0x10] sm:$0xff] }
0x2434   :  { %2818 = vmatmul.msk.f32.vlgmr.msrb.gmra.mxu0 %vm209_vm4, %v2537_v1  ;;  %2819 = vmatmul.msk.f32.vlgmr.msra.gmra.mxu3 %vm209_vm4, %v2537_v1 }
0x2435   :  { %2697 = vmatpush.msrb.mxu1 %v2673_v9 }
0x2437   :  { %2698 = vmatpush.msrb.mxu1 %v2672_v36 }
0x24b1   :  { %v2558_v58 = vpop.f32.mrf.mxu0 }
0x24b2   :  { %v2582_v43 = vadd.f32 %v2558_v58, %v1570_v35  ;;  %v2835_v58 = vld [vmem:[%s4543_s10] ss:$0 sm:$0xff] }
0x24b4   :  { %3076 = vtanh.f32 %v2582_v43  ;;  %v2820_v26 = vmul.f32 -1.442695, %v2582_v43 }
0x24b7   :  { %v2578_v13 = vpop.f32.mrf.mxu3 }
0x24b8   :  { %v2584_v29 = vadd.f32 %v2578_v13, %v1590_v28 }
0x24ba   :  { %v3077_v37 = vpop.eup %3076  ;;  %3078 = vtanh.f32 %v2584_v29  ;;  %v2821_v16 = vmul.f32 -1.442695, %v2584_v29 }
0x24bb   :  { %2607 = vrot.lane.b32.xlu0 %v3077_v37, %s3150_s24  ;;  %3080 = vpow2.f32 %v2820_v26 }
0x24bc   :  { %3082 = vpow2.f32 %v2821_v16 }
0x24c0   :  { %v3079_v20 = vpop.eup %3078 }
0x24c1   :  { %2644 = vrot.lane.b32.xlu1 %v3079_v20, %s3150_s24  ;;  %v3081_v18 = vpop.eup %3080 }
0x24c2   :  { %v2588_v49 = vadd.f32 1.0, %v3081_v18  ;;  %v3083_v56 = vpop.eup %3082 }
0x24c3   :  { %v2625_v5 = vadd.f32 1.0, %v3083_v56 }
0x24c4   :  { %3084 = vrcp.f32 %v2588_v49  ;;  %v2600_v8 = vand.u32 2147483648, %v2588_v49  ;;  %vm2594_vm2 = vweird.f32 %v2588_v49  ;;  %v2598_v24 = vand.u32 2147483647, %v2588_v49 }
0x24c5   :  { %3086 = vrcp.f32 %v2625_v5  ;;  %v2637_v53 = vand.u32 2147483648, %v2625_v5  ;;  %vm2631_vm8 = vweird.f32 %v2625_v5  ;;  %v2635_v14 = vand.u32 2147483647, %v2625_v5 }
0x24c6   :  { %v2601_v10 = vor.u32 1.1754944e-38, %v2600_v8  ;;  %vm2599_vm14 = vcmp.eq.f32.partialorder %v2598_v24, 8.507059e+37 }
0x24c7   :  { %v2638_v40 = vor.u32 1.1754944e-38, %v2637_v53  ;;  %vm2636_vm10 = vcmp.eq.f32.partialorder %v2635_v14, 8.507059e+37 }
0x24ca   :  { %v3085_v45 = vpop.eup %3084 }
0x24cb   :  { %v2590_v50 = vmul.f32 %v3085_v45, %v2588_v49  ;;  %v3087_v4 = vpop.eup %3086  ;;  %vm2595_vm15 = vweird.f32 %v3085_v45 }
0x24cc   :  { %v2627_v22 = vmul.f32 %v3087_v4, %v2625_v5  ;;  %vm2596_vm13 = vmor %vm2594_vm2, %vm2595_vm15  ;;  %vm2632_vm5 = vweird.f32 %v3087_v4 }
0x24cd   :  { %v2591_v39 = vsub.f32 1.0, %v2590_v50  ;;  %vm2633_vm9 = vmor %vm2631_vm8, %vm2632_vm5 }
0x24ce   :  { %v2628_v63 = vsub.f32 1.0, %v2627_v22 }
0x24cf   :  { %v2592_v61 = vmul.f32 %v3085_v45, %v2591_v39 }
0x24d0   :  { %v2629_v21 = vmul.f32 %v3087_v4, %v2628_v63 }
0x24d1   :  { %v2593_v15 = vadd.f32 %v3085_v45, %v2592_v61 }
0x24d2   :  { %v2630_v48 = vadd.f32 %v3087_v4, %v2629_v21 }
0x24d3   :  { %v2597_v52 = vsel %vm2596_vm13, %v3085_v45, %v2593_v15 }
0x24d4   :  { %v2602_v0 = vsel %vm2599_vm14, %v2601_v10, %v2597_v52  ;;  %v2634_v6 = vsel %vm2633_vm9, %v3087_v4, %v2630_v48 }
0x24d5   :  { %v2639_v23 = vsel %vm2636_vm10, %v2638_v40, %v2634_v6  ;;  %v2605_v19 = vmul.f32 %v2602_v0, %v2488_v31 }
0x24d6   :  { %v2642_v12 = vmul.f32 %v2639_v23, %v2526_v47 }
0x252d   :  { %v2608_v55 = vpop.permute.xlu0 %2607 }
0x252e   :  { %v2610_v2 = vmul.f32 %v2608_v55, %v2602_v0 }
0x2530   :  { %2612 = vrot.lane.b32.xlu2 %v2610_v2, %s3150_s24 }
0x2533   :  { %v2645_v60 = vpop.permute.xlu1 %2644 }
0x2534   :  { %v2647_v30 = vmul.f32 %v2645_v60, %v2639_v23 }
0x2536   :  { %2649 = vrot.lane.b32.xlu0 %v2647_v30, %s3150_s24 }
0x258a   :  { %v2613_v27 = vpop.permute.xlu2 %2612 }
0x258b   :  { %v2615_v32 = vadd.f32 %v2613_v27, %v2605_v19 }
0x258d   :  { %3088 = vtanh.f32 %v2615_v32 }
0x2593   :  { %v3089_v34 = vpop.eup %3088 }
0x2594   :  { %2618 = vrot.lane.b32.xlu1 %v3089_v34, %s3150_s24 }
0x25a8   :  { %v2650_v41 = vpop.permute.xlu0 %2649 }
0x25a9   :  { %v2652_v7 = vadd.f32 %v2650_v41, %v2642_v12 }
0x25ab   :  { %3090 = vtanh.f32 %v2652_v7 }
0x25b1   :  { %v3091_v44 = vpop.eup %3090 }
0x25b2   :  { %2655 = vrot.lane.b32.xlu2 %v3091_v44, %s3150_s24 }
0x2606   :  { %v2619_v33 = vpop.permute.xlu1 %2618 }
0x2607   :  { %v2621_v38 = vmul.f32 %v2619_v33, %v2602_v0 }
0x2609   :  { %v2659_v57 = vsel %vm4560_vm0, %v2621_v38, %v4461_v25  ;;  %v2671_v25 = vld [vmem:[%s4542_s9 + $0x8] sm:$0xff] }
0x260a   :  { %2662 = vrot.lane.b32.xlu0 %v2659_v57, %s3151_s0  ;;  %2699 = vmatpush.msrb.mxu1 %v2671_v25 }
0x260c   :  { %v2656_v42 = vpop.permute.xlu2 %2655  ;;  %2700 = vmatpush.msrb.mxu1 %v2670_v62 }
0x260d   :  { %v2658_v11 = vmul.f32 %v2656_v42, %v2639_v23 }
0x260f   :  { %v2660_v46 = vsel %vm4561_vm1, %v2658_v11, %v4468_v59 }
0x2610   :  { %2666 = vrot.lane.b32.xlu1 %v2660_v46, %s3152_s26 }
0x267c   :  { %v2663_v59 = vpop.permute.xlu0 %2662 }
0x2682   :  { %v2667_v1 = vpop.permute.xlu1 %2666 }
0x2683   :  { %v2669_v35 = vsel %vm457_vm6, %v2663_v59, %v2667_v1 }
0x2684   :  { %2822 = vmatmul.msk.f32.vlgmr.msrb.gmra.mxu1 %vm209_vm4, %v2669_v35 }
0x2701   :  { %v2702_v43 = vpop.f32.mrf.mxu1 }
0x2702   :  { %v2703_v28 = vadd.f32 %v2835_v58, %v2702_v43 }
0x2704   :  { %2706 = vst.msk [vmem:[%s4544_s11] sm:$0xff] %vm2705_vm11, %v2703_v28 }
0x2705   :  { %2711 = vsyncpa [#allocation5], 1 }
0x2706   :  { %2712 = vsyncpa [#allocation7], 1 }

</bundles_post_ra>
